<compile_context>
chip_gen: v6e
topology: v6e:2x2x1
jax: 0.10.0
libtpu: 0.0.40
codegen_flags: <defaults>
</compile_context>

<pallas_src>
import math
import jax
import jax.numpy as jnp
from jax.experimental import pallas as pl
from jax.experimental.pallas import tpu as pltpu

IN_DIM = 512
LAYER_DIMS = [512, 1024, 256]
OUT_DIM = 10
OUT_PAD = 128          # lane-dense padded output width
BATCH_SIZE = 32
TILE_B = 32            # whole batch in one grid step


def mlp_kernel(x_ref,
               w0_ref, b0_ref,
               w1_ref, b1_ref,
               w2_ref, b2_ref,
               w3_ref, b3_ref,
               o_ref):
    # Whole fused MLP for one batch tile. Weights are bf16 in VMEM; matmuls
    # accumulate in f32 on the MXU; bias-add / ReLU run in f32 on the VPU.
    h = x_ref[...]  # f32 [TILE_B, IN_DIM]

    h = jnp.dot(h.astype(jnp.bfloat16), w0_ref[...],
                preferred_element_type=jnp.float32) + b0_ref[...]
    h = jnp.maximum(h, 0.0)

    h = jnp.dot(h.astype(jnp.bfloat16), w1_ref[...],
                preferred_element_type=jnp.float32) + b1_ref[...]
    h = jnp.maximum(h, 0.0)

    h = jnp.dot(h.astype(jnp.bfloat16), w2_ref[...],
                preferred_element_type=jnp.float32) + b2_ref[...]
    h = jnp.maximum(h, 0.0)

    out = jnp.dot(h.astype(jnp.bfloat16), w3_ref[...],
                  preferred_element_type=jnp.float32) + b3_ref[...]
    o_ref[...] = out.astype(o_ref.dtype)


def _prepare_params(params):
    """Cast weights to bf16; zero-pad the final layer's out-dim to OUT_PAD lanes."""
    prepared = []
    for li, (w, b) in enumerate(params):
        if li == len(params) - 1:
            w = jnp.pad(w, ((0, 0), (0, OUT_PAD - w.shape[1])))
            b = jnp.pad(b, ((0, 0), (0, OUT_PAD - b.shape[1])))
        prepared.append((w.astype(jnp.bfloat16), b.astype(jnp.float32)))
    return prepared


def my_network_forward(x, params):
    """x: [B, IN_DIM] float32; params: list of (W [in,out] f32, b [1,out] f32)."""
    B = x.shape[0]
    assert B % TILE_B == 0

    prepared = _prepare_params(params)

    # Full-array blocks for weights/biases (constant index across the grid).
    weight_specs = []
    flat_params = []
    flops = 0
    bytes_accessed = x.size * x.dtype.itemsize + B * OUT_PAD * 4
    for (w, b) in prepared:
        weight_specs.append(pl.BlockSpec(w.shape, lambda i: (0, 0)))
        weight_specs.append(pl.BlockSpec(b.shape, lambda i: (0, 0)))
        flat_params.extend([w, b])
        flops += 2 * B * w.shape[0] * w.shape[1]
        bytes_accessed += w.size * 2 + b.size * 4

    grid_spec = pltpu.PrefetchScalarGridSpec(
        num_scalar_prefetch=0,
        grid=(B // TILE_B,),
        in_specs=[pl.BlockSpec((TILE_B, IN_DIM), lambda i: (i, 0))] + weight_specs,
        out_specs=pl.BlockSpec((TILE_B, OUT_PAD), lambda i: (i, 0)),
    )

    out_padded = pl.pallas_call(
        mlp_kernel,
        out_shape=jax.ShapeDtypeStruct((B, OUT_PAD), jnp.float32),
        grid_spec=grid_spec,
        compiler_params=pltpu.CompilerParams(
            dimension_semantics=("arbitrary",)),
        cost_estimate=pl.CostEstimate(
            flops=flops, transcendentals=0, bytes_accessed=bytes_accessed),
    )(x, *flat_params)

    return out_padded[:, :OUT_DIM]


def init_params(key):
    """Deterministic init matching PyTorch nn.Linear default (U[-1/sqrt(fan_in), +])."""
    dims = [IN_DIM] + LAYER_DIMS + [OUT_DIM]
    params = []
    for i in range(len(dims) - 1):
        fan_in, fan_out = dims[i], dims[i + 1]
        key, kw, kb = jax.random.split(key, 3)
        bound = 1.0 / math.sqrt(fan_in)
        w = jax.random.uniform(kw, (fan_in, fan_out), jnp.float32, -bound, bound)
        b = jax.random.uniform(kb, (1, fan_out), jnp.float32, -bound, bound)
        params.append((w, b))
    return params


def reference_forward(x, params):
    """Pure-JAX f32 reference of the original PyTorch forward."""
    h = x
    for i, (w, b) in enumerate(params):
        h = h @ w + b
        if i < len(params) - 1:
            h = jnp.maximum(h, 0.0)
    return h


if __name__ == "__main__":
    key = jax.random.PRNGKey(0)
    key, kx = jax.random.split(key)
    x = jax.random.normal(kx, (BATCH_SIZE, IN_DIM), jnp.float32)
    params = init_params(key)

    out = my_network_forward(x, params)
    out = jax.block_until_ready(out)

    ref = reference_forward(x, params)
    assert out.shape == (BATCH_SIZE, OUT_DIM)
    # bf16 weights/activations with f32 accumulation -> loosened tolerance vs f32 ref.
    assert jnp.allclose(out, ref, atol=5e-2, rtol=5e-2), float(
        jnp.max(jnp.abs(out - ref)))

    print("KERNEL_OK")
</pallas_src>

<mosaic_0001>
module attributes {stable_mosaic.version = 11 : i64} {
  func.func @mlp_kernel(%arg0: i32, %arg1: memref<32x512xf32, #tpu.memory_space<vmem>>, %arg2: memref<512x512xbf16, #tpu.memory_space<vmem>>, %arg3: memref<1x512xf32, #tpu.memory_space<vmem>>, %arg4: memref<512x1024xbf16, #tpu.memory_space<vmem>>, %arg5: memref<1x1024xf32, #tpu.memory_space<vmem>>, %arg6: memref<1024x256xbf16, #tpu.memory_space<vmem>>, %arg7: memref<1x256xf32, #tpu.memory_space<vmem>>, %arg8: memref<256x128xbf16, #tpu.memory_space<vmem>>, %arg9: memref<1x128xf32, #tpu.memory_space<vmem>>, %arg10: memref<32x128xf32, #tpu.memory_space<vmem>>) attributes {dimension_semantics = [#tpu.dimension_semantics<arbitrary>], iteration_bounds = array<i64: 1>, scalar_prefetch = 0 : i64, scratch_operands = 0 : i64, tpu.core_type = #tpu.core_type<tc>, window_params = [{transform_indices = @transform_0, window_bounds = array<i64: 32, 512>}, {pipeline_mode = #tpu.pipeline_mode<synchronous>, transform_indices = @transform_1, window_bounds = array<i64: 512, 512>}, {pipeline_mode = #tpu.pipeline_mode<synchronous>, transform_indices = @transform_2, window_bounds = array<i64: 1, 512>}, {pipeline_mode = #tpu.pipeline_mode<synchronous>, transform_indices = @transform_3, window_bounds = array<i64: 512, 1024>}, {pipeline_mode = #tpu.pipeline_mode<synchronous>, transform_indices = @transform_4, window_bounds = array<i64: 1, 1024>}, {pipeline_mode = #tpu.pipeline_mode<synchronous>, transform_indices = @transform_5, window_bounds = array<i64: 1024, 256>}, {pipeline_mode = #tpu.pipeline_mode<synchronous>, transform_indices = @transform_6, window_bounds = array<i64: 1, 256>}, {pipeline_mode = #tpu.pipeline_mode<synchronous>, transform_indices = @transform_7, window_bounds = array<i64: 256, 128>}, {pipeline_mode = #tpu.pipeline_mode<synchronous>, transform_indices = @transform_8, window_bounds = array<i64: 1, 128>}, {transform_indices = @transform_9, window_bounds = array<i64: 32, 128>}]} {
    %c0 = arith.constant 0 : index
    %c0_0 = arith.constant 0 : index
    %0 = vector.load %arg1[%c0, %c0_0] : memref<32x512xf32, #tpu.memory_space<vmem>>, vector<32x512xf32>
    %1 = arith.truncf %0 : vector<32x512xf32> to vector<32x512xbf16>
    %c0_1 = arith.constant 0 : index
    %c0_2 = arith.constant 0 : index
    %2 = vector.load %arg2[%c0_1, %c0_2] : memref<512x512xbf16, #tpu.memory_space<vmem>>, vector<512x512xbf16>
    %cst = arith.constant dense<0.000000e+00> : vector<32x512xf32>
    %3 = tpu.matmul %1, %2, %cst {dimension_numbers = #tpu.dot_dimension_numbers<[1], [0], [0], [1], [0, 0, 1, 1], [], []>} : vector<32x512xbf16>, vector<512x512xbf16>, vector<32x512xf32> -> vector<32x512xf32>
    %c0_3 = arith.constant 0 : index
    %c0_4 = arith.constant 0 : index
    %4 = vector.load %arg3[%c0_3, %c0_4] : memref<1x512xf32, #tpu.memory_space<vmem>>, vector<1x512xf32>
    %5 = vector.broadcast %4 : vector<1x512xf32> to vector<32x512xf32>
    %6 = arith.addf %3, %5 : vector<32x512xf32>
    %cst_5 = arith.constant 0.000000e+00 : f32
    %7 = vector.broadcast %cst_5 : f32 to vector<32x512xf32>
    %8 = arith.maximumf %6, %7 : vector<32x512xf32>
    %9 = arith.truncf %8 : vector<32x512xf32> to vector<32x512xbf16>
    %c0_6 = arith.constant 0 : index
    %c0_7 = arith.constant 0 : index
    %10 = vector.load %arg4[%c0_6, %c0_7] : memref<512x1024xbf16, #tpu.memory_space<vmem>>, vector<512x1024xbf16>
    %cst_8 = arith.constant dense<0.000000e+00> : vector<32x1024xf32>
    %11 = tpu.matmul %9, %10, %cst_8 {dimension_numbers = #tpu.dot_dimension_numbers<[1], [0], [0], [1], [0, 0, 1, 1], [], []>} : vector<32x512xbf16>, vector<512x1024xbf16>, vector<32x1024xf32> -> vector<32x1024xf32>
    %c0_9 = arith.constant 0 : index
    %c0_10 = arith.constant 0 : index
    %12 = vector.load %arg5[%c0_9, %c0_10] : memref<1x1024xf32, #tpu.memory_space<vmem>>, vector<1x1024xf32>
    %13 = vector.broadcast %12 : vector<1x1024xf32> to vector<32x1024xf32>
    %14 = arith.addf %11, %13 : vector<32x1024xf32>
    %cst_11 = arith.constant 0.000000e+00 : f32
    %15 = vector.broadcast %cst_11 : f32 to vector<32x1024xf32>
    %16 = arith.maximumf %14, %15 : vector<32x1024xf32>
    %17 = arith.truncf %16 : vector<32x1024xf32> to vector<32x1024xbf16>
    %c0_12 = arith.constant 0 : index
    %c0_13 = arith.constant 0 : index
    %18 = vector.load %arg6[%c0_12, %c0_13] : memref<1024x256xbf16, #tpu.memory_space<vmem>>, vector<1024x256xbf16>
    %cst_14 = arith.constant dense<0.000000e+00> : vector<32x256xf32>
    %19 = tpu.matmul %17, %18, %cst_14 {dimension_numbers = #tpu.dot_dimension_numbers<[1], [0], [0], [1], [0, 0, 1, 1], [], []>} : vector<32x1024xbf16>, vector<1024x256xbf16>, vector<32x256xf32> -> vector<32x256xf32>
    %c0_15 = arith.constant 0 : index
    %c0_16 = arith.constant 0 : index
    %20 = vector.load %arg7[%c0_15, %c0_16] : memref<1x256xf32, #tpu.memory_space<vmem>>, vector<1x256xf32>
    %21 = vector.broadcast %20 : vector<1x256xf32> to vector<32x256xf32>
    %22 = arith.addf %19, %21 : vector<32x256xf32>
    %cst_17 = arith.constant 0.000000e+00 : f32
    %23 = vector.broadcast %cst_17 : f32 to vector<32x256xf32>
    %24 = arith.maximumf %22, %23 : vector<32x256xf32>
    %25 = arith.truncf %24 : vector<32x256xf32> to vector<32x256xbf16>
    %c0_18 = arith.constant 0 : index
    %c0_19 = arith.constant 0 : index
    %26 = vector.load %arg8[%c0_18, %c0_19] : memref<256x128xbf16, #tpu.memory_space<vmem>>, vector<256x128xbf16>
    %cst_20 = arith.constant dense<0.000000e+00> : vector<32x128xf32>
    %27 = tpu.matmul %25, %26, %cst_20 {dimension_numbers = #tpu.dot_dimension_numbers<[1], [0], [0], [1], [0, 0, 1, 1], [], []>} : vector<32x256xbf16>, vector<256x128xbf16>, vector<32x128xf32> -> vector<32x128xf32>
    %c0_21 = arith.constant 0 : index
    %c0_22 = arith.constant 0 : index
    %28 = vector.load %arg9[%c0_21, %c0_22] : memref<1x128xf32, #tpu.memory_space<vmem>>, vector<1x128xf32>
    %29 = vector.broadcast %28 : vector<1x128xf32> to vector<32x128xf32>
    %30 = arith.addf %27, %29 : vector<32x128xf32>
    %c0_23 = arith.constant 0 : index
    %c0_24 = arith.constant 0 : index
    %31 = vector.load %arg10[%c0_23, %c0_24] : memref<32x128xf32, #tpu.memory_space<vmem>>, vector<32x128xf32>
    tpu.vector_store %arg10[%c0_23, %c0_24], %30 {strides = array<i32>} : memref<32x128xf32, #tpu.memory_space<vmem>>, vector<32x128xf32>,
    return
  }
  func.func @transform_0(%arg0: i32) -> (i32, i32) {
    %c0_i32 = arith.constant 0 : i32
    %c0_i32_0 = arith.constant 0 : i32
    return %arg0, %c0_i32 : i32, i32
  }
  func.func @transform_1(%arg0: i32) -> (i32, i32) {
    %c0_i32 = arith.constant 0 : i32
    %c0_i32_0 = arith.constant 0 : i32
    %c0_i32_1 = arith.constant 0 : i32
    return %c0_i32, %c0_i32_0 : i32, i32
  }
  func.func @transform_2(%arg0: i32) -> (i32, i32) {
    %c0_i32 = arith.constant 0 : i32
    %c0_i32_0 = arith.constant 0 : i32
    %c0_i32_1 = arith.constant 0 : i32
    return %c0_i32, %c0_i32_0 : i32, i32
  }
  func.func @transform_3(%arg0: i32) -> (i32, i32) {
    %c0_i32 = arith.constant 0 : i32
    %c0_i32_0 = arith.constant 0 : i32
    %c0_i32_1 = arith.constant 0 : i32
    return %c0_i32, %c0_i32_0 : i32, i32
  }
  func.func @transform_4(%arg0: i32) -> (i32, i32) {
    %c0_i32 = arith.constant 0 : i32
    %c0_i32_0 = arith.constant 0 : i32
    %c0_i32_1 = arith.constant 0 : i32
    return %c0_i32, %c0_i32_0 : i32, i32
  }
  func.func @transform_5(%arg0: i32) -> (i32, i32) {
    %c0_i32 = arith.constant 0 : i32
    %c0_i32_0 = arith.constant 0 : i32
    %c0_i32_1 = arith.constant 0 : i32
    return %c0_i32, %c0_i32_0 : i32, i32
  }
  func.func @transform_6(%arg0: i32) -> (i32, i32) {
    %c0_i32 = arith.constant 0 : i32
    %c0_i32_0 = arith.constant 0 : i32
    %c0_i32_1 = arith.constant 0 : i32
    return %c0_i32, %c0_i32_0 : i32, i32
  }
  func.func @transform_7(%arg0: i32) -> (i32, i32) {
    %c0_i32 = arith.constant 0 : i32
    %c0_i32_0 = arith.constant 0 : i32
    %c0_i32_1 = arith.constant 0 : i32
    return %c0_i32, %c0_i32_0 : i32, i32
  }
  func.func @transform_8(%arg0: i32) -> (i32, i32) {
    %c0_i32 = arith.constant 0 : i32
    %c0_i32_0 = arith.constant 0 : i32
    %c0_i32_1 = arith.constant 0 : i32
    return %c0_i32, %c0_i32_0 : i32, i32
  }
  func.func @transform_9(%arg0: i32) -> (i32, i32) {
    %c0_i32 = arith.constant 0 : i32
    %c0_i32_0 = arith.constant 0 : i32
    return %arg0, %c0_i32 : i32, i32
  }
}

</mosaic_0001>

<bundles_post_ra>
// kernel: tpu_custom_call.1
= control target key start
LH: loop header
LB: loop body
LE: loop exit
PB: predicated region body
PF: predicated region fallthrough
CT: control target
= control target key end

     0   :  { %14 = vsyncpa [#allocation3], 0  ;;  %s5850_s0 = inlined_call_operand.hbm [shape: f32[32,512], index: 0, kind: input, shape index: {}]   ;;  %s5851_s1 = inlined_call_operand.hbm [shape: bf16[512,512], index: 1, kind: input, shape index: {}]   ;;  %s5852_s2 = inlined_call_operand.hbm [shape: f32[1,512], index: 2, kind: input, shape index: {}]   ;;  %s5853_s3 = inlined_call_operand.hbm [shape: bf16[512,1024], index: 3, kind: input, shape index: {}]   ;;  %s5854_s4 = inlined_call_operand.hbm [shape: f32[1,1024], index: 4, kind: input, shape index: {}]   ;;  %s5855_s5 = inlined_call_operand.hbm [shape: bf16[1024,256], index: 5, kind: input, shape index: {}]   ;;  %s5856_s6 = inlined_call_operand.vmem [shape: f32[1,256], index: 6, kind: input, shape index: {}]   ;;  %s5857_s7 = inlined_call_operand.hbm [shape: bf16[256,128], index: 7, kind: input, shape index: {}]   ;;  %s5858_s8 = inlined_call_operand.vmem [shape: f32[1,128], index: 8, kind: input, shape index: {}]   ;;  %s5859_s9 = inlined_call_operand.hbm [shape: f32[32,128], index: 9, kind: output, shape index: {}]  }
   0x1   :  { %15 = vsyncpa [#allocation6], 0 }
   0x2   :  { %16 = vsyncpa [#allocation9], 0 }
   0x3   :  { %17 = vsyncpa [#allocation12], 0 }
   0x4   :  { %18 = vsyncpa [#allocation4], 0  ;;  %s5596_s30 = smov [#allocation5]  }
   0x5   :  { %s36_s10 = sshll.u32 %s5596_s30, 4  ;;  %s37_s10 = int_to_ptr.vmem [resolvable:$true] %s36_s10 }
   0x6   :  { %s5434_s11 = scalar_lea.vmem %s37_s10, 16384  ;;  %p5439_p1 = scmp.lt.s32.totalorder %s37_s10, %s37_s10 }
   0x7   :  { %p5435_p0 = scmp.ne.s32.totalorder %s37_s10, %s5434_s11  ;;  %p5440_p2 = scmp.lt.s32.totalorder %s5434_s11, %s5434_s11 }
   0x9   :  { %p5441_p3 = por %p5440_p2, %p5439_p1 }
   0xb   :  { %p5442_p4 = pnand %p5441_p3, %p5435_p0 }
   0xd   :  { %5445 = shalt.err (!%p5442_p4)
}
   0xe   :  { %s5597_s12 = smov 256   ;;  %s5598_s13 = smov 16  }
   0xf   :  { %42 = dma.hbm_to_vmem [thread:$0]  %s5851_s1, 16384, %s37_s10, [#allocation6], %s5597_s12, %s5597_s12, %s5598_s13  }
  0x10   :  { %s5599_s16 = smov [#allocation8]   ;;  %s5600_s18 = smov [#allocation11]  }
  0x11   :  { %s58_s17 = sshll.u32 %s5599_s16, 4  ;;  %s80_s19 = sshll.u32 %s5600_s18, 4  ;;  %s59_s17 = int_to_ptr.vmem [resolvable:$true] %s58_s17  ;;  %s81_s19 = int_to_ptr.vmem [resolvable:$true] %s80_s19 }
  0x12   :  { %s5454_s20 = scalar_lea.vmem %s59_s17, 32768  ;;  %p5459_p6 = scmp.lt.s32.totalorder %s59_s17, %s59_s17 }
  0x13   :  { %p5455_p5 = scmp.ne.s32.totalorder %s59_s17, %s5454_s20  ;;  %p5460_p7 = scmp.lt.s32.totalorder %s5454_s20, %s5454_s20 }
  0x15   :  { %p5461_p8 = por %p5460_p7, %p5459_p6 }
  0x17   :  { %p5462_p9 = pnand %p5461_p8, %p5455_p5 }
  0x19   :  { %5465 = shalt.err (!%p5462_p9)
}
  0x1a   :  { %s5601_s21 = smov 512   ;;  %s5602_s22 = smov 32  }
  0x1b   :  { %64 = dma.hbm_to_vmem [thread:$0]  %s5853_s3, 32768, %s59_s17, [#allocation9], %s5601_s21, %s5601_s21, %s5602_s22  }
  0x1c   :  { %s5474_s1 = scalar_lea.vmem %s81_s19, 16384  ;;  %p5479_p11 = scmp.lt.s32.totalorder %s81_s19, %s81_s19 }
  0x1d   :  { %p5475_p10 = scmp.ne.s32.totalorder %s81_s19, %s5474_s1  ;;  %p5480_p12 = scmp.lt.s32.totalorder %s5474_s1, %s5474_s1 }
  0x1f   :  { %p5481_p13 = por %p5480_p12, %p5479_p11 }
  0x21   :  { %p5482_p0 = pnand %p5481_p13, %p5475_p10 }
  0x23   :  { %5485 = shalt.err (!%p5482_p0)
}
  0x24   :  { %s5603_s25 = smov 128   ;;  %s5604_s26 = smov 8  }
  0x25   :  { %86 = dma.hbm_to_vmem [thread:$0]  %s5855_s5, 16384, %s81_s19, [#allocation12], %s5603_s25, %s5603_s25, %s5604_s26  }
  0x26   :  { %s5605_s29 = smov [#allocation2]   ;;  %s5606_s3 = smov [#allocation7]  }
  0x27   :  { %s24_s30 = sshll.u32 %s5605_s29, 4  ;;  %s49_s10 = sshll.u32 %s5606_s3, 4  ;;  %s25_s30 = int_to_ptr.vmem [resolvable:$true] %s24_s30  ;;  %s50_s10 = int_to_ptr.vmem [resolvable:$true] %s49_s10 }
  0x28   :  { %s5494_s11 = scalar_lea.vmem %s25_s30, 2048  ;;  %p5499_p2 = scmp.lt.s32.totalorder %s25_s30, %s25_s30 }
  0x29   :  { %p5495_p1 = scmp.ne.s32.totalorder %s25_s30, %s5494_s11  ;;  %p5500_p3 = scmp.lt.s32.totalorder %s5494_s11, %s5494_s11 }
  0x2b   :  { %p5501_p4 = por %p5500_p3, %p5499_p2 }
  0x2d   :  { %p5502_p5 = pnand %p5501_p4, %p5495_p1 }
  0x2f   :  { %5505 = shalt.err (!%p5502_p5)
}
  0x30   :  { %30 = dma.hbm_to_vmem [thread:$0]  %s5850_s0, 2048, %s25_s30, [#allocation3], %s5601_s21, %s5601_s21, %s5602_s22  }
  0x31   :  { %s5514_s14 = scalar_lea.vmem %s50_s10, 64  ;;  %p5519_p7 = scmp.lt.s32.totalorder %s50_s10, %s50_s10 }
  0x32   :  { %p5515_p6 = scmp.ne.s32.totalorder %s50_s10, %s5514_s14  ;;  %p5520_p8 = scmp.lt.s32.totalorder %s5514_s14, %s5514_s14 }
  0x34   :  { %p5521_p9 = por %p5520_p8, %p5519_p7 }
  0x36   :  { %p5522_p10 = pnand %p5521_p9, %p5515_p6 }
  0x38   :  { %5525 = shalt.err (!%p5522_p10)
}
  0x39   :  { %52 = dma.hbm_to_vmem [thread:$0]  %s5852_s2, 64, %s50_s10, [#allocation6]  }
  0x3a   :  { %s5607_s16 = smov [#allocation10]   ;;  %s5608_s18 = smov [#allocation13]  }
  0x3b   :  { %s71_s17 = sshll.u32 %s5607_s16, 4  ;;  %s94_s19 = sshll.u32 %s5608_s18, 4  ;;  %s72_s17 = int_to_ptr.vmem [resolvable:$true] %s71_s17  ;;  %s95_s19 = int_to_ptr.vmem [resolvable:$true] %s94_s19 }
  0x3c   :  { %s5534_s20 = scalar_lea.vmem %s72_s17, 128  ;;  %p5539_p12 = scmp.lt.s32.totalorder %s72_s17, %s72_s17 }
  0x3d   :  { %p5535_p11 = scmp.ne.s32.totalorder %s72_s17, %s5534_s20  ;;  %p5540_p13 = scmp.lt.s32.totalorder %s5534_s20, %s5534_s20 }
  0x3f   :  { %p5541_p0 = por %p5540_p13, %p5539_p12 }
  0x41   :  { %p5542_p1 = pnand %p5541_p0, %p5535_p11 }
  0x43   :  { %5545 = shalt.err (!%p5542_p1)
}
  0x44   :  { %74 = dma.hbm_to_vmem [thread:$0]  %s5854_s4, 128, %s72_s17, [#allocation9]  }
  0x45   :  { %s5554_s22 = scalar_lea.vmem %s95_s19, 2048  ;;  %p5559_p3 = scmp.lt.s32.totalorder %s95_s19, %s95_s19 }
  0x46   :  { %p5555_p2 = scmp.ne.s32.totalorder %s95_s19, %s5554_s22  ;;  %p5560_p4 = scmp.lt.s32.totalorder %s5554_s22, %s5554_s22 }
  0x48   :  { %p5561_p5 = por %p5560_p4, %p5559_p3 }
  0x4a   :  { %p5562_p6 = pnand %p5561_p5, %p5555_p2 }
  0x4c   :  { %5565 = shalt.err (!%p5562_p6)
}
  0x4d   :  { %s5609_s2 = smov 64   ;;  %s5610_s23 = smov 4  }
  0x4e   :  { %100 = dma.hbm_to_vmem [thread:$0]  %s5857_s7, 2048, %s95_s19, [#allocation12], %s5609_s2, %s5609_s2, %s5610_s23  }
  0x4f   :  { %5586 = dma.done.wait [#allocation3], 2048  }
  0x50   :  { %5587 = vsyncadd [#allocation3], 4294965248 }
  0x51   :  { %5588 = dma.done.wait [#allocation6], 16448  }
  0x52   :  { %5589 = vsyncadd [#allocation6], 4294950848 }
  0x53   :  { %5590 = dma.done.wait [#allocation9], 32896  }
  0x54   :  { %5591 = vsyncadd [#allocation9], 4294934400 }
  0x55   :  { %5592 = dma.done.wait [#allocation12], 18432  }
  0x56   :  { %5593 = vsyncadd [#allocation12], 4294948864  ;;  %v5026_v0 = vld [vmem:[#allocation5 + $0xe4] ss:$16 sps:$4 sm:$0xff]   ;;  %v5030_v2 = vld [vmem:[#allocation5 + $0xe0] ss:$16 sps:$4 sm:$0xff]  }
  0x57   :  { %v5028_v1 = vld [vmem:[#allocation5 + $0x2e4] ss:$16 sps:$4 sm:$0xff]   ;;  %939 = vmatprep.subr.bf16.mxu0 %v5026_v0  ;;  %v5031_v3 = vld [vmem:[#allocation5 + $0x2e0] ss:$16 sps:$4 sm:$0xff]   ;;  %v126_v46 = vld [vmem:[#allocation2 + $0x8] sm:$0xff]  ;;  %s5611_s28 = smov [#allocation14]  }
  0x58   :  { %992 = vmatprep.subr.bf16.mxu1 %v5028_v1  ;;  %v5032_v4 = vld [vmem:[#allocation5 + $0xc4] ss:$16 sps:$4 sm:$0xff]   ;;  %940 = vmatpush1.bf16.msra.mxu0 %v5030_v2  ;;  %v5036_v6 = vld [vmem:[#allocation5 + $0xc0] ss:$16 sps:$4 sm:$0xff]   ;;  %v130_v47 = vld [vmem:[#allocation2 + $0x28] sm:$0xff]  ;;  %s4422_s29 = sshll.u32 %s5611_s28, 4  ;;  %s4423_s29 = int_to_ptr.vmem [resolvable:$true] %s4422_s29 }
  0x59   :  { %993 = vmatpush1.bf16.msra.mxu1 %v5031_v3  ;;  %v5034_v5 = vld [vmem:[#allocation5 + $0x2c4] ss:$16 sps:$4 sm:$0xff]   ;;  %941 = vmatprep.subr.bf16.mxu0 %v5032_v4  ;;  %v5037_v7 = vld [vmem:[#allocation5 + $0x2c0] ss:$16 sps:$4 sm:$0xff]   ;;  %v128_v48 = vld [vmem:[#allocation2 + $0x18] sm:$0xff]  ;;  %v5686_v53 = vpack.c.bf16 %v130_v47, %v126_v46  ;;  %p5571_p8 = scmp.lt.s32.totalorder %s4423_s29, %s4423_s29 }
  0x5a   :  { %994 = vmatprep.subr.bf16.mxu1 %v5034_v5  ;;  %v5038_v8 = vld [vmem:[#allocation5 + $0xa4] ss:$16 sps:$4 sm:$0xff]   ;;  %v5042_v10 = vld [vmem:[#allocation5 + $0xa0] ss:$16 sps:$4 sm:$0xff]   ;;  %v132_v49 = vld [vmem:[#allocation2 + $0x38] sm:$0xff] }
  0x5b   :  { %v5040_v9 = vld [vmem:[#allocation5 + $0x2a4] ss:$16 sps:$4 sm:$0xff]   ;;  %v5043_v11 = vld [vmem:[#allocation5 + $0x2a0] ss:$16 sps:$4 sm:$0xff]   ;;  %v5688_v54 = vpack.c.bf16 %v132_v49, %v128_v48  ;;  %971 = vmatprep.mubr.bf16.mxu0 %v5686_v53  ;;  %v5152_v46 = vld [vmem:[#allocation5 + $0x48] ss:$16 sps:$4 sm:$0xff]  }
  0x5c   :  { %942 = vmatpush1.bf16.msra.mxu0 %v5036_v6  ;;  %v5044_v12 = vld [vmem:[#allocation5 + $0x84] ss:$16 sps:$4 sm:$0xff]   ;;  %v5048_v14 = vld [vmem:[#allocation5 + $0x80] ss:$16 sps:$4 sm:$0xff]   ;;  %v5155_v47 = vld [vmem:[#allocation5 + $0x248] ss:$16 sps:$4 sm:$0xff]  }
  0x5d   :  { %995 = vmatpush1.bf16.msra.mxu1 %v5037_v7  ;;  %943 = vmatprep.subr.bf16.mxu0 %v5038_v8  ;;  %v5046_v13 = vld [vmem:[#allocation5 + $0x284] ss:$16 sps:$4 sm:$0xff]   ;;  %v5049_v15 = vld [vmem:[#allocation5 + $0x280] ss:$16 sps:$4 sm:$0xff]   ;;  %v5160_v48 = vld [vmem:[#allocation5 + $0x2c] ss:$16 sps:$4 sm:$0xff]  }
  0x5e   :  { %996 = vmatprep.subr.bf16.mxu1 %v5040_v9  ;;  %v5050_v16 = vld [vmem:[#allocation5 + $0x64] ss:$16 sps:$4 sm:$0xff]   ;;  %v5054_v18 = vld [vmem:[#allocation5 + $0x60] ss:$16 sps:$4 sm:$0xff]   ;;  %1024 = vmatprep.mubr.bf16.mxu1 %v5688_v54  ;;  %v5163_v49 = vld [vmem:[#allocation5 + $0x22c] ss:$16 sps:$4 sm:$0xff]  }
  0x5f   :  { %v5052_v17 = vld [vmem:[#allocation5 + $0x264] ss:$16 sps:$4 sm:$0xff]   ;;  %v5055_v19 = vld [vmem:[#allocation5 + $0x260] ss:$16 sps:$4 sm:$0xff]  }
  0x60   :  { %944 = vmatpush1.bf16.msra.mxu0 %v5042_v10  ;;  %v5056_v20 = vld [vmem:[#allocation5 + $0x44] ss:$16 sps:$4 sm:$0xff]   ;;  %v5060_v22 = vld [vmem:[#allocation5 + $0x40] ss:$16 sps:$4 sm:$0xff]   ;;  %v5124_v10 = vld [vmem:[#allocation5 + $0xec] ss:$16 sps:$4 sm:$0xff]  }
  0x61   :  { %997 = vmatpush1.bf16.msra.mxu1 %v5043_v11  ;;  %945 = vmatprep.subr.bf16.mxu0 %v5044_v12  ;;  %v5058_v21 = vld [vmem:[#allocation5 + $0x244] ss:$16 sps:$4 sm:$0xff]   ;;  %v5061_v23 = vld [vmem:[#allocation5 + $0x240] ss:$16 sps:$4 sm:$0xff]   ;;  %v5127_v11 = vld [vmem:[#allocation5 + $0x2ec] ss:$16 sps:$4 sm:$0xff]  }
  0x62   :  { %998 = vmatprep.subr.bf16.mxu1 %v5046_v13  ;;  %v5062_v24 = vld [vmem:[#allocation5 + $0x24] ss:$16 sps:$4 sm:$0xff]   ;;  %v5066_v26 = vld [vmem:[#allocation5 + $0x20] ss:$16 sps:$4 sm:$0xff]   ;;  %v5122_v12 = vld [vmem:[#allocation5 + $0xe8] ss:$16 sps:$4 sm:$0xff]  }
  0x63   :  { %v5064_v25 = vld [vmem:[#allocation5 + $0x224] ss:$16 sps:$4 sm:$0xff]   ;;  %v5067_v27 = vld [vmem:[#allocation5 + $0x220] ss:$16 sps:$4 sm:$0xff]   ;;  %v5125_v13 = vld [vmem:[#allocation5 + $0x2e8] ss:$16 sps:$4 sm:$0xff]  }
  0x64   :  { %946 = vmatpush1.bf16.msra.mxu0 %v5048_v14  ;;  %v5068_v28 = vld [vmem:[#allocation5 + $0x4] ss:$16 sps:$4 sm:$0xff]   ;;  %v5072_v30 = vld [vmem:[#allocation5] ss:$16 sps:$4 sm:$0xff]   ;;  %v134_v14 = vld [vmem:[#allocation2 + $0x48] sm:$0xff] }
  0x65   :  { %999 = vmatpush1.bf16.msra.mxu1 %v5049_v15  ;;  %947 = vmatprep.subr.bf16.mxu0 %v5050_v16  ;;  %v5070_v29 = vld [vmem:[#allocation5 + $0x204] ss:$16 sps:$4 sm:$0xff]   ;;  %v5073_v31 = vld [vmem:[#allocation5 + $0x200] ss:$16 sps:$4 sm:$0xff]   ;;  %v138_v15 = vld [vmem:[#allocation2 + $0x68] sm:$0xff] }
  0x66   :  { %1000 = vmatprep.subr.bf16.mxu1 %v5052_v17  ;;  %v5074_v32 = vld [vmem:[#allocation5 + $0x1e4] ss:$16 sps:$4 sm:$0xff]   ;;  %v5078_v34 = vld [vmem:[#allocation5 + $0x1e0] ss:$16 sps:$4 sm:$0xff]  }
  0x67   :  { %v5076_v33 = vld [vmem:[#allocation5 + $0x3e4] ss:$16 sps:$4 sm:$0xff]   ;;  %v5079_v35 = vld [vmem:[#allocation5 + $0x3e0] ss:$16 sps:$4 sm:$0xff]  }
  0x68   :  { %948 = vmatpush1.bf16.msra.mxu0 %v5054_v18  ;;  %v5080_v36 = vld [vmem:[#allocation5 + $0x1c4] ss:$16 sps:$4 sm:$0xff]   ;;  %v5084_v38 = vld [vmem:[#allocation5 + $0x1c0] ss:$16 sps:$4 sm:$0xff]   ;;  %v136_v18 = vld [vmem:[#allocation2 + $0x58] sm:$0xff] }
  0x69   :  { %1001 = vmatpush1.bf16.msra.mxu1 %v5055_v19  ;;  %949 = vmatprep.subr.bf16.mxu0 %v5056_v20  ;;  %v5082_v37 = vld [vmem:[#allocation5 + $0x3c4] ss:$16 sps:$4 sm:$0xff]   ;;  %v5085_v39 = vld [vmem:[#allocation5 + $0x3c0] ss:$16 sps:$4 sm:$0xff]   ;;  %v140_v19 = vld [vmem:[#allocation2 + $0x78] sm:$0xff] }
  0x6a   :  { %1002 = vmatprep.subr.bf16.mxu1 %v5058_v21  ;;  %v5086_v40 = vld [vmem:[#allocation5 + $0x1a4] ss:$16 sps:$4 sm:$0xff]   ;;  %v5090_v42 = vld [vmem:[#allocation5 + $0x1a0] ss:$16 sps:$4 sm:$0xff]   ;;  %v5130_v20 = vld [vmem:[#allocation5 + $0xcc] ss:$16 sps:$4 sm:$0xff]  }
  0x6b   :  { %v5088_v41 = vld [vmem:[#allocation5 + $0x3a4] ss:$16 sps:$4 sm:$0xff]   ;;  %v5091_v43 = vld [vmem:[#allocation5 + $0x3a0] ss:$16 sps:$4 sm:$0xff]   ;;  %v5133_v21 = vld [vmem:[#allocation5 + $0x2cc] ss:$16 sps:$4 sm:$0xff]  }
  0x6c   :  { %950 = vmatpush1.bf16.msra.mxu0 %v5060_v22  ;;  %v5092_v44 = vld [vmem:[#allocation5 + $0x184] ss:$16 sps:$4 sm:$0xff]   ;;  %v5096_v50 = vld [vmem:[#allocation5 + $0x180] ss:$16 sps:$4 sm:$0xff]   ;;  %v5128_v22 = vld [vmem:[#allocation5 + $0xc8] ss:$16 sps:$4 sm:$0xff]  }
  0x6d   :  { %1003 = vmatpush1.bf16.msra.mxu1 %v5061_v23  ;;  %951 = vmatprep.subr.bf16.mxu0 %v5062_v24  ;;  %v5094_v45 = vld [vmem:[#allocation5 + $0x384] ss:$16 sps:$4 sm:$0xff]   ;;  %v5097_v51 = vld [vmem:[#allocation5 + $0x380] ss:$16 sps:$4 sm:$0xff]   ;;  %v5131_v23 = vld [vmem:[#allocation5 + $0x2c8] ss:$16 sps:$4 sm:$0xff]   ;;  %v5696_v24 = vpack.c.bf16 %v138_v15, %v134_v14 }
  0x6e   :  { %1004 = vmatprep.subr.bf16.mxu1 %v5064_v25  ;;  %v5098_v52 = vld [vmem:[#allocation5 + $0x164] ss:$16 sps:$4 sm:$0xff]   ;;  %v5102_v56 = vld [vmem:[#allocation5 + $0x160] ss:$16 sps:$4 sm:$0xff]   ;;  %v5200_v14 = vld [vmem:[#allocation5 + $0x148] ss:$16 sps:$4 sm:$0xff]  }
  0x6f   :  { %v5100_v55 = vld [vmem:[#allocation5 + $0x364] ss:$16 sps:$4 sm:$0xff]   ;;  %v5103_v57 = vld [vmem:[#allocation5 + $0x360] ss:$16 sps:$4 sm:$0xff]   ;;  %v5203_v15 = vld [vmem:[#allocation5 + $0x348] ss:$16 sps:$4 sm:$0xff]  }
  0x70   :  { %952 = vmatpush1.bf16.msra.mxu0 %v5066_v26  ;;  %v5104_v58 = vld [vmem:[#allocation5 + $0x144] ss:$16 sps:$4 sm:$0xff]   ;;  %v5108_v60 = vld [vmem:[#allocation5 + $0x140] ss:$16 sps:$4 sm:$0xff]  }
  0x71   :  { %1005 = vmatpush1.bf16.msra.mxu1 %v5067_v27  ;;  %953 = vmatprep.subr.bf16.mxu0 %v5068_v28  ;;  %v5106_v59 = vld [vmem:[#allocation5 + $0x344] ss:$16 sps:$4 sm:$0xff]   ;;  %v5109_v61 = vld [vmem:[#allocation5 + $0x340] ss:$16 sps:$4 sm:$0xff]   ;;  %v5698_v27 = vpack.c.bf16 %v140_v19, %v136_v18  ;;  %v5136_v28 = vld [vmem:[#allocation5 + $0xac] ss:$16 sps:$4 sm:$0xff]  }
  0x72   :  { %1006 = vmatprep.subr.bf16.mxu1 %v5070_v29  ;;  %v5110_v62 = vld [vmem:[#allocation5 + $0x124] ss:$16 sps:$4 sm:$0xff]   ;;  %v5114_v0 = vld [vmem:[#allocation5 + $0x120] ss:$16 sps:$4 sm:$0xff]   ;;  %v5208_v18 = vld [vmem:[#allocation5 + $0x12c] ss:$16 sps:$4 sm:$0xff]  }
  0x73   :  { %v5112_v63 = vld [vmem:[#allocation5 + $0x324] ss:$16 sps:$4 sm:$0xff]   ;;  %v5115_v1 = vld [vmem:[#allocation5 + $0x320] ss:$16 sps:$4 sm:$0xff]   ;;  %v5211_v19 = vld [vmem:[#allocation5 + $0x32c] ss:$16 sps:$4 sm:$0xff]  }
  0x74   :  { %954 = vmatpush1.bf16.msra.mxu0 %v5072_v30  ;;  %v5116_v2 = vld [vmem:[#allocation5 + $0x104] ss:$16 sps:$4 sm:$0xff]   ;;  %v5120_v4 = vld [vmem:[#allocation5 + $0x100] ss:$16 sps:$4 sm:$0xff]  }
  0x75   :  { %1007 = vmatpush1.bf16.msra.mxu1 %v5073_v31  ;;  %955 = vmatprep.subr.bf16.mxu0 %v5074_v32  ;;  %v5118_v3 = vld [vmem:[#allocation5 + $0x304] ss:$16 sps:$4 sm:$0xff]   ;;  %v5121_v5 = vld [vmem:[#allocation5 + $0x300] ss:$16 sps:$4 sm:$0xff]   ;;  %v5139_v31 = vld [vmem:[#allocation5 + $0x2ac] ss:$16 sps:$4 sm:$0xff]  }
  0x76   :  { %1008 = vmatprep.subr.bf16.mxu1 %v5076_v33  ;;  %v125_v6 = vld [vmem:[#allocation2] sm:$0xff]  ;;  %v127_v8 = vld [vmem:[#allocation2 + $0x10] sm:$0xff]  ;;  %v5134_v33 = vld [vmem:[#allocation5 + $0xa8] ss:$16 sps:$4 sm:$0xff]  }
  0x77   :  { %v129_v7 = vld [vmem:[#allocation2 + $0x20] sm:$0xff]  ;;  %v131_v9 = vld [vmem:[#allocation2 + $0x30] sm:$0xff] }
  0x78   :  { %956 = vmatpush2.bf16.msra.mxu0 %v5078_v34  ;;  %v5692_v16 = vpack.c.bf16 %v129_v7, %v125_v6  ;;  %v5694_v17 = vpack.c.bf16 %v131_v9, %v127_v8  ;;  %v133_v25 = vld [vmem:[#allocation2 + $0x40] sm:$0xff]  ;;  %v135_v29 = vld [vmem:[#allocation2 + $0x50] sm:$0xff]  ;;  %v5137_v34 = vld [vmem:[#allocation5 + $0x2a8] ss:$16 sps:$4 sm:$0xff]  }
  0x79   :  { %1009 = vmatpush2.bf16.msra.mxu1 %v5079_v35  ;;  %957 = vmatprep.subr.bf16.mxu0 %v5080_v36  ;;  %v137_v26 = vld [vmem:[#allocation2 + $0x60] sm:$0xff]  ;;  %v139_v30 = vld [vmem:[#allocation2 + $0x70] sm:$0xff]  ;;  %v5142_v36 = vld [vmem:[#allocation5 + $0x8c] ss:$16 sps:$4 sm:$0xff]  }
  0x7a   :  { %1010 = vmatprep.subr.bf16.mxu1 %v5082_v37  ;;  %v5704_v32 = vpack.c.bf16 %v137_v26, %v133_v25  ;;  %v5706_v35 = vpack.c.bf16 %v139_v30, %v135_v29  ;;  %v5145_v37 = vld [vmem:[#allocation5 + $0x28c] ss:$16 sps:$4 sm:$0xff]   ;;  %v5188_v6 = vld [vmem:[#allocation5 + $0x188] ss:$16 sps:$4 sm:$0xff]  }
  0x7b   :  { %v5191_v7 = vld [vmem:[#allocation5 + $0x388] ss:$16 sps:$4 sm:$0xff]   ;;  %v5196_v8 = vld [vmem:[#allocation5 + $0x16c] ss:$16 sps:$4 sm:$0xff]  }
  0x7c   :  { %958 = vmatpush2.bf16.msra.mxu0 %v5084_v38  ;;  %v5140_v38 = vld [vmem:[#allocation5 + $0x88] ss:$16 sps:$4 sm:$0xff]   ;;  %v5199_v9 = vld [vmem:[#allocation5 + $0x36c] ss:$16 sps:$4 sm:$0xff]  }
  0x7d   :  { %1011 = vmatpush2.bf16.msra.mxu1 %v5085_v39  ;;  %959 = vmatprep.subr.bf16.mxu0 %v5086_v40  ;;  %v5143_v39 = vld [vmem:[#allocation5 + $0x288] ss:$16 sps:$4 sm:$0xff]   ;;  %v5148_v40 = vld [vmem:[#allocation5 + $0x6c] ss:$16 sps:$4 sm:$0xff]  }
  0x7e   :  { %1012 = vmatprep.subr.bf16.mxu1 %v5088_v41  ;;  %v5151_v41 = vld [vmem:[#allocation5 + $0x26c] ss:$16 sps:$4 sm:$0xff]   ;;  %v1231_v25 = vld [vmem:[#allocation8 + $0x1c0] sm:$0xff] }
  0x7f   :  { %v1235_v26 = vld [vmem:[#allocation8 + $0x1e0] sm:$0xff] }
  0x80   :  { %960 = vmatpush2.bf16.msra.mxu0 %v5090_v42  ;;  %v5146_v42 = vld [vmem:[#allocation5 + $0x68] ss:$16 sps:$4 sm:$0xff]   ;;  %v4622_v30 = vcombine.high %v1231_v25, %v1235_v26 }
  0x81   :  { %1013 = vmatpush2.bf16.msra.mxu1 %v5091_v43  ;;  %961 = vmatprep.subr.bf16.mxu0 %v5092_v44  ;;  %v5149_v43 = vld [vmem:[#allocation5 + $0x268] ss:$16 sps:$4 sm:$0xff]   ;;  %v5154_v44 = vld [vmem:[#allocation5 + $0x4c] ss:$16 sps:$4 sm:$0xff]  }
  0x82   :  { %1014 = vmatprep.subr.bf16.mxu1 %v5094_v45  ;;  %v5157_v45 = vld [vmem:[#allocation5 + $0x24c] ss:$16 sps:$4 sm:$0xff]   ;;  %v5215_v29 = vld [vmem:[#allocation5 + $0x308] ss:$16 sps:$4 sm:$0xff]  }
  0x84   :  { %962 = vmatpush2.bf16.msra.mxu0 %v5096_v50  ;;  %v5158_v50 = vld [vmem:[#allocation5 + $0x28] ss:$16 sps:$4 sm:$0xff]  }
  0x85   :  { %1015 = vmatpush2.bf16.msra.mxu1 %v5097_v51  ;;  %963 = vmatprep.subr.bf16.mxu0 %v5098_v52  ;;  %v5161_v51 = vld [vmem:[#allocation5 + $0x228] ss:$16 sps:$4 sm:$0xff]   ;;  %v5166_v52 = vld [vmem:[#allocation5 + $0xc] ss:$16 sps:$4 sm:$0xff]  }
  0x86   :  { %1016 = vmatprep.subr.bf16.mxu1 %v5100_v55  ;;  %v5167_v55 = vld [vmem:[#allocation5 + $0x208] ss:$16 sps:$4 sm:$0xff]  }
  0x88   :  { %964 = vmatpush2.bf16.msra.mxu0 %v5102_v56  ;;  %v5172_v56 = vld [vmem:[#allocation5 + $0x1ec] ss:$16 sps:$4 sm:$0xff]  }
  0x89   :  { %1017 = vmatpush2.bf16.msra.mxu1 %v5103_v57  ;;  %965 = vmatprep.subr.bf16.mxu0 %v5104_v58  ;;  %v5175_v57 = vld [vmem:[#allocation5 + $0x3ec] ss:$16 sps:$4 sm:$0xff]   ;;  %v5170_v58 = vld [vmem:[#allocation5 + $0x1e8] ss:$16 sps:$4 sm:$0xff]  }
  0x8a   :  { %1018 = vmatprep.subr.bf16.mxu1 %v5106_v59  ;;  %v5173_v59 = vld [vmem:[#allocation5 + $0x3e8] ss:$16 sps:$4 sm:$0xff]  }
  0x8c   :  { %966 = vmatpush2.bf16.msra.mxu0 %v5108_v60  ;;  %v5178_v60 = vld [vmem:[#allocation5 + $0x1cc] ss:$16 sps:$4 sm:$0xff]  }
  0x8d   :  { %1019 = vmatpush2.bf16.msra.mxu1 %v5109_v61  ;;  %967 = vmatprep.subr.bf16.mxu0 %v5110_v62  ;;  %v5181_v61 = vld [vmem:[#allocation5 + $0x3cc] ss:$16 sps:$4 sm:$0xff]   ;;  %v5176_v62 = vld [vmem:[#allocation5 + $0x1c8] ss:$16 sps:$4 sm:$0xff]  }
  0x8e   :  { %1020 = vmatprep.subr.bf16.mxu1 %v5112_v63  ;;  %v5179_v63 = vld [vmem:[#allocation5 + $0x3c8] ss:$16 sps:$4 sm:$0xff]  }
  0x90   :  { %968 = vmatpush2.bf16.msra.mxu0 %v5114_v0  ;;  %v5184_v0 = vld [vmem:[#allocation5 + $0x1ac] ss:$16 sps:$4 sm:$0xff]  }
  0x91   :  { %1021 = vmatpush2.bf16.msra.mxu1 %v5115_v1  ;;  %969 = vmatprep.subr.bf16.mxu0 %v5116_v2  ;;  %v5187_v1 = vld [vmem:[#allocation5 + $0x3ac] ss:$16 sps:$4 sm:$0xff]   ;;  %v5182_v2 = vld [vmem:[#allocation5 + $0x1a8] ss:$16 sps:$4 sm:$0xff]  }
  0x92   :  { %1022 = vmatprep.subr.bf16.mxu1 %v5118_v3  ;;  %v5185_v3 = vld [vmem:[#allocation5 + $0x3a8] ss:$16 sps:$4 sm:$0xff]  }
  0x94   :  { %970 = vmatpush2.bf16.msra.mxu0 %v5120_v4  ;;  %v5190_v4 = vld [vmem:[#allocation5 + $0x18c] ss:$16 sps:$4 sm:$0xff]  }
  0x95   :  { %1023 = vmatpush2.bf16.msra.mxu1 %v5121_v5  ;;  %1045 = vmatprep.subr.bf16.mxu0 %v5124_v10  ;;  %v5193_v5 = vld [vmem:[#allocation5 + $0x38c] ss:$16 sps:$4 sm:$0xff]   ;;  %v5194_v10 = vld [vmem:[#allocation5 + $0x168] ss:$16 sps:$4 sm:$0xff]  }
  0x96   :  { %1098 = vmatprep.subr.bf16.mxu1 %v5127_v11  ;;  %v5197_v11 = vld [vmem:[#allocation5 + $0x368] ss:$16 sps:$4 sm:$0xff]  }
  0x97   :  { %972 = vmatmul.mubr.bf16.vlgmr.msra.gmra.mxu0 %v5692_v16 }
  0x98   :  { %1025 = vmatmul.mubr.bf16.vlgmr.msra.gmra.mxu1 %v5694_v17  ;;  %1046 = vmatpush1.bf16.msra.mxu0 %v5122_v12  ;;  %v5202_v12 = vld [vmem:[#allocation5 + $0x14c] ss:$16 sps:$4 sm:$0xff]  }
  0x99   :  { %1099 = vmatpush1.bf16.msra.mxu1 %v5125_v13  ;;  %1047 = vmatprep.subr.bf16.mxu0 %v5130_v20  ;;  %v5205_v13 = vld [vmem:[#allocation5 + $0x34c] ss:$16 sps:$4 sm:$0xff]   ;;  %v5206_v20 = vld [vmem:[#allocation5 + $0x128] ss:$16 sps:$4 sm:$0xff]  }
  0x9a   :  { %1100 = vmatprep.subr.bf16.mxu1 %v5133_v21  ;;  %981 = vmatprep.mubr.bf16.mxu0 %v5696_v24  ;;  %v5209_v21 = vld [vmem:[#allocation5 + $0x328] ss:$16 sps:$4 sm:$0xff]  }
  0x9b   :  { %1034 = vmatprep.mubr.bf16.mxu1 %v5698_v27 }
  0x9c   :  { %1048 = vmatpush1.bf16.msra.mxu0 %v5128_v22  ;;  %v5214_v22 = vld [vmem:[#allocation5 + $0x10c] ss:$16 sps:$4 sm:$0xff]  }
  0x9d   :  { %1101 = vmatpush1.bf16.msra.mxu1 %v5131_v23  ;;  %1049 = vmatprep.subr.bf16.mxu0 %v5136_v28  ;;  %v5217_v23 = vld [vmem:[#allocation5 + $0x30c] ss:$16 sps:$4 sm:$0xff]   ;;  %v5212_v28 = vld [vmem:[#allocation5 + $0x108] ss:$16 sps:$4 sm:$0xff]  }
  0x9e   :  { %1102 = vmatprep.subr.bf16.mxu1 %v5139_v31  ;;  %v1223_v31 = vld [vmem:[#allocation8 + $0x180] sm:$0xff] }
  0x9f   :  { %982 = vmatmul.mubr.bf16.gmra.mxu0 %v5704_v32 }
  0xa0   :  { %1035 = vmatmul.mubr.bf16.gmra.mxu1 %v5706_v35  ;;  %1050 = vmatpush1.bf16.msra.mxu0 %v5134_v33  ;;  %v1227_v33 = vld [vmem:[#allocation8 + $0x1a0] sm:$0xff] }
  0xa1   :  { %1103 = vmatpush1.bf16.msra.mxu1 %v5137_v34  ;;  %1051 = vmatprep.subr.bf16.mxu0 %v5142_v36  ;;  %v4621_v34 = vcombine.low %v1231_v25, %v1235_v26  ;;  %v4614_v36 = vcombine.high %v1223_v31, %v1227_v33  ;;  %v1279_v25 = vld [vmem:[#allocation8 + $0x340] sm:$0xff] }
  0xa2   :  { %1104 = vmatprep.subr.bf16.mxu1 %v5145_v37  ;;  %1077 = vmatprep.mubr.bf16.mxu0 %v5686_v53  ;;  %v5169_v53 = vld [vmem:[#allocation5 + $0x20c] ss:$16 sps:$4 sm:$0xff]   ;;  %v1215_v37 = vld [vmem:[#allocation8 + $0x140] sm:$0xff] }
  0xa3   :  { %1130 = vmatprep.mubr.bf16.mxu1 %v5688_v54  ;;  %v5164_v54 = vld [vmem:[#allocation5 + $0x8] ss:$16 sps:$4 sm:$0xff]  }
  0xa4   :  { %1052 = vmatpush1.bf16.msra.mxu0 %v5140_v38  ;;  %v1219_v38 = vld [vmem:[#allocation8 + $0x160] sm:$0xff] }
  0xa5   :  { %1105 = vmatpush1.bf16.msra.mxu1 %v5143_v39  ;;  %1053 = vmatprep.subr.bf16.mxu0 %v5148_v40  ;;  %v4613_v39 = vcombine.low %v1223_v31, %v1227_v33  ;;  %v4606_v40 = vcombine.high %v1215_v37, %v1219_v38  ;;  %v1283_v26 = vld [vmem:[#allocation8 + $0x360] sm:$0xff] }
  0xa6   :  { %1106 = vmatprep.subr.bf16.mxu1 %v5151_v41  ;;  %v1207_v41 = vld [vmem:[#allocation8 + $0x100] sm:$0xff] }
  0xa8   :  { %1054 = vmatpush1.bf16.msra.mxu0 %v5146_v42  ;;  %v1211_v42 = vld [vmem:[#allocation8 + $0x120] sm:$0xff] }
  0xa9   :  { %1107 = vmatpush1.bf16.msra.mxu1 %v5149_v43  ;;  %1055 = vmatprep.subr.bf16.mxu0 %v5154_v44  ;;  %v4605_v43 = vcombine.low %v1215_v37, %v1219_v38  ;;  %v4598_v44 = vcombine.high %v1207_v41, %v1211_v42  ;;  %v1275_v37 = vld [vmem:[#allocation8 + $0x320] sm:$0xff] }
  0xaa   :  { %1108 = vmatprep.subr.bf16.mxu1 %v5157_v45  ;;  %v1191_v45 = vld [vmem:[#allocation8 + $0x80] sm:$0xff] }
  0xab   :  { %v1311_v38 = vld [vmem:[#allocation8 + $0x440] sm:$0xff] }
  0xac   :  { %1056 = vmatpush1.bf16.msra.mxu0 %v5152_v46 }
  0xad   :  { %1109 = vmatpush1.bf16.msra.mxu1 %v5155_v47  ;;  %1057 = vmatprep.subr.bf16.mxu0 %v5160_v48  ;;  %v1359_v47 = vld [vmem:[#allocation8 + $0x5c0] sm:$0xff] }
  0xae   :  { %1110 = vmatprep.subr.bf16.mxu1 %v5163_v49  ;;  %v1363_v48 = vld [vmem:[#allocation8 + $0x5e0] sm:$0xff]  ;;  %v5718_v49 = vld [vmem:[#allocation8 + $0x1c8] sm:$0xff] }
  0xb0   :  { %1058 = vmatpush1.bf16.msra.mxu0 %v5158_v50  ;;  %v4750_v50 = vcombine.high %v1359_v47, %v1363_v48 }
  0xb1   :  { %1111 = vmatpush1.bf16.msra.mxu1 %v5161_v51  ;;  %1059 = vmatprep.subr.bf16.mxu0 %v5166_v52  ;;  %v5720_v51 = vld [vmem:[#allocation8 + $0x1e8] sm:$0xff] }
  0xb2   :  { %1112 = vmatprep.subr.bf16.mxu1 %v5169_v53  ;;  %v1187_v53 = vld [vmem:[#allocation8 + $0x60] sm:$0xff] }
  0xb4   :  { %1060 = vmatpush1.bf16.msra.mxu0 %v5164_v54  ;;  %v4623_v54 = vcombine.low %v5718_v49, %v5720_v51 }
  0xb5   :  { %1113 = vmatpush1.bf16.msra.mxu1 %v5167_v55  ;;  %1061 = vmatprep.subr.bf16.mxu0 %v5172_v56  ;;  %v1351_v56 = vld [vmem:[#allocation8 + $0x580] sm:$0xff] }
  0xb6   :  { %1114 = vmatprep.subr.bf16.mxu1 %v5175_v57  ;;  %v1355_v57 = vld [vmem:[#allocation8 + $0x5a0] sm:$0xff] }
  0xb8   :  { %1062 = vmatpush2.bf16.msra.mxu0 %v5170_v58 }
  0xb9   :  { %1115 = vmatpush2.bf16.msra.mxu1 %v5173_v59  ;;  %1063 = vmatprep.subr.bf16.mxu0 %v5178_v60  ;;  %v1175_v59 = vld [vmem:[#allocation8] sm:$0xff] }
  0xba   :  { %1116 = vmatprep.subr.bf16.mxu1 %v5181_v61  ;;  %v1179_v60 = vld [vmem:[#allocation8 + $0x20] sm:$0xff]  ;;  %v4742_v61 = vcombine.high %v1351_v56, %v1355_v57 }
  0xbc   :  { %1064 = vmatpush2.bf16.msra.mxu0 %v5176_v62 }
  0xbd   :  { %1117 = vmatpush2.bf16.msra.mxu1 %v5179_v63  ;;  %1065 = vmatprep.subr.bf16.mxu0 %v5184_v0  ;;  %v4741_v63 = vcombine.low %v1351_v56, %v1355_v57  ;;  %v1343_v0 = vld [vmem:[#allocation8 + $0x540] sm:$0xff] }
  0xbe   :  { %1118 = vmatprep.subr.bf16.mxu1 %v5187_v1  ;;  %v1347_v1 = vld [vmem:[#allocation8 + $0x560] sm:$0xff] }
  0xbf   :  { %v1247_v57 = vld [vmem:[#allocation8 + $0x240] sm:$0xff] }
  0xc0   :  { %1066 = vmatpush2.bf16.msra.mxu0 %v5182_v2 }
  0xc1   :  { %1119 = vmatpush2.bf16.msra.mxu1 %v5185_v3  ;;  %1067 = vmatprep.subr.bf16.mxu0 %v5190_v4  ;;  %v1295_v3 = vld [vmem:[#allocation8 + $0x3c0] sm:$0xff] }
  0xc2   :  { %1120 = vmatprep.subr.bf16.mxu1 %v5193_v5  ;;  %v1299_v4 = vld [vmem:[#allocation8 + $0x3e0] sm:$0xff]  ;;  %v4734_v5 = vcombine.high %v1343_v0, %v1347_v1 }
  0xc4   :  { %1068 = vmatpush2.bf16.msra.mxu0 %v5188_v6  ;;  %v4566_v6 = vcombine.high %v1175_v59, %v1179_v60 }
  0xc5   :  { %1121 = vmatpush2.bf16.msra.mxu1 %v5191_v7  ;;  %1069 = vmatprep.subr.bf16.mxu0 %v5196_v8  ;;  %v4733_v7 = vcombine.low %v1343_v0, %v1347_v1  ;;  %v1335_v8 = vld [vmem:[#allocation8 + $0x500] sm:$0xff] }
  0xc6   :  { %1122 = vmatprep.subr.bf16.mxu1 %v5199_v9  ;;  %v1339_v9 = vld [vmem:[#allocation8 + $0x520] sm:$0xff] }
  0xc7   :  { %v1239_v1 = vld [vmem:[#allocation8 + $0x200] sm:$0xff] }
  0xc8   :  { %1070 = vmatpush2.bf16.msra.mxu0 %v5194_v10  ;;  %v4565_v10 = vcombine.low %v1175_v59, %v1179_v60  ;;  %v1415_v59 = vld [vmem:[#allocation8 + $0x780] sm:$0xff] }
  0xc9   :  { %1123 = vmatpush2.bf16.msra.mxu1 %v5197_v11  ;;  %1071 = vmatprep.subr.bf16.mxu0 %v5202_v12  ;;  %v1287_v11 = vld [vmem:[#allocation8 + $0x380] sm:$0xff] }
  0xca   :  { %1124 = vmatprep.subr.bf16.mxu1 %v5205_v13  ;;  %v1291_v12 = vld [vmem:[#allocation8 + $0x3a0] sm:$0xff]  ;;  %v4725_v13 = vcombine.low %v1335_v8, %v1339_v9 }
  0xcb   :  { %v1419_v60 = vld [vmem:[#allocation8 + $0x7a0] sm:$0xff] }
  0xcc   :  { %1072 = vmatpush2.bf16.msra.mxu0 %v5200_v14  ;;  %v4726_v14 = vcombine.high %v1335_v8, %v1339_v9  ;;  %v1399_v9 = vld [vmem:[#allocation8 + $0x700] sm:$0xff] }
  0xcd   :  { %1125 = vmatpush2.bf16.msra.mxu1 %v5203_v15  ;;  %1073 = vmatprep.subr.bf16.mxu0 %v5208_v18  ;;  %v4686_v15 = vcombine.high %v1295_v3, %v1299_v4  ;;  %v1327_v18 = vld [vmem:[#allocation8 + $0x4c0] sm:$0xff] }
  0xce   :  { %1126 = vmatprep.subr.bf16.mxu1 %v5211_v19  ;;  %v1331_v19 = vld [vmem:[#allocation8 + $0x4e0] sm:$0xff] }
  0xd0   :  { %1074 = vmatpush2.bf16.msra.mxu0 %v5206_v20  ;;  %v4685_v20 = vcombine.low %v1295_v3, %v1299_v4  ;;  %v1407_v3 = vld [vmem:[#allocation8 + $0x740] sm:$0xff] }
  0xd1   :  { %1127 = vmatpush2.bf16.msra.mxu1 %v5209_v21  ;;  %1075 = vmatprep.subr.bf16.mxu0 %v5214_v22  ;;  %v4717_v21 = vcombine.low %v1327_v18, %v1331_v19  ;;  %v4718_v22 = vcombine.high %v1327_v18, %v1331_v19  ;;  %v1411_v4 = vld [vmem:[#allocation8 + $0x760] sm:$0xff] }
  0xd2   :  { %1128 = vmatprep.subr.bf16.mxu1 %v5217_v23  ;;  %v4678_v23 = vcombine.high %v1287_v11, %v1291_v12  ;;  %v1395_v18 = vld [vmem:[#allocation8 + $0x6e0] sm:$0xff] }
  0xd4   :  { %1076 = vmatpush2.bf16.msra.mxu0 %v5212_v28  ;;  %v1319_v28 = vld [vmem:[#allocation8 + $0x480] sm:$0xff] }
  0xd5   :  { %1129 = vmatpush2.bf16.msra.mxu1 %v5215_v29  ;;  %2753 = vmatprep.subr.bf16.mxu0 %v4622_v30  ;;  %v1323_v29 = vld [vmem:[#allocation8 + $0x4a0] sm:$0xff]  ;;  %v4677_v30 = vcombine.low %v1287_v11, %v1291_v12 }
  0xd6   :  { %2806 = vmatprep.subr.bf16.mxu1 %v4750_v50  ;;  %v4709_v31 = vcombine.low %v1319_v28, %v1323_v29  ;;  %v4710_v33 = vcombine.high %v1319_v28, %v1323_v29  ;;  %v1259_v50 = vld [vmem:[#allocation8 + $0x2a0] sm:$0xff] }
  0xd7   :  { %1078 = vmatmul.mubr.bf16.vlgmr.msra.gmra.mxu0 %v5692_v16  ;;  %v1199_v16 = vld [vmem:[#allocation8 + $0xc0] sm:$0xff] }
  0xd8   :  { %1131 = vmatmul.mubr.bf16.vlgmr.msra.gmra.mxu1 %v5694_v17  ;;  %1087 = vmatprep.mubr.bf16.mxu0 %v5696_v24  ;;  %v1203_v17 = vld [vmem:[#allocation8 + $0xe0] sm:$0xff]  ;;  %v4597_v24 = vcombine.low %v1207_v41, %v1211_v42 }
  0xd9   :  { %1140 = vmatprep.mubr.bf16.mxu1 %v5698_v27  ;;  %2754 = vmatpush1.bf16.msra.mxu0 %v4621_v34  ;;  %v1195_v27 = vld [vmem:[#allocation8 + $0xa0] sm:$0xff]  ;;  %v4590_v46 = vcombine.high %v1199_v16, %v1203_v17  ;;  %v4589_v52 = vcombine.low %v1199_v16, %v1203_v17  ;;  %v4670_v34 = vcombine.high %v1279_v25, %v1283_v26 }
  0xda   :  { %2755 = vmatprep.subr.bf16.mxu0 %v4614_v36  ;;  %v4582_v55 = vcombine.high %v1191_v45, %v1195_v27  ;;  %v4581_v58 = vcombine.low %v1191_v45, %v1195_v27  ;;  %v1271_v36 = vld [vmem:[#allocation8 + $0x300] sm:$0xff] }
  0xdb   :  { %v1267_v16 = vld [vmem:[#allocation8 + $0x2e0] sm:$0xff]  ;;  %v4661_v45 = vcombine.low %v1271_v36, %v1275_v37 }
  0xdc   :  { %v1303_v17 = vld [vmem:[#allocation8 + $0x400] sm:$0xff] }
  0xdd   :  { %2756 = vmatpush1.bf16.msra.mxu0 %v4613_v39  ;;  %v1315_v39 = vld [vmem:[#allocation8 + $0x460] sm:$0xff] }
  0xde   :  { %2757 = vmatprep.subr.bf16.mxu0 %v4606_v40  ;;  %v4669_v40 = vcombine.low %v1279_v25, %v1283_v26  ;;  %v4701_v41 = vcombine.low %v1311_v38, %v1315_v39  ;;  %v4702_v42 = vcombine.high %v1311_v38, %v1315_v39  ;;  %v1375_v26 = vld [vmem:[#allocation8 + $0x640] sm:$0xff]  ;;  %v5728_v38 = vld [vmem:[#allocation8 + $0x5e8] sm:$0xff] }
  0xdf   :  { %1088 = vmatmul.mubr.bf16.gmra.mxu0 %v5704_v32  ;;  %v1183_v32 = vld [vmem:[#allocation8 + $0x40] sm:$0xff] }
  0xe0   :  { %1141 = vmatmul.mubr.bf16.gmra.mxu1 %v5706_v35  ;;  %v4749_v35 = vcombine.low %v1359_v47, %v1363_v48  ;;  %v4574_v62 = vcombine.high %v1183_v32, %v1187_v53  ;;  %v4573_v2 = vcombine.low %v1183_v32, %v1187_v53  ;;  %v1255_v48 = vld [vmem:[#allocation8 + $0x280] sm:$0xff] }
  0xe1   :  { %2758 = vmatpush1.bf16.msra.mxu0 %v4605_v43  ;;  %v4662_v43 = vcombine.high %v1271_v36, %v1275_v37  ;;  %v1427_v32 = vld [vmem:[#allocation8 + $0x7e0] sm:$0xff]  ;;  %v4646_v56 = vcombine.high %v1255_v48, %v1259_v50  ;;  %v5726_v37 = vld [vmem:[#allocation8 + $0x5c8] sm:$0xff] }
  0xe2   :  { %2759 = vmatprep.subr.bf16.mxu0 %v4598_v44  ;;  %2807 = vmatpush1.bf16.msra.mxu1 %v4749_v35  ;;  %v1263_v44 = vld [vmem:[#allocation8 + $0x2c0] sm:$0xff]  ;;  %v4752_v39 = vcombine.high %v5726_v37, %v5728_v38 }
  0xe3   :  { %2808 = vmatprep.subr.bf16.mxu1 %v4742_v61  ;;  %v4654_v47 = vcombine.high %v1263_v44, %v1267_v16  ;;  %v4653_v53 = vcombine.low %v1263_v44, %v1267_v16  ;;  %v4645_v61 = vcombine.low %v1255_v48, %v1259_v50  ;;  %v1379_v28 = vld [vmem:[#allocation8 + $0x660] sm:$0xff]  ;;  %v5739_v44 = vld [vmem:[#allocation7] sm:$0xf] }
  0xe4   :  { %v4766_v29 = vcombine.high %v1375_v26, %v1379_v28 }
  0xe5   :  { %2760 = vmatpush1.bf16.msra.mxu0 %v4597_v24  ;;  %v1307_v24 = vld [vmem:[#allocation8 + $0x420] sm:$0xff] }
  0xe6   :  { %2761 = vmatprep.subr.bf16.mxu0 %v4590_v46  ;;  %2809 = vmatpush1.bf16.msra.mxu1 %v4741_v63  ;;  %v4693_v27 = vcombine.low %v1303_v17, %v1307_v24  ;;  %v4694_v46 = vcombine.high %v1303_v17, %v1307_v24  ;;  %v4806_v63 = vcombine.high %v1415_v59, %v1419_v60 }
  0xe7   :  { %2810 = vmatprep.subr.bf16.mxu1 %v4734_v5 }
  0xe9   :  { %2762 = vmatpush1.bf16.msra.mxu0 %v4589_v52  ;;  %v1423_v52 = vld [vmem:[#allocation8 + $0x7c0] sm:$0xff] }
  0xea   :  { %2763 = vmatprep.subr.bf16.mxu0 %v4582_v55  ;;  %2811 = vmatpush1.bf16.msra.mxu1 %v4733_v7  ;;  %v4813_v35 = vcombine.low %v1423_v52, %v1427_v32  ;;  %v4814_v55 = vcombine.high %v1423_v52, %v1427_v32  ;;  %v4798_v7 = vcombine.high %v1407_v3, %v1411_v4 }
  0xeb   :  { %2812 = vmatprep.subr.bf16.mxu1 %v4726_v14  ;;  %v4624_v14 = vcombine.high %v5718_v49, %v5720_v51 }
  0xed   :  { %2764 = vmatpush1.bf16.msra.mxu0 %v4581_v58  ;;  %v1251_v58 = vld [vmem:[#allocation8 + $0x260] sm:$0xff] }
  0xee   :  { %2765 = vmatprep.subr.bf16.mxu0 %v4574_v62  ;;  %2813 = vmatpush1.bf16.msra.mxu1 %v4725_v13  ;;  %v4805_v62 = vcombine.low %v1415_v59, %v1419_v60  ;;  %v4638_v0 = vcombine.high %v1247_v57, %v1251_v58  ;;  %v4637_v5 = vcombine.low %v1247_v57, %v1251_v58 }
  0xef   :  { %2814 = vmatprep.subr.bf16.mxu1 %v4718_v22  ;;  %v1387_v22 = vld [vmem:[#allocation8 + $0x6a0] sm:$0xff] }
  0xf1   :  { %2766 = vmatpush1.bf16.msra.mxu0 %v4573_v2  ;;  %v1243_v2 = vld [vmem:[#allocation8 + $0x220] sm:$0xff] }
  0xf2   :  { %2767 = vmatprep.subr.bf16.mxu0 %v4566_v6  ;;  %2815 = vmatpush1.bf16.msra.mxu1 %v4717_v21  ;;  %v4797_v6 = vcombine.low %v1407_v3, %v1411_v4  ;;  %v4630_v8 = vcombine.high %v1239_v1, %v1243_v2  ;;  %v4629_v11 = vcombine.low %v1239_v1, %v1243_v2  ;;  %v1383_v21 = vld [vmem:[#allocation8 + $0x680] sm:$0xff] }
  0xf3   :  { %2816 = vmatprep.subr.bf16.mxu1 %v4710_v33  ;;  %v4773_v25 = vcombine.low %v1383_v21, %v1387_v22  ;;  %v1371_v33 = vld [vmem:[#allocation8 + $0x620] sm:$0xff] }
  0xf5   :  { %2768 = vmatpush1.bf16.msra.mxu0 %v4565_v10  ;;  %v1403_v10 = vld [vmem:[#allocation8 + $0x720] sm:$0xff] }
  0xf6   :  { %2769 = vmatprep.subr.bf16.mxu0 %v4686_v15  ;;  %2817 = vmatpush1.bf16.msra.mxu1 %v4709_v31  ;;  %v4789_v12 = vcombine.low %v1399_v9, %v1403_v10  ;;  %v4790_v13 = vcombine.high %v1399_v9, %v1403_v10  ;;  %v1391_v15 = vld [vmem:[#allocation8 + $0x6c0] sm:$0xff] }
  0xf7   :  { %2818 = vmatprep.subr.bf16.mxu1 %v4702_v42  ;;  %v4781_v19 = vcombine.low %v1391_v15, %v1395_v18  ;;  %v1367_v31 = vld [vmem:[#allocation8 + $0x600] sm:$0xff] }
  0xf8   :  { %v4757_v36 = vcombine.low %v1367_v31, %v1371_v33 }
  0xf9   :  { %2770 = vmatpush2.bf16.msra.mxu0 %v4685_v20  ;;  %v4782_v20 = vcombine.high %v1391_v15, %v1395_v18 }
  0xfa   :  { %2771 = vmatprep.subr.bf16.mxu0 %v4678_v23  ;;  %2819 = vmatpush1.bf16.msra.mxu1 %v4701_v41  ;;  %v4774_v23 = vcombine.high %v1383_v21, %v1387_v22  ;;  %v279_v41 = vlaneseq }
  0xfb   :  { %2820 = vmatprep.subr.bf16.mxu1 %v4694_v46 }
  0xfc   :  { %v5734_v42 = vshrl.u32 %v279_v41, 7 }
  0xfd   :  { %2772 = vmatpush2.bf16.msra.mxu0 %v4677_v30  ;;  %v4765_v30 = vcombine.low %v1375_v26, %v1379_v28 }
  0xfe   :  { %2773 = vmatprep.subr.bf16.mxu0 %v4670_v34  ;;  %2821 = vmatpush1.bf16.msra.mxu1 %v4693_v27  ;;  %v4758_v34 = vcombine.high %v1367_v31, %v1371_v33  ;;  %v5742_v16 = vsub.s32 0, %v5734_v42 }
  0xff   :  { %2822 = vmatprep.subr.bf16.mxu1 %v4814_v55 }
 0x100   :  { %v282_v24 = vrot.slane %v5739_v44, %v5742_v16 }
 0x101   :  { %2774 = vmatpush2.bf16.msra.mxu0 %v4669_v40  ;;  %v4751_v40 = vcombine.low %v5726_v37, %v5728_v38 }
 0x102   :  { %2775 = vmatprep.subr.bf16.mxu0 %v4662_v43  ;;  %2823 = vmatpush2.bf16.msra.mxu1 %v4813_v35  ;;  %v5737_v43 = vsub.s32 1, %v5734_v42 }
 0x103   :  { %2824 = vmatprep.subr.bf16.mxu1 %v4806_v63 }
 0x104   :  { %v286_v17 = vrot.slane %v5739_v44, %v5737_v43 }
 0x105   :  { %2776 = vmatpush2.bf16.msra.mxu0 %v4661_v45 }
 0x106   :  { %2777 = vmatprep.subr.bf16.mxu0 %v4654_v47  ;;  %2825 = vmatpush2.bf16.msra.mxu1 %v4805_v62 }
 0x107   :  { %2826 = vmatprep.subr.bf16.mxu1 %v4798_v7  ;;  %v1228_v7 = vld [vmem:[#allocation8 + $0x1a8] sm:$0xff] }
 0x109   :  { %2778 = vmatpush2.bf16.msra.mxu0 %v4653_v53 }
 0x10a   :  { %2779 = vmatprep.subr.bf16.mxu0 %v4646_v56  ;;  %2827 = vmatpush2.bf16.msra.mxu1 %v4797_v6  ;;  %v1224_v6 = vld [vmem:[#allocation8 + $0x188] sm:$0xff] }
 0x10b   :  { %2828 = vmatprep.subr.bf16.mxu1 %v4790_v13  ;;  %v4615_v31 = vcombine.low %v1224_v6, %v1228_v7 }
 0x10d   :  { %2780 = vmatpush2.bf16.msra.mxu0 %v4645_v61 }
 0x10e   :  { %2781 = vmatprep.subr.bf16.mxu0 %v4638_v0  ;;  %2829 = vmatpush2.bf16.msra.mxu1 %v4789_v12 }
 0x10f   :  { %2830 = vmatprep.subr.bf16.mxu1 %v4782_v20  ;;  %v4616_v20 = vcombine.high %v1224_v6, %v1228_v7  ;;  %v1272_v7 = vld [vmem:[#allocation8 + $0x308] sm:$0xff] }
 0x111   :  { %2782 = vmatpush2.bf16.msra.mxu0 %v4637_v5 }
 0x112   :  { %2783 = vmatprep.subr.bf16.mxu0 %v4630_v8  ;;  %2831 = vmatpush2.bf16.msra.mxu1 %v4781_v19 }
 0x113   :  { %2832 = vmatprep.subr.bf16.mxu1 %v4774_v23  ;;  %v1216_v23 = vld [vmem:[#allocation8 + $0x148] sm:$0xff] }
 0x115   :  { %2784 = vmatpush2.bf16.msra.mxu0 %v4629_v11 }
 0x116   :  { %2859 = vmatprep.subr.bf16.mxu0 %v4624_v14  ;;  %2833 = vmatpush2.bf16.msra.mxu1 %v4773_v25  ;;  %v1220_v25 = vld [vmem:[#allocation8 + $0x168] sm:$0xff] }
 0x117   :  { %2834 = vmatprep.subr.bf16.mxu1 %v4766_v29  ;;  %v4608_v33 = vcombine.high %v1216_v23, %v1220_v25 }
 0x11a   :  { %2835 = vmatpush2.bf16.msra.mxu1 %v4765_v30 }
 0x11b   :  { %2836 = vmatprep.subr.bf16.mxu1 %v4758_v34 }
 0x11e   :  { %2837 = vmatpush2.bf16.msra.mxu1 %v4757_v36  ;;  %v1208_v36 = vld [vmem:[#allocation8 + $0x108] sm:$0xff] }
 0x11f   :  { %2912 = vmatprep.subr.bf16.mxu1 %v4752_v39  ;;  %v1212_v39 = vld [vmem:[#allocation8 + $0x128] sm:$0xff] }
 0x120   :  { %v4599_v49 = vcombine.low %v1208_v36, %v1212_v39 }
 0x157   :  { %v973_v45 = vpop.f32.mrf.mxu0 }
 0x158   :  { %v1026_v27 = vpop.f32.mrf.mxu1  ;;  %v974_v50 = vadd.f32 %v973_v45, %v282_v24  ;;  %v4600_v45 = vcombine.high %v1208_v36, %v1212_v39 }
 0x159   :  { %v975_v46 = vpop.f32.mrf.mxu0 }
 0x15a   :  { %v1028_v47 = vpop.f32.mrf.mxu1  ;;  %v976_v48 = vadd.f32 %v975_v46, %v286_v17  ;;  %v1027_v59 = vadd.f32 %v1026_v27, %v974_v50  ;;  %v1200_v27 = vld [vmem:[#allocation8 + $0xc8] sm:$0xff] }
 0x15b   :  { %v977_v52 = vpop.f32.mrf.mxu0  ;;  %v1204_v46 = vld [vmem:[#allocation8 + $0xe8] sm:$0xff] }
 0x15c   :  { %v1030_v32 = vpop.f32.mrf.mxu1  ;;  %v978_v53 = vadd.f32 %v977_v52, %v282_v24  ;;  %v1029_v56 = vadd.f32 %v1028_v47, %v976_v48  ;;  %v1151_v8 = vmax.f32 %v1027_v59, 0.0  ;;  %v4592_v51 = vcombine.high %v1200_v27, %v1204_v46  ;;  %v1196_v47 = vld [vmem:[#allocation8 + $0xa8] sm:$0xff] }
 0x15d   :  { %v979_v35 = vpop.f32.mrf.mxu0  ;;  %v4591_v48 = vcombine.low %v1200_v27, %v1204_v46  ;;  %v1184_v52 = vld [vmem:[#allocation8 + $0x48] sm:$0xff] }
 0x15e   :  { %v1032_v55 = vpop.f32.mrf.mxu1  ;;  %v1031_v57 = vadd.f32 %v1030_v32, %v978_v53  ;;  %v980_v58 = vadd.f32 %v979_v35, %v286_v17  ;;  %v1152_v3 = vmax.f32 %v1029_v56, 0.0  ;;  %v1188_v32 = vld [vmem:[#allocation8 + $0x68] sm:$0xff] }
 0x15f   :  { %v983_v60 = vpop.f32.mrf.mxu0  ;;  %v4576_v35 = vcombine.high %v1184_v52, %v1188_v32  ;;  %v1180_v56 = vld [vmem:[#allocation8 + $0x28] sm:$0xff] }
 0x160   :  { %v1036_v61 = vpop.f32.mrf.mxu1  ;;  %v1033_v62 = vadd.f32 %v1032_v55, %v980_v58  ;;  %v984_v63 = vadd.f32 %v983_v60, %v282_v24  ;;  %v1155_v0 = vmax.f32 %v1031_v57, 0.0  ;;  %v1176_v55 = vld [vmem:[#allocation8 + $0x8] sm:$0xff]  ;;  %v4575_v57 = vcombine.low %v1184_v52, %v1188_v32 }
 0x161   :  { %v985_v1 = vpop.f32.mrf.mxu0  ;;  %v4568_v58 = vcombine.high %v1176_v55, %v1180_v56  ;;  %v1296_v59 = vld [vmem:[#allocation8 + $0x3c8] sm:$0xff] }
 0x162   :  { %v1038_v2 = vpop.f32.mrf.mxu1  ;;  %v1156_v4 = vmax.f32 %v1033_v62, 0.0  ;;  %v986_v5 = vadd.f32 %v985_v1, %v286_v17  ;;  %v1037_v9 = vadd.f32 %v1036_v61, %v984_v63  ;;  %v5750_v15 = vpack.c.bf16 %v1155_v0, %v1151_v8  ;;  %v1300_v60 = vld [vmem:[#allocation8 + $0x3e8] sm:$0xff] }
 0x163   :  { %v987_v10 = vpop.f32.mrf.mxu0  ;;  %v4567_v61 = vcombine.low %v1176_v55, %v1180_v56  ;;  %v4688_v62 = vcombine.high %v1296_v59, %v1300_v60  ;;  %v1288_v63 = vld [vmem:[#allocation8 + $0x388] sm:$0xff]  ;;  %v4687_v1 = vcombine.low %v1296_v59, %v1300_v60  ;;  %v1233_v55 = vld [vmem:[#allocation8 + $0x1d0] sm:$0xff] }
 0x164   :  { %v1040_v11 = vpop.f32.mrf.mxu1  ;;  %v5748_v12 = vpack.c.bf16 %v1156_v4, %v1152_v3  ;;  %v988_v13 = vadd.f32 %v987_v10, %v282_v24  ;;  %v1039_v14 = vadd.f32 %v1038_v2, %v986_v5  ;;  %v1159_v26 = vmax.f32 %v1037_v9, 0.0  ;;  %v1292_v0 = vld [vmem:[#allocation8 + $0x3a8] sm:$0xff]  ;;  %v1237_v56 = vld [vmem:[#allocation8 + $0x1f0] sm:$0xff] }
 0x165   :  { %v989_v18 = vpop.f32.mrf.mxu0  ;;  %v4607_v24 = vcombine.low %v1216_v23, %v1220_v25  ;;  %v4680_v2 = vcombine.high %v1288_v63, %v1292_v0  ;;  %v1280_v3 = vld [vmem:[#allocation8 + $0x348] sm:$0xff]  ;;  %v4679_v5 = vcombine.low %v1288_v63, %v1292_v0 }
 0x166   :  { %v1042_v19 = vpop.f32.mrf.mxu1  ;;  %v990_v21 = vadd.f32 %v989_v18, %v286_v17  ;;  %v1041_v22 = vadd.f32 %v1040_v11, %v988_v13  ;;  %2785 = vmatprep.mubr.bf16.mxu0 %v5748_v12  ;;  %v1160_v28 = vmax.f32 %v1039_v14, 0.0  ;;  %v1284_v4 = vld [vmem:[#allocation8 + $0x368] sm:$0xff] }
 0x167   :  { %2786 = vmatmul.mubr.bf16.vlgmr.msra.gmra.mxu0 %v5750_v15  ;;  %v4672_v6 = vcombine.high %v1280_v3, %v1284_v4  ;;  %v1276_v8 = vld [vmem:[#allocation8 + $0x328] sm:$0xff]  ;;  %v4671_v9 = vcombine.low %v1280_v3, %v1284_v4 }
 0x168   :  { %v1163_v29 = vmax.f32 %v1041_v22, 0.0  ;;  %v1043_v30 = vadd.f32 %v1042_v19, %v990_v21  ;;  %2860 = vmatpush1.bf16.msra.mxu0 %v4623_v54  ;;  %v1192_v54 = vld [vmem:[#allocation8 + $0x88] sm:$0xff]  ;;  %v4664_v10 = vcombine.high %v1272_v7, %v1276_v8  ;;  %v4663_v14 = vcombine.low %v1272_v7, %v1276_v8 }
 0x169   :  { %2861 = vmatprep.subr.bf16.mxu0 %v4616_v20  ;;  %v4584_v50 = vcombine.high %v1192_v54, %v1196_v47  ;;  %v4583_v53 = vcombine.low %v1192_v54, %v1196_v47  ;;  %v1264_v11 = vld [vmem:[#allocation8 + $0x2c8] sm:$0xff]  ;;  %v293_v19 = vsub.s32 3, %v5734_v42  ;;  %v289_v22 = vsub.s32 2, %v5734_v42 }
 0x16a   :  { %v1164_v34 = vmax.f32 %v1043_v30, 0.0  ;;  %v5757_v41 = vpack.c.bf16 %v1163_v29, %v1159_v26  ;;  %v1268_v13 = vld [vmem:[#allocation8 + $0x2e8] sm:$0xff] }
 0x16b   :  { %v4656_v18 = vcombine.high %v1264_v11, %v1268_v13  ;;  %v1256_v20 = vld [vmem:[#allocation8 + $0x288] sm:$0xff]  ;;  %v4655_v23 = vcombine.low %v1264_v11, %v1268_v13  ;;  %v5769_v26 = vrot.slane %v5739_v44, %v293_v19  ;;  %v290_v30 = vrot.slane %v5739_v44, %v289_v22  ;;  %v1225_v13 = vld [vmem:[#allocation8 + $0x190] sm:$0xff] }
 0x16c   :  { %v5759_v17 = vpack.c.bf16 %v1164_v34, %v1160_v28  ;;  %2862 = vmatpush1.bf16.msra.mxu0 %v4615_v31  ;;  %v1260_v21 = vld [vmem:[#allocation8 + $0x2a8] sm:$0xff] }
 0x16d   :  { %2863 = vmatprep.subr.bf16.mxu0 %v4608_v33  ;;  %v4648_v25 = vcombine.high %v1256_v20, %v1260_v21  ;;  %v1248_v28 = vld [vmem:[#allocation8 + $0x248] sm:$0xff]  ;;  %v4647_v34 = vcombine.low %v1256_v20, %v1260_v21 }
 0x16e   :  { %2795 = vmatprep.mubr.bf16.mxu0 %v5759_v17  ;;  %v1252_v29 = vld [vmem:[#allocation8 + $0x268] sm:$0xff] }
 0x16f   :  { %2796 = vmatmul.mubr.bf16.gmra.mxu0 %v5757_v41  ;;  %v1240_v27 = vld [vmem:[#allocation8 + $0x208] sm:$0xff] }
 0x170   :  { %2864 = vmatpush1.bf16.msra.mxu0 %v4607_v24  ;;  %2891 = vmatprep.mubr.bf16.mxu0 %v5748_v12  ;;  %v4640_v24 = vcombine.high %v1248_v28, %v1252_v29  ;;  %v1244_v46 = vld [vmem:[#allocation8 + $0x228] sm:$0xff] }
 0x171   :  { %2865 = vmatprep.subr.bf16.mxu0 %v4600_v45  ;;  %v4632_v52 = vcombine.high %v1240_v27, %v1244_v46  ;;  %v1356_v7 = vld [vmem:[#allocation8 + $0x5a8] sm:$0xff] }
 0x174   :  { %2866 = vmatpush1.bf16.msra.mxu0 %v4599_v49 }
 0x175   :  { %2867 = vmatprep.subr.bf16.mxu0 %v4592_v51 }
 0x178   :  { %2868 = vmatpush1.bf16.msra.mxu0 %v4591_v48  ;;  %v4639_v48 = vcombine.low %v1248_v28, %v1252_v29  ;;  %v4625_v28 = vcombine.low %v1233_v55, %v1237_v56 }
 0x179   :  { %2869 = vmatprep.subr.bf16.mxu0 %v4584_v50 }
 0x17c   :  { %2870 = vmatpush1.bf16.msra.mxu0 %v4583_v53 }
 0x17d   :  { %2871 = vmatprep.subr.bf16.mxu0 %v4576_v35 }
 0x180   :  { %2872 = vmatpush1.bf16.msra.mxu0 %v4575_v57 }
 0x181   :  { %2873 = vmatprep.subr.bf16.mxu0 %v4568_v58 }
 0x184   :  { %2874 = vmatpush1.bf16.msra.mxu0 %v4567_v61 }
 0x185   :  { %2875 = vmatprep.subr.bf16.mxu0 %v4688_v62  ;;  %v4631_v62 = vcombine.low %v1240_v27, %v1244_v46  ;;  %v1221_v27 = vld [vmem:[#allocation8 + $0x170] sm:$0xff] }
 0x188   :  { %2876 = vmatpush2.bf16.msra.mxu0 %v4687_v1 }
 0x189   :  { %2877 = vmatprep.subr.bf16.mxu0 %v4680_v2  ;;  %v4626_v2 = vcombine.high %v1233_v55, %v1237_v56 }
 0x18c   :  { %2878 = vmatpush2.bf16.msra.mxu0 %v4679_v5 }
 0x18d   :  { %2879 = vmatprep.subr.bf16.mxu0 %v4672_v6  ;;  %v1352_v6 = vld [vmem:[#allocation8 + $0x588] sm:$0xff] }
 0x190   :  { %2880 = vmatpush2.bf16.msra.mxu0 %v4671_v9 }
 0x191   :  { %2881 = vmatprep.subr.bf16.mxu0 %v4664_v10 }
 0x194   :  { %2882 = vmatpush2.bf16.msra.mxu0 %v4663_v14  ;;  %v1229_v14 = vld [vmem:[#allocation8 + $0x1b0] sm:$0xff] }
 0x195   :  { %2883 = vmatprep.subr.bf16.mxu0 %v4656_v18 }
 0x197   :  { %v1079_v31 = vpop.f32.mrf.mxu0 }
 0x198   :  { %v1132_v33 = vpop.f32.mrf.mxu1  ;;  %2884 = vmatpush2.bf16.msra.mxu0 %v4655_v23  ;;  %v1080_v49 = vadd.f32 %v1079_v31, %v290_v30  ;;  %v4744_v31 = vcombine.high %v1352_v6, %v1356_v7 }
 0x199   :  { %v1081_v36 = vpop.f32.mrf.mxu0  ;;  %2885 = vmatprep.subr.bf16.mxu0 %v4648_v25 }
 0x19a   :  { %v1134_v39 = vpop.f32.mrf.mxu1  ;;  %v1082_v45 = vadd.f32 %v1081_v36, %v5769_v26  ;;  %v1133_v57 = vadd.f32 %v1132_v33, %v1080_v49  ;;  %v4618_v36 = vcombine.high %v1225_v13, %v1229_v14 }
 0x19b   :  { %v1083_v51 = vpop.f32.mrf.mxu0 }
 0x19c   :  { %v1136_v54 = vpop.f32.mrf.mxu1  ;;  %v1084_v47 = vadd.f32 %v1083_v51, %v290_v30  ;;  %2886 = vmatpush2.bf16.msra.mxu0 %v4647_v34  ;;  %v1135_v32 = vadd.f32 %v1134_v39, %v1082_v45  ;;  %v1153_v8 = vmax.f32 %v1133_v57, 0.0  ;;  %v1344_v39 = vld [vmem:[#allocation8 + $0x548] sm:$0xff] }
 0x19d   :  { %v1085_v50 = vpop.f32.mrf.mxu0  ;;  %2887 = vmatprep.subr.bf16.mxu0 %v4640_v24  ;;  %v1348_v24 = vld [vmem:[#allocation8 + $0x568] sm:$0xff] }
 0x19e   :  { %v1138_v44 = vpop.f32.mrf.mxu1  ;;  %v1137_v53 = vadd.f32 %v1136_v54, %v1084_v47  ;;  %v1086_v35 = vadd.f32 %v1085_v50, %v5769_v26  ;;  %v1154_v3 = vmax.f32 %v1135_v32, 0.0  ;;  %v4617_v54 = vcombine.low %v1225_v13, %v1229_v14  ;;  %v1340_v32 = vld [vmem:[#allocation8 + $0x528] sm:$0xff]  ;;  %v1189_v13 = vld [vmem:[#allocation8 + $0x70] sm:$0xff] }
 0x19f   :  { %v1089_v58 = vpop.f32.mrf.mxu0  ;;  %v4736_v47 = vcombine.high %v1344_v39, %v1348_v24  ;;  %v4735_v56 = vcombine.low %v1344_v39, %v1348_v24  ;;  %v1328_v57 = vld [vmem:[#allocation8 + $0x4c8] sm:$0xff] }
 0x1a0   :  { %v1142_v59 = vpop.f32.mrf.mxu1  ;;  %v1139_v60 = vadd.f32 %v1138_v44, %v1086_v35  ;;  %v1090_v61 = vadd.f32 %v1089_v58, %v290_v30  ;;  %2888 = vmatpush2.bf16.msra.mxu0 %v4639_v48  ;;  %v1157_v63 = vmax.f32 %v1137_v53, 0.0  ;;  %v1336_v44 = vld [vmem:[#allocation8 + $0x508] sm:$0xff]  ;;  %v1209_v53 = vld [vmem:[#allocation8 + $0x110] sm:$0xff] }
 0x1a1   :  { %v1091_v0 = vpop.f32.mrf.mxu0  ;;  %2889 = vmatprep.subr.bf16.mxu0 %v4632_v52  ;;  %v1213_v35 = vld [vmem:[#allocation8 + $0x130] sm:$0xff]  ;;  %v4728_v38 = vcombine.high %v1336_v44, %v1340_v32  ;;  %v1332_v58 = vld [vmem:[#allocation8 + $0x4e8] sm:$0xff] }
 0x1a2   :  { %v1144_v1 = vpop.f32.mrf.mxu1  ;;  %v1158_v4 = vmax.f32 %v1139_v60, 0.0  ;;  %v1092_v5 = vadd.f32 %v1091_v0, %v5769_v26  ;;  %v1143_v9 = vadd.f32 %v1142_v59, %v1090_v61  ;;  %v5779_v23 = vpack.c.bf16 %v1157_v63, %v1153_v8  ;;  %v1201_v59 = vld [vmem:[#allocation8 + $0xd0] sm:$0xff] }
 0x1a3   :  { %v1093_v10 = vpop.f32.mrf.mxu0  ;;  %v1205_v60 = vld [vmem:[#allocation8 + $0xf0] sm:$0xff]  ;;  %v4727_v61 = vcombine.low %v1336_v44, %v1340_v32  ;;  %v4720_v63 = vcombine.high %v1328_v57, %v1332_v58 }
 0x1a4   :  { %v1146_v11 = vpop.f32.mrf.mxu1  ;;  %v5777_v18 = vpack.c.bf16 %v1158_v4, %v1154_v3  ;;  %v1094_v20 = vadd.f32 %v1093_v10, %v290_v30  ;;  %v1145_v21 = vadd.f32 %v1144_v1, %v1092_v5  ;;  %2890 = vmatpush2.bf16.msra.mxu0 %v4631_v62  ;;  %v1161_v45 = vmax.f32 %v1143_v9, 0.0  ;;  %v1217_v30 = vld [vmem:[#allocation8 + $0x150] sm:$0xff]  ;;  %v1320_v1 = vld [vmem:[#allocation8 + $0x488] sm:$0xff] }
 0x1a5   :  { %v1095_v25 = vpop.f32.mrf.mxu0  ;;  %2965 = vmatprep.subr.bf16.mxu0 %v4626_v2  ;;  %v4610_v50 = vcombine.high %v1217_v30, %v1221_v27  ;;  %v4609_v37 = vcombine.low %v1217_v30, %v1221_v27  ;;  %v4601_v62 = vcombine.low %v1209_v53, %v1213_v35  ;;  %v4594_v0 = vcombine.high %v1201_v59, %v1205_v60  ;;  %v1324_v2 = vld [vmem:[#allocation8 + $0x4a8] sm:$0xff]  ;;  %v1193_v3 = vld [vmem:[#allocation8 + $0x90] sm:$0xff] }
 0x1a6   :  { %v1148_v29 = vpop.f32.mrf.mxu1  ;;  %v1096_v33 = vadd.f32 %v1095_v25, %v5769_v26  ;;  %v1147_v34 = vadd.f32 %v1146_v11, %v1094_v20  ;;  %2838 = vmatprep.mubr.bf16.mxu1 %v5777_v18  ;;  %v1162_v46 = vmax.f32 %v1145_v21, 0.0  ;;  %v4743_v26 = vcombine.low %v1352_v6, %v1356_v7  ;;  %v1197_v4 = vld [vmem:[#allocation8 + $0xb0] sm:$0xff]  ;;  %v1312_v9 = vld [vmem:[#allocation8 + $0x448] sm:$0xff] }
 0x1a7   :  { %2892 = vmatmul.mubr.bf16.vlgmr.msra.gmra.mxu0 %v5750_v15  ;;  %2839 = vmatmul.mubr.bf16.vlgmr.msra.gmra.mxu1 %v5779_v23  ;;  %v4719_v5 = vcombine.low %v1328_v57, %v1332_v58  ;;  %v4593_v6 = vcombine.low %v1201_v59, %v1205_v60  ;;  %v4712_v7 = vcombine.high %v1320_v1, %v1324_v2  ;;  %v1316_v10 = vld [vmem:[#allocation8 + $0x468] sm:$0xff]  ;;  %v1185_v11 = vld [vmem:[#allocation8 + $0x50] sm:$0xff] }
 0x1a8   :  { %v1165_v49 = vmax.f32 %v1147_v34, 0.0  ;;  %v1149_v51 = vadd.f32 %v1148_v29, %v1096_v33  ;;  %2901 = vmatprep.mubr.bf16.mxu0 %v5759_v17  ;;  %2913 = vmatpush1.bf16.msra.mxu1 %v4751_v40  ;;  %v4602_v40 = vcombine.high %v1209_v53, %v1213_v35  ;;  %v4586_v8 = vcombine.high %v1193_v3, %v1197_v4  ;;  %v1308_v29 = vld [vmem:[#allocation8 + $0x428] sm:$0xff]  ;;  %v1181_v33 = vld [vmem:[#allocation8 + $0x30] sm:$0xff] }
 0x1a9   :  { %2966 = vmatpush1.bf16.msra.mxu0 %v4625_v28  ;;  %2914 = vmatprep.subr.bf16.mxu1 %v4744_v31  ;;  %v4711_v14 = vcombine.low %v1320_v1, %v1324_v2  ;;  %v4585_v20 = vcombine.low %v1193_v3, %v1197_v4  ;;  %v4704_v21 = vcombine.high %v1312_v9, %v1316_v10  ;;  %v1304_v28 = vld [vmem:[#allocation8 + $0x408] sm:$0xff]  ;;  %v1177_v31 = vld [vmem:[#allocation8 + $0x10] sm:$0xff] }
 0x1aa   :  { %v1166_v48 = vmax.f32 %v1149_v51, 0.0  ;;  %2967 = vmatprep.subr.bf16.mxu0 %v4618_v36  ;;  %v5789_v52 = vpack.c.bf16 %v1165_v49, %v1161_v45  ;;  %v4578_v25 = vcombine.high %v1185_v11, %v1189_v13  ;;  %v4703_v34 = vcombine.low %v1312_v9, %v1316_v10  ;;  %v1424_v45 = vld [vmem:[#allocation8 + $0x7c8] sm:$0xff]  ;;  %v1297_v27 = vld [vmem:[#allocation8 + $0x3d0] sm:$0xff] }
 0x1ab   :  { %v4577_v36 = vcombine.low %v1185_v11, %v1189_v13  ;;  %v4696_v39 = vcombine.high %v1304_v28, %v1308_v29  ;;  %v4570_v24 = vcombine.high %v1177_v31, %v1181_v33  ;;  %v1428_v30 = vld [vmem:[#allocation8 + $0x7e8] sm:$0xff]  ;;  %v4695_v49 = vcombine.low %v1304_v28, %v1308_v29  ;;  %v1293_v44 = vld [vmem:[#allocation8 + $0x3b0] sm:$0xff] }
 0x1ac   :  { %v5791_v55 = vpack.c.bf16 %v1166_v48, %v1162_v46  ;;  %2915 = vmatpush1.bf16.msra.mxu1 %v4743_v26  ;;  %v1301_v46 = vld [vmem:[#allocation8 + $0x3f0] sm:$0xff]  ;;  %v4569_v51 = vcombine.low %v1177_v31, %v1181_v33  ;;  %v4816_v26 = vcombine.high %v1424_v45, %v1428_v30  ;;  %v1420_v48 = vld [vmem:[#allocation8 + $0x7a8] sm:$0xff]  ;;  %v4815_v32 = vcombine.low %v1424_v45, %v1428_v30 }
 0x1ad   :  { %2968 = vmatpush1.bf16.msra.mxu0 %v4617_v54  ;;  %2916 = vmatprep.subr.bf16.mxu1 %v4736_v47  ;;  %v4690_v54 = vcombine.high %v1297_v27, %v1301_v46  ;;  %v1416_v47 = vld [vmem:[#allocation8 + $0x788] sm:$0xff]  ;;  %v4689_v53 = vcombine.low %v1297_v27, %v1301_v46  ;;  %v1285_v57 = vld [vmem:[#allocation8 + $0x370] sm:$0xff] }
 0x1ae   :  { %2848 = vmatprep.mubr.bf16.mxu1 %v5791_v55  ;;  %2969 = vmatprep.subr.bf16.mxu0 %v4610_v50  ;;  %v1289_v50 = vld [vmem:[#allocation8 + $0x390] sm:$0xff]  ;;  %v4808_v35 = vcombine.high %v1416_v47, %v1420_v48  ;;  %v4807_v58 = vcombine.low %v1416_v47, %v1420_v48 }
 0x1af   :  { %2902 = vmatmul.mubr.bf16.gmra.mxu0 %v5757_v41  ;;  %2849 = vmatmul.mubr.bf16.gmra.mxu1 %v5789_v52  ;;  %v4681_v59 = vcombine.low %v1289_v50, %v1293_v44  ;;  %v1277_v1 = vld [vmem:[#allocation8 + $0x330] sm:$0xff] }
 0x1b0   :  { %2917 = vmatpush1.bf16.msra.mxu1 %v4735_v56  ;;  %2997 = vmatprep.mubr.bf16.mxu0 %v5748_v12  ;;  %v4682_v56 = vcombine.high %v1289_v50, %v1293_v44  ;;  %v1269_v9 = vld [vmem:[#allocation8 + $0x2f0] sm:$0xff] }
 0x1b1   :  { %2970 = vmatpush1.bf16.msra.mxu0 %v4609_v37  ;;  %2944 = vmatprep.mubr.bf16.mxu1 %v5777_v18  ;;  %v1408_v37 = vld [vmem:[#allocation8 + $0x748] sm:$0xff]  ;;  %v1261_v28 = vld [vmem:[#allocation8 + $0x2b0] sm:$0xff] }
 0x1b2   :  { %2918 = vmatprep.subr.bf16.mxu1 %v4728_v38  ;;  %2971 = vmatprep.subr.bf16.mxu0 %v4602_v40  ;;  %v1412_v38 = vld [vmem:[#allocation8 + $0x768] sm:$0xff]  ;;  %v1281_v40 = vld [vmem:[#allocation8 + $0x350] sm:$0xff] }
 0x1b3   :  { %v4800_v60 = vcombine.high %v1408_v37, %v1412_v38  ;;  %v4799_v2 = vcombine.low %v1408_v37, %v1412_v38  ;;  %v4673_v3 = vcombine.low %v1281_v40, %v1285_v57  ;;  %v1253_v45 = vld [vmem:[#allocation8 + $0x270] sm:$0xff]  ;;  %v1238_v37 = vld [vmem:[#allocation8 + $0x1f8] sm:$0xff] }
 0x1b4   :  { %2919 = vmatpush1.bf16.msra.mxu1 %v4727_v61  ;;  %v4674_v61 = vcombine.high %v1281_v40, %v1285_v57  ;;  %v1245_v47 = vld [vmem:[#allocation8 + $0x230] sm:$0xff] }
 0x1b5   :  { %2972 = vmatpush1.bf16.msra.mxu0 %v4601_v62  ;;  %2920 = vmatprep.subr.bf16.mxu1 %v4720_v63  ;;  %v1400_v62 = vld [vmem:[#allocation8 + $0x708] sm:$0xff] }
 0x1b6   :  { %2973 = vmatprep.subr.bf16.mxu0 %v4594_v0  ;;  %v1404_v63 = vld [vmem:[#allocation8 + $0x728] sm:$0xff]  ;;  %v1273_v0 = vld [vmem:[#allocation8 + $0x310] sm:$0xff] }
 0x1b7   :  { %v4792_v4 = vcombine.high %v1400_v62, %v1404_v63  ;;  %v4791_v10 = vcombine.low %v1400_v62, %v1404_v63  ;;  %v4665_v11 = vcombine.low %v1273_v0, %v1277_v1  ;;  %v1230_v62 = vld [vmem:[#allocation8 + $0x1b8] sm:$0xff] }
 0x1b8   :  { %2921 = vmatpush1.bf16.msra.mxu1 %v4719_v5  ;;  %v4666_v5 = vcombine.high %v1273_v0, %v1277_v1 }
 0x1b9   :  { %2974 = vmatpush1.bf16.msra.mxu0 %v4593_v6  ;;  %2922 = vmatprep.subr.bf16.mxu1 %v4712_v7  ;;  %v1392_v6 = vld [vmem:[#allocation8 + $0x6c8] sm:$0xff] }
 0x1ba   :  { %2975 = vmatprep.subr.bf16.mxu0 %v4586_v8  ;;  %v1396_v7 = vld [vmem:[#allocation8 + $0x6e8] sm:$0xff]  ;;  %v1265_v8 = vld [vmem:[#allocation8 + $0x2d0] sm:$0xff] }
 0x1bb   :  { %v4784_v13 = vcombine.high %v1392_v6, %v1396_v7  ;;  %v4783_v29 = vcombine.low %v1392_v6, %v1396_v7  ;;  %v4657_v31 = vcombine.low %v1265_v8, %v1269_v9  ;;  %v1222_v6 = vld [vmem:[#allocation8 + $0x178] sm:$0xff] }
 0x1bc   :  { %2923 = vmatpush1.bf16.msra.mxu1 %v4711_v14  ;;  %v4658_v14 = vcombine.high %v1265_v8, %v1269_v9 }
 0x1bd   :  { %2976 = vmatpush1.bf16.msra.mxu0 %v4585_v20  ;;  %2924 = vmatprep.subr.bf16.mxu1 %v4704_v21  ;;  %v1384_v20 = vld [vmem:[#allocation8 + $0x688] sm:$0xff] }
 0x1be   :  { %2977 = vmatprep.subr.bf16.mxu0 %v4578_v25  ;;  %v1388_v21 = vld [vmem:[#allocation8 + $0x6a8] sm:$0xff]  ;;  %v1257_v25 = vld [vmem:[#allocation8 + $0x290] sm:$0xff] }
 0x1bf   :  { %v4776_v33 = vcombine.high %v1384_v20, %v1388_v21  ;;  %v4775_v30 = vcombine.low %v1384_v20, %v1388_v21  ;;  %v4649_v27 = vcombine.low %v1257_v25, %v1261_v28  ;;  %v1214_v20 = vld [vmem:[#allocation8 + $0x138] sm:$0xff] }
 0x1c0   :  { %2925 = vmatpush1.bf16.msra.mxu1 %v4703_v34  ;;  %v4650_v34 = vcombine.high %v1257_v25, %v1261_v28 }
 0x1c1   :  { %2978 = vmatpush1.bf16.msra.mxu0 %v4577_v36  ;;  %2926 = vmatprep.subr.bf16.mxu1 %v4696_v39  ;;  %v1376_v36 = vld [vmem:[#allocation8 + $0x648] sm:$0xff] }
 0x1c2   :  { %2979 = vmatprep.subr.bf16.mxu0 %v4570_v24  ;;  %v1380_v39 = vld [vmem:[#allocation8 + $0x668] sm:$0xff]  ;;  %v1249_v24 = vld [vmem:[#allocation8 + $0x250] sm:$0xff] }
 0x1c3   :  { %v4768_v46 = vcombine.high %v1376_v36, %v1380_v39  ;;  %v4767_v48 = vcombine.low %v1376_v36, %v1380_v39  ;;  %v4641_v50 = vcombine.low %v1249_v24, %v1253_v45  ;;  %v1206_v36 = vld [vmem:[#allocation8 + $0xf8] sm:$0xff] }
 0x1c4   :  { %2927 = vmatpush1.bf16.msra.mxu1 %v4695_v49  ;;  %v4642_v49 = vcombine.high %v1249_v24, %v1253_v45 }
 0x1c5   :  { %2980 = vmatpush1.bf16.msra.mxu0 %v4569_v51  ;;  %2928 = vmatprep.subr.bf16.mxu1 %v4816_v26  ;;  %v1368_v51 = vld [vmem:[#allocation8 + $0x608] sm:$0xff] }
 0x1c6   :  { %2981 = vmatprep.subr.bf16.mxu0 %v4690_v54  ;;  %v1372_v26 = vld [vmem:[#allocation8 + $0x628] sm:$0xff]  ;;  %v1241_v54 = vld [vmem:[#allocation8 + $0x210] sm:$0xff] }
 0x1c7   :  { %v4760_v44 = vcombine.high %v1368_v51, %v1372_v26  ;;  %v4759_v38 = vcombine.low %v1368_v51, %v1372_v26  ;;  %v4633_v40 = vcombine.low %v1241_v54, %v1245_v47  ;;  %v1198_v51 = vld [vmem:[#allocation8 + $0xb8] sm:$0xff] }
 0x1c8   :  { %2929 = vmatpush2.bf16.msra.mxu1 %v4815_v32  ;;  %v4634_v32 = vcombine.high %v1241_v54, %v1245_v47 }
 0x1c9   :  { %2982 = vmatpush2.bf16.msra.mxu0 %v4689_v53  ;;  %2930 = vmatprep.subr.bf16.mxu1 %v4808_v35  ;;  %v1361_v53 = vld [vmem:[#allocation8 + $0x5d0] sm:$0xff] }
 0x1ca   :  { %2983 = vmatprep.subr.bf16.mxu0 %v4682_v56  ;;  %v1365_v35 = vld [vmem:[#allocation8 + $0x5f0] sm:$0xff]  ;;  %v1234_v56 = vld [vmem:[#allocation8 + $0x1d8] sm:$0xff] }
 0x1cb   :  { %v4754_v57 = vcombine.high %v1361_v53, %v1365_v35  ;;  %v4753_v63 = vcombine.low %v1361_v53, %v1365_v35  ;;  %v4627_v0 = vcombine.low %v1234_v56, %v1238_v37 }
 0x1cc   :  { %2931 = vmatpush2.bf16.msra.mxu1 %v4807_v58  ;;  %v4628_v58 = vcombine.high %v1234_v56, %v1238_v37 }
 0x1cd   :  { %2984 = vmatpush2.bf16.msra.mxu0 %v4681_v59  ;;  %2932 = vmatprep.subr.bf16.mxu1 %v4800_v60  ;;  %v1353_v59 = vld [vmem:[#allocation8 + $0x590] sm:$0xff] }
 0x1ce   :  { %2985 = vmatprep.subr.bf16.mxu0 %v4674_v61  ;;  %v1357_v60 = vld [vmem:[#allocation8 + $0x5b0] sm:$0xff]  ;;  %v1226_v61 = vld [vmem:[#allocation8 + $0x198] sm:$0xff] }
 0x1cf   :  { %v4746_v1 = vcombine.high %v1353_v59, %v1357_v60  ;;  %v4745_v7 = vcombine.low %v1353_v59, %v1357_v60  ;;  %v4619_v8 = vcombine.low %v1226_v61, %v1230_v62 }
 0x1d0   :  { %2933 = vmatpush2.bf16.msra.mxu1 %v4799_v2  ;;  %v4620_v2 = vcombine.high %v1226_v61, %v1230_v62 }
 0x1d1   :  { %2986 = vmatpush2.bf16.msra.mxu0 %v4673_v3  ;;  %2934 = vmatprep.subr.bf16.mxu1 %v4792_v4  ;;  %v1345_v3 = vld [vmem:[#allocation8 + $0x550] sm:$0xff] }
 0x1d2   :  { %2987 = vmatprep.subr.bf16.mxu0 %v4666_v5  ;;  %v1349_v4 = vld [vmem:[#allocation8 + $0x570] sm:$0xff]  ;;  %v1218_v5 = vld [vmem:[#allocation8 + $0x158] sm:$0xff] }
 0x1d3   :  { %v4738_v9 = vcombine.high %v1345_v3, %v1349_v4  ;;  %v4737_v21 = vcombine.low %v1345_v3, %v1349_v4  ;;  %v4611_v25 = vcombine.low %v1218_v5, %v1222_v6 }
 0x1d4   :  { %2935 = vmatpush2.bf16.msra.mxu1 %v4791_v10  ;;  %v4612_v10 = vcombine.high %v1218_v5, %v1222_v6 }
 0x1d5   :  { %2988 = vmatpush2.bf16.msra.mxu0 %v4665_v11  ;;  %2936 = vmatprep.subr.bf16.mxu1 %v4784_v13  ;;  %v1337_v11 = vld [vmem:[#allocation8 + $0x510] sm:$0xff] }
 0x1d6   :  { %2989 = vmatprep.subr.bf16.mxu0 %v4658_v14  ;;  %v1341_v13 = vld [vmem:[#allocation8 + $0x530] sm:$0xff]  ;;  %v1210_v14 = vld [vmem:[#allocation8 + $0x118] sm:$0xff] }
 0x1d7   :  { %v4730_v28 = vcombine.high %v1337_v11, %v1341_v13  ;;  %v4729_v39 = vcombine.low %v1337_v11, %v1341_v13  ;;  %v4603_v24 = vcombine.low %v1210_v14, %v1214_v20 }
 0x1d8   :  { %2937 = vmatpush2.bf16.msra.mxu1 %v4783_v29  ;;  %v4604_v29 = vcombine.high %v1210_v14, %v1214_v20 }
 0x1d9   :  { %2990 = vmatpush2.bf16.msra.mxu0 %v4657_v31  ;;  %2938 = vmatprep.subr.bf16.mxu1 %v4776_v33  ;;  %v1329_v31 = vld [vmem:[#allocation8 + $0x4d0] sm:$0xff] }
 0x1da   :  { %2991 = vmatprep.subr.bf16.mxu0 %v4650_v34  ;;  %v1333_v33 = vld [vmem:[#allocation8 + $0x4f0] sm:$0xff]  ;;  %v1202_v34 = vld [vmem:[#allocation8 + $0xd8] sm:$0xff] }
 0x1db   :  { %v4722_v45 = vcombine.high %v1329_v31, %v1333_v33  ;;  %v4721_v26 = vcombine.low %v1329_v31, %v1333_v33  ;;  %v4595_v54 = vcombine.low %v1202_v34, %v1206_v36 }
 0x1dc   :  { %2939 = vmatpush2.bf16.msra.mxu1 %v4775_v30  ;;  %v4596_v30 = vcombine.high %v1202_v34, %v1206_v36 }
 0x1dd   :  { %2992 = vmatpush2.bf16.msra.mxu0 %v4649_v27  ;;  %2940 = vmatprep.subr.bf16.mxu1 %v4768_v46  ;;  %v1321_v27 = vld [vmem:[#allocation8 + $0x490] sm:$0xff] }
 0x1de   :  { %2993 = vmatprep.subr.bf16.mxu0 %v4642_v49  ;;  %v1325_v46 = vld [vmem:[#allocation8 + $0x4b0] sm:$0xff]  ;;  %v1194_v49 = vld [vmem:[#allocation8 + $0x98] sm:$0xff] }
 0x1df   :  { %v4714_v47 = vcombine.high %v1321_v27, %v1325_v46  ;;  %v4713_v53 = vcombine.low %v1321_v27, %v1325_v46  ;;  %v4587_v35 = vcombine.low %v1194_v49, %v1198_v51 }
 0x1e0   :  { %2941 = vmatpush2.bf16.msra.mxu1 %v4767_v48  ;;  %v4588_v48 = vcombine.high %v1194_v49, %v1198_v51 }
 0x1e1   :  { %2994 = vmatpush2.bf16.msra.mxu0 %v4641_v50  ;;  %2942 = vmatprep.subr.bf16.mxu1 %v4760_v44  ;;  %v1317_v50 = vld [vmem:[#allocation8 + $0x470] sm:$0xff]  ;;  %v1186_v44 = vld [vmem:[#allocation8 + $0x58] sm:$0xff] }
 0x1e2   :  { %2995 = vmatprep.subr.bf16.mxu0 %v4634_v32  ;;  %v1190_v32 = vld [vmem:[#allocation8 + $0x78] sm:$0xff] }
 0x1e3   :  { %v4580_v37 = vcombine.high %v1186_v44, %v1190_v32  ;;  %v4579_v60 = vcombine.low %v1186_v44, %v1190_v32 }
 0x1e4   :  { %2943 = vmatpush2.bf16.msra.mxu1 %v4759_v38  ;;  %v1305_v38 = vld [vmem:[#allocation8 + $0x410] sm:$0xff] }
 0x1e5   :  { %2996 = vmatpush2.bf16.msra.mxu0 %v4633_v40  ;;  %3018 = vmatprep.subr.bf16.mxu1 %v4754_v57  ;;  %v1309_v40 = vld [vmem:[#allocation8 + $0x430] sm:$0xff]  ;;  %v1178_v57 = vld [vmem:[#allocation8 + $0x18] sm:$0xff] }
 0x1e6   :  { %3071 = vmatprep.subr.bf16.mxu0 %v4628_v58  ;;  %v1182_v58 = vld [vmem:[#allocation8 + $0x38] sm:$0xff]  ;;  %v4698_v61 = vcombine.high %v1305_v38, %v1309_v40  ;;  %v4697_v3 = vcombine.low %v1305_v38, %v1309_v40 }
 0x1e7   :  { %2945 = vmatmul.mubr.bf16.vlgmr.msra.gmra.mxu1 %v5779_v23  ;;  %v4572_v62 = vcombine.high %v1178_v57, %v1182_v58  ;;  %v4571_v4 = vcombine.low %v1178_v57, %v1182_v58 }
 0x1e8   :  { %2998 = vmatmul.mubr.bf16.vlgmr.msra.gmra.mxu0 %v5750_v15  ;;  %2954 = vmatprep.mubr.bf16.mxu1 %v5791_v55 }
 0x1e9   :  { %3007 = vmatprep.mubr.bf16.mxu0 %v5759_v17  ;;  %3019 = vmatpush1.bf16.msra.mxu1 %v4753_v63  ;;  %v1425_v63 = vld [vmem:[#allocation8 + $0x7d0] sm:$0xff] }
 0x1ea   :  { %3072 = vmatpush1.bf16.msra.mxu0 %v4627_v0  ;;  %3020 = vmatprep.subr.bf16.mxu1 %v4746_v1  ;;  %v1429_v0 = vld [vmem:[#allocation8 + $0x7f0] sm:$0xff]  ;;  %v1298_v1 = vld [vmem:[#allocation8 + $0x3d8] sm:$0xff] }
 0x1eb   :  { %3073 = vmatprep.subr.bf16.mxu0 %v4620_v2  ;;  %v1302_v2 = vld [vmem:[#allocation8 + $0x3f8] sm:$0xff]  ;;  %v4818_v5 = vcombine.high %v1425_v63, %v1429_v0  ;;  %v4817_v11 = vcombine.low %v1425_v63, %v1429_v0 }
 0x1ec   :  { %v4692_v6 = vcombine.high %v1298_v1, %v1302_v2  ;;  %v4691_v13 = vcombine.low %v1298_v1, %v1302_v2 }
 0x1ed   :  { %3021 = vmatpush1.bf16.msra.mxu1 %v4745_v7  ;;  %v1417_v7 = vld [vmem:[#allocation8 + $0x790] sm:$0xff] }
 0x1ee   :  { %3074 = vmatpush1.bf16.msra.mxu0 %v4619_v8  ;;  %3022 = vmatprep.subr.bf16.mxu1 %v4738_v9  ;;  %v1421_v8 = vld [vmem:[#allocation8 + $0x7b0] sm:$0xff]  ;;  %v1290_v9 = vld [vmem:[#allocation8 + $0x398] sm:$0xff] }
 0x1ef   :  { %2955 = vmatmul.mubr.bf16.gmra.mxu1 %v5789_v52  ;;  %3075 = vmatprep.subr.bf16.mxu0 %v4612_v10  ;;  %v1294_v10 = vld [vmem:[#allocation8 + $0x3b8] sm:$0xff]  ;;  %v4810_v14 = vcombine.high %v1417_v7, %v1421_v8  ;;  %v4809_v31 = vcombine.low %v1417_v7, %v1421_v8 }
 0x1f0   :  { %3008 = vmatmul.mubr.bf16.gmra.mxu0 %v5757_v41  ;;  %3050 = vmatprep.mubr.bf16.mxu1 %v5777_v18  ;;  %v4684_v20 = vcombine.high %v1290_v9, %v1294_v10  ;;  %v4683_v33 = vcombine.low %v1290_v9, %v1294_v10 }
 0x1f1   :  { %3023 = vmatpush1.bf16.msra.mxu1 %v4737_v21  ;;  %3103 = vmatprep.mubr.bf16.mxu0 %v5748_v12  ;;  %v1313_v12 = vld [vmem:[#allocation8 + $0x450] sm:$0xff] }
 0x1f2   :  { %3076 = vmatpush1.bf16.msra.mxu0 %v4611_v25  ;;  %3024 = vmatprep.subr.bf16.mxu1 %v4730_v28  ;;  %v4706_v56 = vcombine.high %v1313_v12, %v1317_v50  ;;  %v4705_v59 = vcombine.low %v1313_v12, %v1317_v50  ;;  %v1409_v21 = vld [vmem:[#allocation8 + $0x750] sm:$0xff]  ;;  %v1282_v28 = vld [vmem:[#allocation8 + $0x358] sm:$0xff] }
 0x1f3   :  { %3077 = vmatprep.subr.bf16.mxu0 %v4604_v29  ;;  %v1413_v25 = vld [vmem:[#allocation8 + $0x770] sm:$0xff]  ;;  %v1286_v29 = vld [vmem:[#allocation8 + $0x378] sm:$0xff] }
 0x1f4   :  { %v4802_v34 = vcombine.high %v1409_v21, %v1413_v25  ;;  %v4676_v36 = vcombine.high %v1282_v28, %v1286_v29  ;;  %v4801_v27 = vcombine.low %v1409_v21, %v1413_v25  ;;  %v4675_v46 = vcombine.low %v1282_v28, %v1286_v29  ;;  %v5220_v25 = vld [vmem:[#allocation11 + $0x74] ss:$8 sps:$4 sm:$0xff]  }
 0x1f5   :  { %3025 = vmatpush1.bf16.msra.mxu1 %v4729_v39  ;;  %v1401_v39 = vld [vmem:[#allocation8 + $0x710] sm:$0xff]  ;;  %v1354_v28 = vld [vmem:[#allocation8 + $0x598] sm:$0xff] }
 0x1f6   :  { %3078 = vmatpush1.bf16.msra.mxu0 %v4603_v24  ;;  %3026 = vmatprep.subr.bf16.mxu1 %v4722_v45  ;;  %v1405_v24 = vld [vmem:[#allocation8 + $0x730] sm:$0xff]  ;;  %v1274_v45 = vld [vmem:[#allocation8 + $0x318] sm:$0xff] }
 0x1f7   :  { %3079 = vmatprep.subr.bf16.mxu0 %v4596_v30  ;;  %v1278_v30 = vld [vmem:[#allocation8 + $0x338] sm:$0xff]  ;;  %v4794_v49 = vcombine.high %v1401_v39, %v1405_v24  ;;  %v4793_v12 = vcombine.low %v1401_v39, %v1405_v24  ;;  %v5223_v24 = vld [vmem:[#allocation11 + $0x64] ss:$8 sps:$4 sm:$0xff]  }
 0x1f8   :  { %v4668_v51 = vcombine.high %v1274_v45, %v1278_v30  ;;  %v4667_v50 = vcombine.low %v1274_v45, %v1278_v30  ;;  %v1358_v29 = vld [vmem:[#allocation8 + $0x5b8] sm:$0xff] }
 0x1f9   :  { %3027 = vmatpush1.bf16.msra.mxu1 %v4721_v26  ;;  %v1393_v26 = vld [vmem:[#allocation8 + $0x6d0] sm:$0xff]  ;;  %v1350_v39 = vld [vmem:[#allocation8 + $0x578] sm:$0xff]  ;;  %v4747_v45 = vcombine.low %v1354_v28, %v1358_v29 }
 0x1fa   :  { %3080 = vmatpush1.bf16.msra.mxu0 %v4595_v54  ;;  %3028 = vmatprep.subr.bf16.mxu1 %v4714_v47  ;;  %v1397_v54 = vld [vmem:[#allocation8 + $0x6f0] sm:$0xff]  ;;  %v1266_v47 = vld [vmem:[#allocation8 + $0x2d8] sm:$0xff] }
 0x1fb   :  { %3081 = vmatprep.subr.bf16.mxu0 %v4588_v48  ;;  %v1270_v48 = vld [vmem:[#allocation8 + $0x2f8] sm:$0xff]  ;;  %v4786_v44 = vcombine.high %v1393_v26, %v1397_v54  ;;  %v4785_v38 = vcombine.low %v1393_v26, %v1397_v54 }
 0x1fc   :  { %v4660_v32 = vcombine.high %v1266_v47, %v1270_v48  ;;  %v4659_v40 = vcombine.low %v1266_v47, %v1270_v48  ;;  %v1330_v47 = vld [vmem:[#allocation8 + $0x4d8] sm:$0xff]  ;;  %v5229_v48 = vld [vmem:[#allocation11 + $0x44] ss:$8 sps:$4 sm:$0xff]  }
 0x1fd   :  { %3029 = vmatpush1.bf16.msra.mxu1 %v4713_v53  ;;  %v1385_v53 = vld [vmem:[#allocation8 + $0x690] sm:$0xff] }
 0x1fe   :  { %3082 = vmatpush1.bf16.msra.mxu0 %v4587_v35  ;;  %3030 = vmatprep.subr.bf16.mxu1 %v4706_v56  ;;  %v1389_v35 = vld [vmem:[#allocation8 + $0x6b0] sm:$0xff]  ;;  %v1258_v56 = vld [vmem:[#allocation8 + $0x298] sm:$0xff] }
 0x1ff   :  { %3083 = vmatprep.subr.bf16.mxu0 %v4580_v37  ;;  %v1262_v37 = vld [vmem:[#allocation8 + $0x2b8] sm:$0xff]  ;;  %v4778_v57 = vcombine.high %v1385_v53, %v1389_v35  ;;  %v4777_v63 = vcombine.low %v1385_v53, %v1389_v35 }
 0x200   :  { %v4652_v58 = vcombine.high %v1258_v56, %v1262_v37  ;;  %v4651_v0 = vcombine.low %v1258_v56, %v1262_v37  ;;  %v1326_v53 = vld [vmem:[#allocation8 + $0x4b8] sm:$0xff] }
 0x201   :  { %3031 = vmatpush1.bf16.msra.mxu1 %v4705_v59  ;;  %v1377_v59 = vld [vmem:[#allocation8 + $0x650] sm:$0xff]  ;;  %v5232_v35 = vld [vmem:[#allocation11 + $0x34] ss:$8 sps:$4 sm:$0xff]  }
 0x202   :  { %3084 = vmatpush1.bf16.msra.mxu0 %v4579_v60  ;;  %3032 = vmatprep.subr.bf16.mxu1 %v4698_v61  ;;  %v1381_v60 = vld [vmem:[#allocation8 + $0x670] sm:$0xff]  ;;  %v1250_v61 = vld [vmem:[#allocation8 + $0x258] sm:$0xff] }
 0x203   :  { %3085 = vmatprep.subr.bf16.mxu0 %v4572_v62  ;;  %v1254_v62 = vld [vmem:[#allocation8 + $0x278] sm:$0xff]  ;;  %v4770_v1 = vcombine.high %v1377_v59, %v1381_v60  ;;  %v4769_v7 = vcombine.low %v1377_v59, %v1381_v60  ;;  %v5233_v59 = vld [vmem:[#allocation11 + $0x20] ss:$8 sps:$4 sm:$0xff]  }
 0x204   :  { %v4644_v2 = vcombine.high %v1250_v61, %v1254_v62  ;;  %v4643_v8 = vcombine.low %v1250_v61, %v1254_v62  ;;  %v1306_v60 = vld [vmem:[#allocation8 + $0x418] sm:$0xff] }
 0x205   :  { %3033 = vmatpush1.bf16.msra.mxu1 %v4697_v3  ;;  %v1369_v3 = vld [vmem:[#allocation8 + $0x610] sm:$0xff]  ;;  %v1310_v61 = vld [vmem:[#allocation8 + $0x438] sm:$0xff] }
 0x206   :  { %3086 = vmatpush1.bf16.msra.mxu0 %v4571_v4  ;;  %3034 = vmatprep.subr.bf16.mxu1 %v4818_v5  ;;  %v1373_v4 = vld [vmem:[#allocation8 + $0x630] sm:$0xff]  ;;  %v1242_v5 = vld [vmem:[#allocation8 + $0x218] sm:$0xff] }
 0x207   :  { %3087 = vmatprep.subr.bf16.mxu0 %v4692_v6  ;;  %v1246_v6 = vld [vmem:[#allocation8 + $0x238] sm:$0xff]  ;;  %v4762_v9 = vcombine.high %v1369_v3, %v1373_v4 }
 0x208   :  { %v4636_v10 = vcombine.high %v1242_v5, %v1246_v6  ;;  %v5238_v62 = vld [vmem:[#allocation11 + $0x14] ss:$8 sps:$4 sm:$0xff]  }
 0x209   :  { %3035 = vmatpush2.bf16.msra.mxu1 %v4817_v11  ;;  %v1362_v11 = vld [vmem:[#allocation8 + $0x5d8] sm:$0xff] }
 0x20a   :  { %3088 = vmatpush2.bf16.msra.mxu0 %v4691_v13  ;;  %3036 = vmatprep.subr.bf16.mxu1 %v4810_v14  ;;  %v1366_v13 = vld [vmem:[#allocation8 + $0x5f8] sm:$0xff]  ;;  %v4761_v14 = vcombine.low %v1369_v3, %v1373_v4  ;;  %v5241_v4 = vld [vmem:[#allocation11 + $0x4] ss:$8 sps:$4 sm:$0xff]  }
 0x20b   :  { %3089 = vmatprep.subr.bf16.mxu0 %v4684_v20  ;;  %v4635_v20 = vcombine.low %v1242_v5, %v1246_v6  ;;  %v4756_v21 = vcombine.high %v1362_v11, %v1366_v13  ;;  %v1430_v3 = vld [vmem:[#allocation8 + $0x7f8] sm:$0xff]  ;;  %v4699_v5 = vcombine.low %v1306_v60, %v1310_v61 }
 0x20d   :  { %3037 = vmatpush2.bf16.msra.mxu1 %v4809_v31  ;;  %v4755_v31 = vcombine.low %v1362_v11, %v1366_v13 }
 0x20e   :  { %3090 = vmatpush2.bf16.msra.mxu0 %v4683_v33  ;;  %3038 = vmatprep.subr.bf16.mxu1 %v4802_v34  ;;  %v4748_v33 = vcombine.high %v1354_v28, %v1358_v29  ;;  %v5218_v34 = vld [vmem:[#allocation11 + $0x70] ss:$8 sps:$4 sm:$0xff]  }
 0x20f   :  { %3091 = vmatprep.subr.bf16.mxu0 %v4676_v36  ;;  %v1346_v36 = vld [vmem:[#allocation8 + $0x558] sm:$0xff] }
 0x210   :  { %v4740_v30 = vcombine.high %v1346_v36, %v1350_v39  ;;  %v4739_v26 = vcombine.low %v1346_v36, %v1350_v39  ;;  %v5250_v36 = vld [vmem:[#allocation11 + $0xd4] ss:$8 sps:$4 sm:$0xff]  }
 0x211   :  { %3039 = vmatpush2.bf16.msra.mxu1 %v4801_v27  ;;  %v5221_v27 = vld [vmem:[#allocation11 + $0x60] ss:$8 sps:$4 sm:$0xff]  }
 0x212   :  { %3092 = vmatpush2.bf16.msra.mxu0 %v4675_v46  ;;  %3040 = vmatprep.subr.bf16.mxu1 %v4794_v49  ;;  %v1338_v46 = vld [vmem:[#allocation8 + $0x518] sm:$0xff] }
 0x213   :  { %3093 = vmatprep.subr.bf16.mxu0 %v4668_v51  ;;  %v1342_v49 = vld [vmem:[#allocation8 + $0x538] sm:$0xff] }
 0x214   :  { %v5226_v51 = vld [vmem:[#allocation11 + $0x54] ss:$8 sps:$4 sm:$0xff]   ;;  %v4732_v54 = vcombine.high %v1338_v46, %v1342_v49 }
 0x215   :  { %3041 = vmatpush2.bf16.msra.mxu1 %v4793_v12  ;;  %v4731_v12 = vcombine.low %v1338_v46, %v1342_v49  ;;  %v5253_v46 = vld [vmem:[#allocation11 + $0xc4] ss:$8 sps:$4 sm:$0xff]  }
 0x216   :  { %3094 = vmatpush2.bf16.msra.mxu0 %v4667_v50  ;;  %3042 = vmatprep.subr.bf16.mxu1 %v4786_v44  ;;  %v5227_v44 = vld [vmem:[#allocation11 + $0x40] ss:$8 sps:$4 sm:$0xff]  }
 0x217   :  { %3095 = vmatprep.subr.bf16.mxu0 %v4660_v32  ;;  %v1322_v32 = vld [vmem:[#allocation8 + $0x498] sm:$0xff] }
 0x218   :  { %v4716_v37 = vcombine.high %v1322_v32, %v1326_v53 }
 0x219   :  { %3043 = vmatpush2.bf16.msra.mxu1 %v4785_v38  ;;  %v5230_v38 = vld [vmem:[#allocation11 + $0x30] ss:$8 sps:$4 sm:$0xff]  }
 0x21a   :  { %3096 = vmatpush2.bf16.msra.mxu0 %v4659_v40  ;;  %3044 = vmatprep.subr.bf16.mxu1 %v4778_v57  ;;  %v1314_v40 = vld [vmem:[#allocation8 + $0x458] sm:$0xff]  ;;  %v4715_v57 = vcombine.low %v1322_v32, %v1326_v53  ;;  %v5259_v53 = vld [vmem:[#allocation11 + $0xa4] ss:$8 sps:$4 sm:$0xff]  }
 0x21b   :  { %3097 = vmatprep.subr.bf16.mxu0 %v4652_v58  ;;  %v1382_v32 = vld [vmem:[#allocation8 + $0x678] sm:$0xff] }
 0x21d   :  { %3045 = vmatpush2.bf16.msra.mxu1 %v4777_v63 }
 0x21e   :  { %3098 = vmatpush2.bf16.msra.mxu0 %v4651_v0  ;;  %3046 = vmatprep.subr.bf16.mxu1 %v4770_v1  ;;  %v4700_v0 = vcombine.high %v1306_v60, %v1310_v61  ;;  %v5236_v1 = vld [vmem:[#allocation11 + $0x10] ss:$8 sps:$4 sm:$0xff]   ;;  %v5265_v61 = vld [vmem:[#allocation11 + $0x84] ss:$8 sps:$4 sm:$0xff]  }
 0x21f   :  { %3099 = vmatprep.subr.bf16.mxu0 %v4644_v2  ;;  %v1426_v2 = vld [vmem:[#allocation8 + $0x7d8] sm:$0xff] }
 0x220   :  { %v4820_v6 = vcombine.high %v1426_v2, %v1430_v3  ;;  %v4819_v11 = vcombine.low %v1426_v2, %v1430_v3  ;;  %v5260_v60 = vld [vmem:[#allocation11 + $0x90] ss:$8 sps:$4 sm:$0xff]   ;;  %v5316_v3 = vld [vmem:[#allocation11 + $0x274] ss:$8 sps:$4 sm:$0xff]  }
 0x221   :  { %3047 = vmatpush2.bf16.msra.mxu1 %v4769_v7  ;;  %v5239_v7 = vld [vmem:[#allocation11] ss:$8 sps:$4 sm:$0xff]   ;;  %v5813_v2 = vld [vmem:[#allocation10] sm:$0xff] }
 0x222   :  { %3100 = vmatpush2.bf16.msra.mxu0 %v4643_v8  ;;  %3048 = vmatprep.subr.bf16.mxu1 %v4762_v9  ;;  %v1418_v8 = vld [vmem:[#allocation8 + $0x798] sm:$0xff] }
 0x223   :  { %3101 = vmatprep.subr.bf16.mxu0 %v4636_v10  ;;  %v1422_v9 = vld [vmem:[#allocation8 + $0x7b8] sm:$0xff] }
 0x224   :  { %v5244_v10 = vld [vmem:[#allocation11 + $0xf4] ss:$8 sps:$4 sm:$0xff]   ;;  %v4812_v13 = vcombine.high %v1418_v8, %v1422_v9  ;;  %v4811_v28 = vcombine.low %v1418_v8, %v1422_v9  ;;  %v5271_v9 = vld [vmem:[#allocation11 + $0x164] ss:$8 sps:$4 sm:$0xff]  }
 0x225   :  { %3049 = vmatpush2.bf16.msra.mxu1 %v4761_v14  ;;  %v5242_v14 = vld [vmem:[#allocation11 + $0xf0] ss:$8 sps:$4 sm:$0xff]  }
 0x226   :  { %3102 = vmatpush2.bf16.msra.mxu0 %v4635_v20  ;;  %3124 = vmatprep.subr.bf16.mxu1 %v4756_v21  ;;  %v1410_v20 = vld [vmem:[#allocation8 + $0x758] sm:$0xff] }
 0x227   :  { %4005 = vmatprep.subr.bf16.mxu0 %v5220_v25  ;;  %v1414_v21 = vld [vmem:[#allocation8 + $0x778] sm:$0xff]  ;;  %v5247_v25 = vld [vmem:[#allocation11 + $0xe4] ss:$8 sps:$4 sm:$0xff]  }
 0x228   :  { %3051 = vmatmul.mubr.bf16.vlgmr.msra.gmra.mxu1 %v5779_v23  ;;  %v4804_v29 = vcombine.high %v1410_v20, %v1414_v21  ;;  %v4803_v39 = vcombine.low %v1410_v20, %v1414_v21  ;;  %v5269_v20 = vld [vmem:[#allocation11 + $0x160] ss:$8 sps:$4 sm:$0xff]  }
 0x229   :  { %3104 = vmatmul.mubr.bf16.vlgmr.msra.gmra.mxu0 %v5750_v15  ;;  %3060 = vmatprep.mubr.bf16.mxu1 %v5791_v55  ;;  %v5224_v15 = vld [vmem:[#allocation11 + $0x50] ss:$8 sps:$4 sm:$0xff]  }
 0x22a   :  { %3113 = vmatprep.mubr.bf16.mxu0 %v5759_v17  ;;  %3125 = vmatpush1.bf16.msra.mxu1 %v4755_v31  ;;  %v1334_v17 = vld [vmem:[#allocation8 + $0x4f8] sm:$0xff]  ;;  %v5245_v31 = vld [vmem:[#allocation11 + $0xe0] ss:$8 sps:$4 sm:$0xff]  }
 0x22b   :  { %3126 = vmatprep.subr.bf16.mxu1 %v4748_v33  ;;  %4006 = vmatpush1.bf16.msra.mxu0 %v5218_v34  ;;  %v4724_v50 = vcombine.high %v1330_v47, %v1334_v17  ;;  %v4723_v56 = vcombine.low %v1330_v47, %v1334_v17  ;;  %v1402_v33 = vld [vmem:[#allocation8 + $0x718] sm:$0xff] }
 0x22c   :  { %4007 = vmatprep.subr.bf16.mxu0 %v5223_v24  ;;  %v1406_v34 = vld [vmem:[#allocation8 + $0x738] sm:$0xff] }
 0x22d   :  { %v4796_v24 = vcombine.high %v1402_v33, %v1406_v34  ;;  %v4795_v49 = vcombine.low %v1402_v33, %v1406_v34  ;;  %v5256_v47 = vld [vmem:[#allocation11 + $0xb4] ss:$8 sps:$4 sm:$0xff]  }
 0x22e   :  { %3127 = vmatpush1.bf16.msra.mxu1 %v4747_v45  ;;  %v5248_v45 = vld [vmem:[#allocation11 + $0xd0] ss:$8 sps:$4 sm:$0xff]  }
 0x22f   :  { %3128 = vmatprep.subr.bf16.mxu1 %v4740_v30  ;;  %4008 = vmatpush1.bf16.msra.mxu0 %v5221_v27  ;;  %v1394_v30 = vld [vmem:[#allocation8 + $0x6d8] sm:$0xff] }
 0x230   :  { %3061 = vmatmul.mubr.bf16.gmra.mxu1 %v5789_v52  ;;  %4009 = vmatprep.subr.bf16.mxu0 %v5226_v51  ;;  %v1398_v27 = vld [vmem:[#allocation8 + $0x6f8] sm:$0xff] }
 0x231   :  { %3114 = vmatmul.mubr.bf16.gmra.mxu0 %v5757_v41  ;;  %3156 = vmatprep.mubr.bf16.mxu1 %v5777_v18  ;;  %v1318_v41 = vld [vmem:[#allocation8 + $0x478] sm:$0xff]  ;;  %v5235_v18 = vld [vmem:[#allocation11 + $0x24] ss:$8 sps:$4 sm:$0xff]   ;;  %v4788_v51 = vcombine.high %v1394_v30, %v1398_v27  ;;  %v4787_v17 = vcombine.low %v1394_v30, %v1398_v27 }
 0x232   :  { %3129 = vmatpush1.bf16.msra.mxu1 %v4739_v26  ;;  %v4708_v58 = vcombine.high %v1314_v40, %v1318_v41  ;;  %v4707_v63 = vcombine.low %v1314_v40, %v1318_v41  ;;  %v5251_v26 = vld [vmem:[#allocation11 + $0xc0] ss:$8 sps:$4 sm:$0xff]   ;;  %v1370_v40 = vld [vmem:[#allocation8 + $0x618] sm:$0xff]  ;;  %v5277_v27 = vld [vmem:[#allocation11 + $0x144] ss:$8 sps:$4 sm:$0xff]  }
 0x233   :  { %3130 = vmatprep.subr.bf16.mxu1 %v4732_v54  ;;  %4010 = vmatpush1.bf16.msra.mxu0 %v5224_v15  ;;  %v1386_v54 = vld [vmem:[#allocation8 + $0x698] sm:$0xff] }
 0x234   :  { %4011 = vmatprep.subr.bf16.mxu0 %v5229_v48  ;;  %v1390_v15 = vld [vmem:[#allocation8 + $0x6b8] sm:$0xff]  ;;  %v2787_v48 = vpop.f32.mrf.mxu0 }
 0x235   :  { %v1374_v41 = vld [vmem:[#allocation8 + $0x638] sm:$0xff] }
 0x236   :  { %3131 = vmatpush1.bf16.msra.mxu1 %v4731_v12  ;;  %v4780_v12 = vcombine.high %v1386_v54, %v1390_v15 }
 0x237   :  { %3132 = vmatprep.subr.bf16.mxu1 %v4724_v50  ;;  %4012 = vmatpush1.bf16.msra.mxu0 %v5227_v44  ;;  %v5254_v50 = vld [vmem:[#allocation11 + $0xb0] ss:$8 sps:$4 sm:$0xff]  }
 0x238   :  { %4013 = vmatprep.subr.bf16.mxu0 %v5232_v35  ;;  %v1378_v44 = vld [vmem:[#allocation8 + $0x658] sm:$0xff]  ;;  %v4779_v35 = vcombine.low %v1386_v54, %v1390_v15 }
 0x23a   :  { %3133 = vmatpush1.bf16.msra.mxu1 %v4723_v56  ;;  %v2789_v56 = vpop.f32.mrf.mxu0 }
 0x23b   :  { %3134 = vmatprep.subr.bf16.mxu1 %v4716_v37  ;;  %4014 = vmatpush1.bf16.msra.mxu0 %v5230_v38  ;;  %v4772_v37 = vcombine.high %v1378_v44, %v1382_v32  ;;  %v5257_v38 = vld [vmem:[#allocation11 + $0xa0] ss:$8 sps:$4 sm:$0xff]  }
 0x23c   :  { %4015 = vmatprep.subr.bf16.mxu0 %v5235_v18  ;;  %v5262_v18 = vld [vmem:[#allocation11 + $0x94] ss:$8 sps:$4 sm:$0xff]  }
 0x23e   :  { %3135 = vmatpush1.bf16.msra.mxu1 %v4715_v57  ;;  %v4771_v57 = vcombine.low %v1378_v44, %v1382_v32  ;;  %v5280_v32 = vld [vmem:[#allocation11 + $0x134] ss:$8 sps:$4 sm:$0xff]  }
 0x23f   :  { %3136 = vmatprep.subr.bf16.mxu1 %v4708_v58  ;;  %4016 = vmatpush1.bf16.msra.mxu0 %v5233_v59  ;;  %v2791_v58 = vpop.f32.mrf.mxu0  ;;  %v4764_v59 = vcombine.high %v1370_v40, %v1374_v41 }
 0x240   :  { %4017 = vmatprep.subr.bf16.mxu0 %v5238_v62  ;;  %v4763_v62 = vcombine.low %v1370_v40, %v1374_v41  ;;  %v5278_v41 = vld [vmem:[#allocation11 + $0x130] ss:$8 sps:$4 sm:$0xff]  }
 0x242   :  { %3137 = vmatpush1.bf16.msra.mxu1 %v4707_v63  ;;  %v2793_v63 = vpop.f32.mrf.mxu0 }
 0x243   :  { %3138 = vmatprep.subr.bf16.mxu1 %v4700_v0  ;;  %4018 = vmatpush1.bf16.msra.mxu0 %v5236_v1  ;;  %v5263_v0 = vld [vmem:[#allocation11 + $0x80] ss:$8 sps:$4 sm:$0xff]   ;;  %v5268_v1 = vld [vmem:[#allocation11 + $0x174] ss:$8 sps:$4 sm:$0xff]  }
 0x244   :  { %4019 = vmatprep.subr.bf16.mxu0 %v5241_v4  ;;  %v2797_v4 = vpop.f32.mrf.mxu0 }
 0x246   :  { %3139 = vmatpush1.bf16.msra.mxu1 %v4699_v5  ;;  %v1440_v5 = vrot.slane %v5813_v2, %v5737_v43 }
 0x247   :  { %3140 = vmatprep.subr.bf16.mxu1 %v4820_v6  ;;  %4020 = vmatpush1.bf16.msra.mxu0 %v5239_v7  ;;  %v5266_v6 = vld [vmem:[#allocation11 + $0x170] ss:$8 sps:$4 sm:$0xff]   ;;  %v1436_v7 = vrot.slane %v5813_v2, %v5742_v16 }
 0x248   :  { %4021 = vmatprep.subr.bf16.mxu0 %v5244_v10  ;;  %v2799_v10 = vpop.f32.mrf.mxu0 }
 0x249   :  { %v2788_v21 = vadd.f32 %v2787_v48, %v1436_v7  ;;  %v2800_v54 = vadd.f32 %v2799_v10, %v1440_v5  ;;  %v5314_v48 = vld [vmem:[#allocation11 + $0x270] ss:$8 sps:$4 sm:$0xff]   ;;  %v5287_v10 = vld [vmem:[#allocation11 + $0x100] ss:$8 sps:$4 sm:$0xff]  }
 0x24a   :  { %3141 = vmatpush2.bf16.msra.mxu1 %v4819_v11  ;;  %v2801_v34 = vpop.f32.mrf.mxu0 }
 0x24b   :  { %3142 = vmatprep.subr.bf16.mxu1 %v4812_v13  ;;  %4022 = vmatpush2.bf16.msra.mxu0 %v5242_v14  ;;  %v2790_v13 = vadd.f32 %v2789_v56, %v1440_v5  ;;  %v2792_v14 = vadd.f32 %v2791_v58, %v1436_v7  ;;  %v2802_v15 = vadd.f32 %v2801_v34, %v1436_v7  ;;  %v5283_v58 = vld [vmem:[#allocation11 + $0x124] ss:$8 sps:$4 sm:$0xff]  }
 0x24c   :  { %4023 = vmatprep.subr.bf16.mxu0 %v5247_v25  ;;  %v5337_v34 = vld [vmem:[#allocation11 + $0x204] ss:$8 sps:$4 sm:$0xff]  }
 0x24e   :  { %3143 = vmatpush2.bf16.msra.mxu1 %v4811_v28  ;;  %v5274_v28 = vld [vmem:[#allocation11 + $0x154] ss:$8 sps:$4 sm:$0xff]  }
 0x24f   :  { %3144 = vmatprep.subr.bf16.mxu1 %v4804_v29  ;;  %4024 = vmatpush2.bf16.msra.mxu0 %v5245_v31  ;;  %v2794_v29 = vadd.f32 %v2793_v63, %v1440_v5 }
 0x250   :  { %4025 = vmatprep.subr.bf16.mxu0 %v5250_v36 }
 0x252   :  { %3145 = vmatpush2.bf16.msra.mxu1 %v4803_v39 }
 0x253   :  { %3146 = vmatprep.subr.bf16.mxu1 %v4796_v24  ;;  %4026 = vmatpush2.bf16.msra.mxu0 %v5248_v45 }
 0x254   :  { %4027 = vmatprep.subr.bf16.mxu0 %v5253_v46 }
 0x256   :  { %3147 = vmatpush2.bf16.msra.mxu1 %v4795_v49  ;;  %v2803_v49 = vpop.f32.mrf.mxu0 }
 0x257   :  { %3148 = vmatprep.subr.bf16.mxu1 %v4788_v51  ;;  %4028 = vmatpush2.bf16.msra.mxu0 %v5251_v26 }
 0x258   :  { %4029 = vmatprep.subr.bf16.mxu0 %v5256_v47 }
 0x25a   :  { %3149 = vmatpush2.bf16.msra.mxu1 %v4787_v17  ;;  %v5275_v17 = vld [vmem:[#allocation11 + $0x140] ss:$8 sps:$4 sm:$0xff]  }
 0x25b   :  { %3150 = vmatprep.subr.bf16.mxu1 %v4780_v12  ;;  %4030 = vmatpush2.bf16.msra.mxu0 %v5254_v50  ;;  %v2798_v12 = vadd.f32 %v2797_v4, %v1436_v7  ;;  %v5286_v4 = vld [vmem:[#allocation11 + $0x114] ss:$8 sps:$4 sm:$0xff]   ;;  %v5323_v7 = vld [vmem:[#allocation11 + $0x240] ss:$8 sps:$4 sm:$0xff]  }
 0x25c   :  { %4031 = vmatprep.subr.bf16.mxu0 %v5259_v53  ;;  %v5319_v53 = vld [vmem:[#allocation11 + $0x264] ss:$8 sps:$4 sm:$0xff]  }
 0x25e   :  { %3151 = vmatpush2.bf16.msra.mxu1 %v4779_v35  ;;  %v2804_v35 = vadd.f32 %v2803_v49, %v1440_v5  ;;  %v5325_v5 = vld [vmem:[#allocation11 + $0x244] ss:$8 sps:$4 sm:$0xff]   ;;  %v5302_v49 = vld [vmem:[#allocation11 + $0x1b0] ss:$8 sps:$4 sm:$0xff]  }
 0x25f   :  { %3152 = vmatprep.subr.bf16.mxu1 %v4772_v37  ;;  %4032 = vmatpush2.bf16.msra.mxu0 %v5257_v38 }
 0x260   :  { %4033 = vmatprep.subr.bf16.mxu0 %v5262_v18  ;;  %v5317_v18 = vld [vmem:[#allocation11 + $0x260] ss:$8 sps:$4 sm:$0xff]  }
 0x262   :  { %3153 = vmatpush2.bf16.msra.mxu1 %v4771_v57 }
 0x263   :  { %3154 = vmatprep.subr.bf16.mxu1 %v4764_v59  ;;  %4034 = vmatpush2.bf16.msra.mxu0 %v5260_v60  ;;  %v5322_v59 = vld [vmem:[#allocation11 + $0x254] ss:$8 sps:$4 sm:$0xff]  }
 0x264   :  { %4035 = vmatprep.subr.bf16.mxu0 %v5265_v61 }
 0x266   :  { %3155 = vmatpush2.bf16.msra.mxu1 %v4763_v62 }
 0x267   :  { %v2840_v8 = vpop.f32.mrf.mxu1  ;;  %4036 = vmatpush2.bf16.msra.mxu0 %v5263_v0  ;;  %4058 = vmatprep.subr.bf16.mxu1 %v5268_v1  ;;  %v5281_v0 = vld [vmem:[#allocation11 + $0x120] ss:$8 sps:$4 sm:$0xff]   ;;  %v5320_v1 = vld [vmem:[#allocation11 + $0x250] ss:$8 sps:$4 sm:$0xff]  }
 0x268   :  { %4111 = vmatprep.subr.bf16.mxu0 %v5316_v3  ;;  %v2841_v36 = vadd.f32 %v2840_v8, %v2788_v21  ;;  %v5289_v8 = vld [vmem:[#allocation11 + $0x104] ss:$8 sps:$4 sm:$0xff]   ;;  %v5329_v21 = vld [vmem:[#allocation11 + $0x220] ss:$8 sps:$4 sm:$0xff]  }
 0x269   :  { %3157 = vmatmul.mubr.bf16.vlgmr.msra.gmra.mxu1 %v5779_v23  ;;  %v2842_v11 = vpop.f32.mrf.mxu1  ;;  %v5272_v23 = vld [vmem:[#allocation11 + $0x150] ss:$8 sps:$4 sm:$0xff]  }
 0x26a   :  { %3166 = vmatprep.mubr.bf16.mxu1 %v5791_v55  ;;  %4059 = vmatpush1.bf16.msra.mxu1 %v5266_v6  ;;  %v2843_v31 = vadd.f32 %v2842_v11, %v2790_v13  ;;  %v3177_v51 = vmax.f32 %v2841_v36, 0.0  ;;  %v5284_v6 = vld [vmem:[#allocation11 + $0x110] ss:$8 sps:$4 sm:$0xff]   ;;  %v5292_v13 = vld [vmem:[#allocation11 + $0x1f4] ss:$8 sps:$4 sm:$0xff]  }
 0x26b   :  { %v2844_v25 = vpop.f32.mrf.mxu1  ;;  %4060 = vmatprep.subr.bf16.mxu1 %v5271_v9  ;;  %v5328_v9 = vld [vmem:[#allocation11 + $0x234] ss:$8 sps:$4 sm:$0xff]   ;;  %v5326_v11 = vld [vmem:[#allocation11 + $0x230] ss:$8 sps:$4 sm:$0xff]  }
 0x26c   :  { %v2845_v33 = vadd.f32 %v2844_v25, %v2792_v14  ;;  %v3178_v55 = vmax.f32 %v2843_v31, 0.0  ;;  %v5331_v14 = vld [vmem:[#allocation11 + $0x224] ss:$8 sps:$4 sm:$0xff]   ;;  %v5332_v31 = vld [vmem:[#allocation11 + $0x210] ss:$8 sps:$4 sm:$0xff]  }
 0x26d   :  { %v2846_v39 = vpop.f32.mrf.mxu1  ;;  %v5295_v25 = vld [vmem:[#allocation11 + $0x1e4] ss:$8 sps:$4 sm:$0xff]   ;;  %v5296_v36 = vld [vmem:[#allocation11 + $0x1d0] ss:$8 sps:$4 sm:$0xff]  }
 0x26e   :  { %v2847_v24 = vadd.f32 %v2846_v39, %v2794_v29  ;;  %4061 = vmatpush1.bf16.msra.mxu1 %v5269_v20  ;;  %v3185_v45 = vmax.f32 %v2845_v33, 0.0  ;;  %v5290_v20 = vld [vmem:[#allocation11 + $0x1f0] ss:$8 sps:$4 sm:$0xff]   ;;  %v5293_v29 = vld [vmem:[#allocation11 + $0x1e0] ss:$8 sps:$4 sm:$0xff]  }
 0x26f   :  { %v2850_v30 = vpop.f32.mrf.mxu1  ;;  %4062 = vmatprep.subr.bf16.mxu1 %v5274_v28  ;;  %v5334_v28 = vld [vmem:[#allocation11 + $0x214] ss:$8 sps:$4 sm:$0xff]   ;;  %v5335_v39 = vld [vmem:[#allocation11 + $0x200] ss:$8 sps:$4 sm:$0xff]  }
 0x270   :  { %v3186_v46 = vmax.f32 %v2847_v24, 0.0  ;;  %v3209_v50 = vpack.c.bf16 %v3185_v45, %v3177_v51  ;;  %v2851_v38 = vadd.f32 %v2850_v30, %v2798_v12  ;;  %v5298_v33 = vld [vmem:[#allocation11 + $0x1d4] ss:$8 sps:$4 sm:$0xff]   ;;  %v5301_v24 = vld [vmem:[#allocation11 + $0x1c4] ss:$8 sps:$4 sm:$0xff]  }
 0x271   :  { %3167 = vmatmul.mubr.bf16.gmra.mxu1 %v5789_v52  ;;  %v2852_v26 = vpop.f32.mrf.mxu1  ;;  %v5299_v45 = vld [vmem:[#allocation11 + $0x1c0] ss:$8 sps:$4 sm:$0xff]   ;;  %v5338_v30 = vld [vmem:[#allocation11 + $0x2f0] ss:$8 sps:$4 sm:$0xff]   ;;  %v5349_v12 = vld [vmem:[#allocation11 + $0x2c4] ss:$8 sps:$4 sm:$0xff]  }
 0x272   :  { %v3210_v47 = vpack.c.bf16 %v3186_v46, %v3178_v55  ;;  %4063 = vmatpush1.bf16.msra.mxu1 %v5272_v23  ;;  %v2853_v56 = vadd.f32 %v2852_v26, %v2800_v54  ;;  %v3193_v62 = vmax.f32 %v2851_v38, 0.0  ;;  %v5340_v23 = vld [vmem:[#allocation11 + $0x2f4] ss:$8 sps:$4 sm:$0xff]   ;;  %v5343_v55 = vld [vmem:[#allocation11 + $0x2e4] ss:$8 sps:$4 sm:$0xff]   ;;  %v2893_v46 = vpop.f32.mrf.mxu0 }
 0x273   :  { %v2854_v44 = vpop.f32.mrf.mxu1  ;;  %4064 = vmatprep.subr.bf16.mxu1 %v5277_v27  ;;  %v5304_v27 = vld [vmem:[#allocation11 + $0x1b4] ss:$8 sps:$4 sm:$0xff]   ;;  %v5341_v51 = vld [vmem:[#allocation11 + $0x2e0] ss:$8 sps:$4 sm:$0xff]   ;;  %v5307_v26 = vld [vmem:[#allocation11 + $0x1a4] ss:$8 sps:$4 sm:$0xff]  }
 0x274   :  { %v2855_v37 = vadd.f32 %v2854_v44, %v2802_v15  ;;  %4037 = vmatprep.mubr.bf16.mxu0 %v3210_v47  ;;  %v3194_v60 = vmax.f32 %v2853_v56, 0.0  ;;  %v5346_v54 = vld [vmem:[#allocation11 + $0x2d4] ss:$8 sps:$4 sm:$0xff]   ;;  %v2895_v15 = vpop.f32.mrf.mxu0  ;;  %v5305_v47 = vld [vmem:[#allocation11 + $0x1a0] ss:$8 sps:$4 sm:$0xff]  }
 0x275   :  { %v2856_v40 = vpop.f32.mrf.mxu1  ;;  %4038 = vmatmul.mubr.bf16.vlgmr.msra.gmra.mxu0 %v3209_v50  ;;  %v5308_v44 = vld [vmem:[#allocation11 + $0x190] ss:$8 sps:$4 sm:$0xff]  }
 0x276   :  { %v2857_v52 = vadd.f32 %v2856_v40, %v2804_v35  ;;  %4065 = vmatpush1.bf16.msra.mxu1 %v5275_v17  ;;  %4112 = vmatpush1.bf16.msra.mxu0 %v5314_v48  ;;  %v3201_v57 = vmax.f32 %v2855_v37, 0.0  ;;  %v5344_v17 = vld [vmem:[#allocation11 + $0x2d0] ss:$8 sps:$4 sm:$0xff]   ;;  %v5310_v48 = vld [vmem:[#allocation11 + $0x194] ss:$8 sps:$4 sm:$0xff]   ;;  %v2897_v50 = vpop.f32.mrf.mxu0 }
 0x277   :  { %4066 = vmatprep.subr.bf16.mxu1 %v5280_v32  ;;  %4113 = vmatprep.subr.bf16.mxu0 %v5319_v53  ;;  %v5347_v32 = vld [vmem:[#allocation11 + $0x2c0] ss:$8 sps:$4 sm:$0xff]   ;;  %v5313_v53 = vld [vmem:[#allocation11 + $0x184] ss:$8 sps:$4 sm:$0xff]   ;;  %v5352_v35 = vld [vmem:[#allocation11 + $0x2b4] ss:$8 sps:$4 sm:$0xff]  }
 0x278   :  { %v3202_v61 = vmax.f32 %v2857_v52, 0.0  ;;  %v3217_v3 = vpack.c.bf16 %v3201_v57, %v3193_v62  ;;  %v2899_v56 = vpop.f32.mrf.mxu0  ;;  %v5311_v37 = vld [vmem:[#allocation11 + $0x180] ss:$8 sps:$4 sm:$0xff]   ;;  %v5350_v38 = vld [vmem:[#allocation11 + $0x2b0] ss:$8 sps:$4 sm:$0xff]  }
 0x279   :  { %v5355_v40 = vld [vmem:[#allocation11 + $0x2a4] ss:$8 sps:$4 sm:$0xff]   ;;  %v5364_v52 = vld [vmem:[#allocation11 + $0x374] ss:$8 sps:$4 sm:$0xff]   ;;  %v5353_v57 = vld [vmem:[#allocation11 + $0x2a0] ss:$8 sps:$4 sm:$0xff]  }
 0x27a   :  { %v3218_v63 = vpack.c.bf16 %v3202_v61, %v3194_v60  ;;  %4067 = vmatpush1.bf16.msra.mxu1 %v5278_v41  ;;  %4114 = vmatpush1.bf16.msra.mxu0 %v5317_v18  ;;  %v2903_v41 = vpop.f32.mrf.mxu0  ;;  %v1448_v18 = vrot.slane %v5813_v2, %v293_v19  ;;  %v5358_v60 = vld [vmem:[#allocation11 + $0x294] ss:$8 sps:$4 sm:$0xff]   ;;  %v5361_v19 = vld [vmem:[#allocation11 + $0x284] ss:$8 sps:$4 sm:$0xff]  }
 0x27b   :  { %4068 = vmatprep.subr.bf16.mxu1 %v5283_v58  ;;  %4115 = vmatprep.subr.bf16.mxu0 %v5322_v59  ;;  %v1444_v58 = vrot.slane %v5813_v2, %v289_v22 }
 0x27c   :  { %4047 = vmatprep.mubr.bf16.mxu0 %v3218_v63  ;;  %v2905_v61 = vpop.f32.mrf.mxu0  ;;  %v2896_v63 = vadd.f32 %v2895_v15, %v1448_v18  ;;  %v5370_v15 = vld [vmem:[#allocation11 + $0x354] ss:$8 sps:$4 sm:$0xff]  }
 0x27d   :  { %4048 = vmatmul.mubr.bf16.gmra.mxu0 %v3217_v3  ;;  %v2894_v3 = vadd.f32 %v2893_v46, %v1444_v58 }
 0x27e   :  { %4069 = vmatpush1.bf16.msra.mxu1 %v5281_v0  ;;  %4116 = vmatpush1.bf16.msra.mxu0 %v5320_v1  ;;  %v2898_v0 = vadd.f32 %v2897_v50, %v1444_v58  ;;  %v5356_v1 = vld [vmem:[#allocation11 + $0x290] ss:$8 sps:$4 sm:$0xff]  }
 0x27f   :  { %4070 = vmatprep.subr.bf16.mxu1 %v5286_v4  ;;  %4117 = vmatprep.subr.bf16.mxu0 %v5325_v5  ;;  %v2900_v5 = vadd.f32 %v2899_v56, %v1448_v18  ;;  %v5368_v50 = vld [vmem:[#allocation11 + $0x350] ss:$8 sps:$4 sm:$0xff]  }
 0x280   :  { %v5374_v56 = vld [vmem:[#allocation11 + $0x330] ss:$8 sps:$4 sm:$0xff]  }
 0x282   :  { %4071 = vmatpush1.bf16.msra.mxu1 %v5284_v6  ;;  %4118 = vmatpush1.bf16.msra.mxu0 %v5323_v7 }
 0x283   :  { %4072 = vmatprep.subr.bf16.mxu1 %v5289_v8  ;;  %4119 = vmatprep.subr.bf16.mxu0 %v5328_v9  ;;  %v2907_v8 = vpop.f32.mrf.mxu0 }
 0x286   :  { %4073 = vmatpush1.bf16.msra.mxu1 %v5287_v10  ;;  %4120 = vmatpush1.bf16.msra.mxu0 %v5326_v11  ;;  %v5359_v11 = vld [vmem:[#allocation11 + $0x280] ss:$8 sps:$4 sm:$0xff]  }
 0x287   :  { %4074 = vmatprep.subr.bf16.mxu1 %v5292_v13  ;;  %4121 = vmatprep.subr.bf16.mxu0 %v5331_v14 }
 0x28a   :  { %4075 = vmatpush2.bf16.msra.mxu1 %v5290_v20  ;;  %4122 = vmatpush1.bf16.msra.mxu0 %v5329_v21 }
 0x28b   :  { %4076 = vmatprep.subr.bf16.mxu1 %v5295_v25  ;;  %4123 = vmatprep.subr.bf16.mxu0 %v5334_v28  ;;  %v2909_v25 = vpop.f32.mrf.mxu0 }
 0x28e   :  { %4077 = vmatpush2.bf16.msra.mxu1 %v5293_v29  ;;  %4124 = vmatpush1.bf16.msra.mxu0 %v5332_v31  ;;  %v2906_v31 = vadd.f32 %v2905_v61, %v1448_v18  ;;  %v5389_v61 = vld [vmem:[#allocation11 + $0x3e0] ss:$8 sps:$4 sm:$0xff]  }
 0x28f   :  { %4078 = vmatprep.subr.bf16.mxu1 %v5298_v33  ;;  %4125 = vmatprep.subr.bf16.mxu0 %v5337_v34  ;;  %v2908_v33 = vadd.f32 %v2907_v8, %v1444_v58  ;;  %v5403_v8 = vld [vmem:[#allocation11 + $0x3a4] ss:$8 sps:$4 sm:$0xff]  }
 0x292   :  { %4079 = vmatpush2.bf16.msra.mxu1 %v5296_v36  ;;  %4126 = vmatpush1.bf16.msra.mxu0 %v5335_v39  ;;  %v5362_v36 = vld [vmem:[#allocation11 + $0x370] ss:$8 sps:$4 sm:$0xff]   ;;  %v2904_v39 = vadd.f32 %v2903_v41, %v1444_v58  ;;  %v5385_v41 = vld [vmem:[#allocation11 + $0x304] ss:$8 sps:$4 sm:$0xff]  }
 0x293   :  { %4080 = vmatprep.subr.bf16.mxu1 %v5301_v24  ;;  %4127 = vmatprep.subr.bf16.mxu0 %v5340_v23  ;;  %v5386_v58 = vld [vmem:[#allocation11 + $0x3f0] ss:$8 sps:$4 sm:$0xff]  }
 0x296   :  { %4081 = vmatpush2.bf16.msra.mxu1 %v5299_v45  ;;  %4128 = vmatpush2.bf16.msra.mxu0 %v5338_v30  ;;  %v5367_v45 = vld [vmem:[#allocation11 + $0x364] ss:$8 sps:$4 sm:$0xff]   ;;  %v2910_v30 = vadd.f32 %v2909_v25, %v1448_v18  ;;  %v5383_v18 = vld [vmem:[#allocation11 + $0x300] ss:$8 sps:$4 sm:$0xff]  }
 0x297   :  { %4082 = vmatprep.subr.bf16.mxu1 %v5304_v27  ;;  %4129 = vmatprep.subr.bf16.mxu0 %v5343_v55 }
 0x29a   :  { %4083 = vmatpush2.bf16.msra.mxu1 %v5302_v49  ;;  %4130 = vmatpush2.bf16.msra.mxu0 %v5341_v51 }
 0x29b   :  { %4084 = vmatprep.subr.bf16.mxu1 %v5307_v26  ;;  %4131 = vmatprep.subr.bf16.mxu0 %v5346_v54  ;;  %v5365_v26 = vld [vmem:[#allocation11 + $0x360] ss:$8 sps:$4 sm:$0xff]  }
 0x29e   :  { %4085 = vmatpush2.bf16.msra.mxu1 %v5305_v47  ;;  %4132 = vmatpush2.bf16.msra.mxu0 %v5344_v17 }
 0x29f   :  { %4086 = vmatprep.subr.bf16.mxu1 %v5310_v48  ;;  %4133 = vmatprep.subr.bf16.mxu0 %v5349_v12 }
 0x2a2   :  { %4087 = vmatpush2.bf16.msra.mxu1 %v5308_v44  ;;  %4134 = vmatpush2.bf16.msra.mxu0 %v5347_v32  ;;  %v5373_v32 = vld [vmem:[#allocation11 + $0x344] ss:$8 sps:$4 sm:$0xff]  }
 0x2a3   :  { %4088 = vmatprep.subr.bf16.mxu1 %v5313_v53  ;;  %4135 = vmatprep.subr.bf16.mxu0 %v5352_v35  ;;  %v5371_v53 = vld [vmem:[#allocation11 + $0x340] ss:$8 sps:$4 sm:$0xff]   ;;  %v5376_v35 = vld [vmem:[#allocation11 + $0x334] ss:$8 sps:$4 sm:$0xff]  }
 0x2a6   :  { %4089 = vmatpush2.bf16.msra.mxu1 %v5311_v37  ;;  %4136 = vmatpush2.bf16.msra.mxu0 %v5350_v38  ;;  %v5379_v37 = vld [vmem:[#allocation11 + $0x324] ss:$8 sps:$4 sm:$0xff]   ;;  %v5377_v38 = vld [vmem:[#allocation11 + $0x320] ss:$8 sps:$4 sm:$0xff]  }
 0x2a7   :  { %v2946_v59 = vpop.f32.mrf.mxu1  ;;  %4137 = vmatprep.subr.bf16.mxu0 %v5355_v40  ;;  %4164 = vmatprep.subr.bf16.mxu1 %v5364_v52  ;;  %v5382_v40 = vld [vmem:[#allocation11 + $0x314] ss:$8 sps:$4 sm:$0xff]   ;;  %v5380_v52 = vld [vmem:[#allocation11 + $0x310] ss:$8 sps:$4 sm:$0xff]  }
 0x2a8   :  { %v2947_v9 = vadd.f32 %v2946_v59, %v2894_v3  ;;  %v5391_v59 = vld [vmem:[#allocation11 + $0x3e4] ss:$8 sps:$4 sm:$0xff]  }
 0x2a9   :  { %v2948_v62 = vpop.f32.mrf.mxu1 }
 0x2aa   :  { %4138 = vmatpush2.bf16.msra.mxu0 %v5353_v57  ;;  %v2949_v6 = vadd.f32 %v2948_v62, %v2896_v63  ;;  %v3179_v28 = vmax.f32 %v2947_v9, 0.0  ;;  %v5388_v57 = vld [vmem:[#allocation11 + $0x3f4] ss:$8 sps:$4 sm:$0xff]   ;;  %v1451_v9 = vsub.s32 4, %v5734_v42 }
 0x2ab   :  { %v2950_v4 = vpop.f32.mrf.mxu1  ;;  %4139 = vmatprep.subr.bf16.mxu0 %v5358_v60  ;;  %v2999_v60 = vpop.f32.mrf.mxu0  ;;  %v5394_v62 = vld [vmem:[#allocation11 + $0x3d4] ss:$8 sps:$4 sm:$0xff]  }
 0x2ac   :  { %v2951_v7 = vadd.f32 %v2950_v4, %v2898_v0  ;;  %v3180_v20 = vmax.f32 %v2949_v6, 0.0  ;;  %v5392_v0 = vld [vmem:[#allocation11 + $0x3d0] ss:$8 sps:$4 sm:$0xff]   ;;  %v5395_v4 = vld [vmem:[#allocation11 + $0x3c0] ss:$8 sps:$4 sm:$0xff]  }
 0x2ad   :  { %v2952_v22 = vpop.f32.mrf.mxu1  ;;  %v3001_v63 = vpop.f32.mrf.mxu0  ;;  %v5398_v6 = vld [vmem:[#allocation11 + $0x3b0] ss:$8 sps:$4 sm:$0xff]  }
 0x2ae   :  { %v2953_v10 = vadd.f32 %v2952_v22, %v2900_v5  ;;  %4140 = vmatpush2.bf16.msra.mxu0 %v5356_v1  ;;  %v3187_v13 = vmax.f32 %v2951_v7, 0.0  ;;  %v5397_v1 = vld [vmem:[#allocation11 + $0x3c4] ss:$8 sps:$4 sm:$0xff]   ;;  %v1455_v7 = vsub.s32 5, %v5734_v42 }
 0x2af   :  { %v2956_v14 = vpop.f32.mrf.mxu1  ;;  %4141 = vmatprep.subr.bf16.mxu0 %v5361_v19  ;;  %v3003_v3 = vpop.f32.mrf.mxu0  ;;  %v5400_v19 = vld [vmem:[#allocation11 + $0x3b4] ss:$8 sps:$4 sm:$0xff]  }
 0x2b0   :  { %v3188_v21 = vmax.f32 %v2953_v10, 0.0  ;;  %v3211_v24 = vpack.c.bf16 %v3187_v13, %v3179_v28  ;;  %v2957_v46 = vadd.f32 %v2956_v14, %v2904_v39  ;;  %v5401_v10 = vld [vmem:[#allocation11 + $0x3a0] ss:$8 sps:$4 sm:$0xff]   ;;  %v5406_v13 = vld [vmem:[#allocation11 + $0x394] ss:$8 sps:$4 sm:$0xff]   ;;  %v1452_v14 = vrot.slane %v5813_v2, %v1451_v9 }
 0x2b1   :  { %v2958_v29 = vpop.f32.mrf.mxu1  ;;  %v3005_v5 = vpop.f32.mrf.mxu0  ;;  %v5404_v28 = vld [vmem:[#allocation11 + $0x390] ss:$8 sps:$4 sm:$0xff]  }
 0x2b2   :  { %v3212_v34 = vpack.c.bf16 %v3188_v21, %v3180_v20  ;;  %4142 = vmatpush2.bf16.msra.mxu0 %v5359_v11  ;;  %v2959_v27 = vadd.f32 %v2958_v29, %v2906_v31  ;;  %v3195_v48 = vmax.f32 %v2957_v46, 0.0  ;;  %v1456_v11 = vrot.slane %v5813_v2, %v1455_v7 }
 0x2b3   :  { %v2960_v23 = vpop.f32.mrf.mxu1  ;;  %v3009_v22 = vpop.f32.mrf.mxu0  ;;  %v3004_v31 = vadd.f32 %v3003_v3, %v1452_v14  ;;  %v1459_v3 = vsub.s32 6, %v5734_v42 }
 0x2b4   :  { %v2961_v55 = vadd.f32 %v2960_v23, %v2908_v33  ;;  %4090 = vmatprep.mubr.bf16.mxu1 %v3212_v34  ;;  %v3196_v47 = vmax.f32 %v2959_v27, 0.0  ;;  %v3002_v29 = vadd.f32 %v3001_v63, %v1456_v11  ;;  %v5409_v33 = vld [vmem:[#allocation11 + $0x384] ss:$8 sps:$4 sm:$0xff]   ;;  %v3000_v34 = vadd.f32 %v2999_v60, %v1452_v14 }
 0x2b5   :  { %v2962_v49 = vpop.f32.mrf.mxu1  ;;  %4091 = vmatmul.mubr.bf16.vlgmr.msra.gmra.mxu1 %v3211_v24  ;;  %v3011_v21 = vpop.f32.mrf.mxu0  ;;  %v3006_v39 = vadd.f32 %v3005_v5, %v1456_v11  ;;  %v1460_v5 = vrot.slane %v5813_v2, %v1459_v3 }
 0x2b6   :  { %v2963_v51 = vadd.f32 %v2962_v49, %v2910_v30  ;;  %4165 = vmatpush1.bf16.msra.mxu1 %v5362_v36  ;;  %v3203_v54 = vmax.f32 %v2961_v55, 0.0  ;;  %v5407_v55 = vld [vmem:[#allocation11 + $0x380] ss:$8 sps:$4 sm:$0xff]  }
 0x2b7   :  { %4166 = vmatprep.subr.bf16.mxu1 %v5367_v45  ;;  %v3013_v45 = vpop.f32.mrf.mxu0 }
 0x2b8   :  { %v3204_v17 = vmax.f32 %v2963_v51, 0.0  ;;  %v3219_v44 = vpack.c.bf16 %v3203_v54, %v3195_v48  ;;  %v3012_v48 = vadd.f32 %v3011_v21, %v1456_v11 }
 0x2ba   :  { %v3220_v12 = vpack.c.bf16 %v3204_v17, %v3196_v47  ;;  %4167 = vmatpush1.bf16.msra.mxu1 %v5365_v26 }
 0x2bb   :  { %4168 = vmatprep.subr.bf16.mxu1 %v5370_v15  ;;  %v3015_v15 = vpop.f32.mrf.mxu0 }
 0x2bc   :  { %4100 = vmatprep.mubr.bf16.mxu1 %v3220_v12  ;;  %v3014_v12 = vadd.f32 %v3013_v45, %v1452_v14 }
 0x2bd   :  { %4101 = vmatmul.mubr.bf16.gmra.mxu1 %v3219_v44  ;;  %v3010_v44 = vadd.f32 %v3009_v22, %v1452_v14 }
 0x2be   :  { %4169 = vmatpush1.bf16.msra.mxu1 %v5368_v50 }
 0x2bf   :  { %4170 = vmatprep.subr.bf16.mxu1 %v5373_v32 }
 0x2c2   :  { %4171 = vmatpush1.bf16.msra.mxu1 %v5371_v53 }
 0x2c3   :  { %4172 = vmatprep.subr.bf16.mxu1 %v5376_v35  ;;  %v3016_v35 = vadd.f32 %v3015_v15, %v1456_v11 }
 0x2c6   :  { %4173 = vmatpush1.bf16.msra.mxu1 %v5374_v56 }
 0x2c7   :  { %4174 = vmatprep.subr.bf16.mxu1 %v5379_v37 }
 0x2ca   :  { %4175 = vmatpush1.bf16.msra.mxu1 %v5377_v38 }
 0x2cb   :  { %4176 = vmatprep.subr.bf16.mxu1 %v5382_v40 }
 0x2ce   :  { %4177 = vmatpush1.bf16.msra.mxu1 %v5380_v52 }
 0x2cf   :  { %4178 = vmatprep.subr.bf16.mxu1 %v5385_v41 }
 0x2d2   :  { %4179 = vmatpush1.bf16.msra.mxu1 %v5383_v18 }
 0x2d3   :  { %4180 = vmatprep.subr.bf16.mxu1 %v5388_v57 }
 0x2d6   :  { %4181 = vmatpush2.bf16.msra.mxu1 %v5386_v58 }
 0x2d7   :  { %4182 = vmatprep.subr.bf16.mxu1 %v5391_v59 }
 0x2da   :  { %4183 = vmatpush2.bf16.msra.mxu1 %v5389_v61 }
 0x2db   :  { %4184 = vmatprep.subr.bf16.mxu1 %v5394_v62 }
 0x2de   :  { %4185 = vmatpush2.bf16.msra.mxu1 %v5392_v0 }
 0x2df   :  { %4186 = vmatprep.subr.bf16.mxu1 %v5397_v1  ;;  %v1463_v1 = vsub.s32 7, %v5734_v42 }
 0x2e2   :  { %4187 = vmatpush2.bf16.msra.mxu1 %v5395_v4 }
 0x2e3   :  { %4188 = vmatprep.subr.bf16.mxu1 %v5400_v19  ;;  %v1464_v19 = vrot.slane %v5813_v2, %v1463_v1 }
 0x2e6   :  { %4189 = vmatpush2.bf16.msra.mxu1 %v5398_v6 }
 0x2e7   :  { %4190 = vmatprep.subr.bf16.mxu1 %v5403_v8 }
 0x2e8   :  { %v3052_v20 = vpop.f32.mrf.mxu1 }
 0x2e9   :  { %v3053_v30 = vadd.f32 %v3052_v20, %v3000_v34  ;;  %v3105_v61 = vpop.f32.mrf.mxu0 }
 0x2ea   :  { %v3054_v25 = vpop.f32.mrf.mxu1  ;;  %4191 = vmatpush2.bf16.msra.mxu1 %v5401_v10  ;;  %v3106_v10 = vadd.f32 %v3105_v61, %v1460_v5  ;;  %v5424_v61 = vld [vmem:[#allocation13 + $0x40] sm:$0xff]  }
 0x2eb   :  { %4192 = vmatprep.subr.bf16.mxu1 %v5406_v13  ;;  %v3055_v24 = vadd.f32 %v3054_v25, %v3002_v29  ;;  %v3181_v47 = vmax.f32 %v3053_v30, 0.0  ;;  %v3107_v62 = vpop.f32.mrf.mxu0 }
 0x2ec   :  { %v3056_v36 = vpop.f32.mrf.mxu1  ;;  %v3108_v9 = vadd.f32 %v3107_v62, %v1464_v19  ;;  %v5425_v62 = vld [vmem:[#allocation13] sm:$0xff]  }
 0x2ed   :  { %v3057_v23 = vadd.f32 %v3056_v36, %v3004_v31  ;;  %v3182_v26 = vmax.f32 %v3055_v24, 0.0  ;;  %v3109_v63 = vpop.f32.mrf.mxu0 }
 0x2ee   :  { %v3058_v27 = vpop.f32.mrf.mxu1  ;;  %4193 = vmatpush2.bf16.msra.mxu1 %v5404_v28  ;;  %v3110_v22 = vadd.f32 %v3109_v63, %v1460_v5 }
 0x2ef   :  { %v3059_v46 = vadd.f32 %v3058_v27, %v3006_v39  ;;  %4194 = vmatprep.subr.bf16.mxu1 %v5409_v33  ;;  %v3189_v49 = vmax.f32 %v3057_v23, 0.0  ;;  %v3111_v0 = vpop.f32.mrf.mxu0 }
 0x2f0   :  { %v3062_v51 = vpop.f32.mrf.mxu1  ;;  %v3112_v13 = vadd.f32 %v3111_v0, %v1464_v19 }
 0x2f1   :  { %v3190_v54 = vmax.f32 %v3059_v46, 0.0  ;;  %v3213_v32 = vpack.c.bf16 %v3189_v49, %v3181_v47  ;;  %v3063_v38 = vadd.f32 %v3062_v51, %v3010_v44  ;;  %v3115_v4 = vpop.f32.mrf.mxu0 }
 0x2f2   :  { %v3064_v17 = vpop.f32.mrf.mxu1  ;;  %4195 = vmatpush2.bf16.msra.mxu1 %v5407_v55  ;;  %v3116_v30 = vadd.f32 %v3115_v4, %v1460_v5 }
 0x2f3   :  { %v3214_v50 = vpack.c.bf16 %v3190_v54, %v3182_v26  ;;  %v3065_v56 = vadd.f32 %v3064_v17, %v3012_v48  ;;  %v3197_v58 = vmax.f32 %v3063_v38, 0.0  ;;  %v3117_v7 = vpop.f32.mrf.mxu0  ;;  %v5415_v38 = vld [vmem:[#allocation13 + $0x28] sm:$0xff]  }
 0x2f4   :  { %v3066_v53 = vpop.f32.mrf.mxu1  ;;  %v3118_v24 = vadd.f32 %v3117_v7, %v1464_v19 }
 0x2f5   :  { %v3067_v37 = vadd.f32 %v3066_v53, %v3014_v12  ;;  %4143 = vmatprep.mubr.bf16.mxu0 %v3214_v50  ;;  %v3198_v18 = vmax.f32 %v3065_v56, 0.0  ;;  %v3119_v21 = vpop.f32.mrf.mxu0  ;;  %v5411_v53 = vld [vmem:[#allocation13 + $0x38] sm:$0xff]   ;;  %v5413_v56 = vld [vmem:[#allocation13 + $0x30] sm:$0xff]  }
 0x2f6   :  { %v3068_v40 = vpop.f32.mrf.mxu1  ;;  %4144 = vmatmul.mubr.bf16.vlgmr.msra.gmra.mxu0 %v3213_v32  ;;  %v3120_v23 = vadd.f32 %v3119_v21, %v1460_v5  ;;  %v5410_v32 = vld [vmem:[#allocation13 + $0x78] sm:$0xff]   ;;  %v3353_v21 = vld [vmem:[%s5856_s6] sm:$0x3] }
 0x2f7   :  { %v3069_v52 = vadd.f32 %v3068_v40, %v3016_v35  ;;  %v3205_v41 = vmax.f32 %v3067_v37, 0.0  ;;  %v3121_v36 = vpop.f32.mrf.mxu0  ;;  %v5412_v35 = vld [vmem:[#allocation13 + $0x70] sm:$0xff]   ;;  %4966 = vmatprep.subr.bf16.mxu0 %v5410_v32  ;;  %4994 = vmatprep.subr.bf16.mxu1 %v5410_v32  ;;  %v5414_v37 = vld [vmem:[#allocation13 + $0x68] sm:$0xff]   ;;  %v5416_v40 = vld [vmem:[#allocation13 + $0x60] sm:$0xff]  }
 0x2f8   :  { %v3122_v46 = vadd.f32 %v3121_v36, %v1464_v19  ;;  %4967 = vmatpush3.bf16.msra.mxu0 %v5411_v53 }
 0x2f9   :  { %v3206_v57 = vmax.f32 %v3069_v52, 0.0  ;;  %v3221_v60 = vpack.c.bf16 %v3205_v41, %v3197_v58  ;;  %4968 = vmatprep.subr.bf16.mxu0 %v5412_v35  ;;  %v5417_v52 = vld [vmem:[#allocation13 + $0x20] sm:$0xff]   ;;  %v5418_v41 = vld [vmem:[#allocation13 + $0x58] sm:$0xff]   ;;  %v5421_v58 = vld [vmem:[#allocation13 + $0x10] sm:$0xff]  }
 0x2fb   :  { %v3222_v59 = vpack.c.bf16 %v3206_v57, %v3198_v18  ;;  %v5419_v18 = vld [vmem:[#allocation13 + $0x18] sm:$0xff]   ;;  %v5420_v57 = vld [vmem:[#allocation13 + $0x50] sm:$0xff]  }
 0x2fc   :  { %4969 = vmatpush3.bf16.msra.mxu0 %v5413_v56 }
 0x2fd   :  { %4153 = vmatprep.mubr.bf16.mxu0 %v3222_v59  ;;  %4970 = vmatprep.subr.bf16.mxu0 %v5414_v37  ;;  %v5422_v59 = vld [vmem:[#allocation13 + $0x48] sm:$0xff]  }
 0x2fe   :  { %4154 = vmatmul.mubr.bf16.gmra.mxu0 %v3221_v60  ;;  %v5423_v60 = vld [vmem:[#allocation13 + $0x8] sm:$0xff]  }
 0x300   :  { %4971 = vmatpush3.bf16.msra.mxu0 %v5415_v38 }
 0x301   :  { %4972 = vmatprep.subr.bf16.mxu0 %v5416_v40 }
 0x304   :  { %4973 = vmatpush3.bf16.msra.mxu0 %v5417_v52 }
 0x305   :  { %4974 = vmatprep.subr.bf16.mxu0 %v5418_v41 }
 0x308   :  { %4975 = vmatpush3.bf16.msra.mxu0 %v5419_v18 }
 0x309   :  { %4976 = vmatprep.subr.bf16.mxu0 %v5420_v57 }
 0x30c   :  { %4977 = vmatpush3.bf16.msra.mxu0 %v5421_v58 }
 0x30d   :  { %4978 = vmatprep.subr.bf16.mxu0 %v5422_v59 }
 0x310   :  { %4979 = vmatpush3.bf16.msra.mxu0 %v5423_v60 }
 0x311   :  { %4980 = vmatprep.subr.bf16.mxu0 %v5424_v61 }
 0x314   :  { %4981 = vmatpush3.bf16.msra.mxu0 %v5425_v62 }
 0x329   :  { %v3158_v6 = vpop.f32.mrf.mxu1 }
 0x32a   :  { %v3159_v25 = vadd.f32 %v3158_v6, %v3106_v10 }
 0x32b   :  { %v3160_v8 = vpop.f32.mrf.mxu1 }
 0x32c   :  { %v3161_v14 = vadd.f32 %v3160_v8, %v3108_v9  ;;  %v3183_v2 = vmax.f32 %v3159_v25, 0.0 }
 0x32d   :  { %v3162_v11 = vpop.f32.mrf.mxu1 }
 0x32e   :  { %v3163_v20 = vadd.f32 %v3162_v11, %v3110_v22  ;;  %v3184_v33 = vmax.f32 %v3161_v14, 0.0 }
 0x32f   :  { %v3164_v28 = vpop.f32.mrf.mxu1 }
 0x330   :  { %v3165_v29 = vadd.f32 %v3164_v28, %v3112_v13  ;;  %v3191_v42 = vmax.f32 %v3163_v20, 0.0 }
 0x331   :  { %v3168_v31 = vpop.f32.mrf.mxu1 }
 0x332   :  { %v3192_v34 = vmax.f32 %v3165_v29, 0.0  ;;  %v3215_v27 = vpack.c.bf16 %v3191_v42, %v3183_v2  ;;  %v3169_v26 = vadd.f32 %v3168_v31, %v3116_v30  ;;  %v3362_v29 = vrot.slane %v3353_v21, %v5737_v43 }
 0x333   :  { %v3170_v39 = vpop.f32.mrf.mxu1  ;;  %v3358_v42 = vrot.slane %v3353_v21, %v5742_v16 }
 0x334   :  { %v3216_v45 = vpack.c.bf16 %v3192_v34, %v3184_v33  ;;  %v3171_v49 = vadd.f32 %v3170_v39, %v3118_v24  ;;  %v3199_v12 = vmax.f32 %v3169_v26, 0.0 }
 0x335   :  { %v3172_v55 = vpop.f32.mrf.mxu1  ;;  %v4039_v63 = vpop.f32.mrf.mxu0 }
 0x336   :  { %v3173_v51 = vadd.f32 %v3172_v55, %v3120_v23  ;;  %4196 = vmatprep.mubr.bf16.mxu1 %v3216_v45  ;;  %v3200_v17 = vmax.f32 %v3171_v49, 0.0  ;;  %v4040_v2 = vadd.f32 %v4039_v63, %v3358_v42 }
 0x337   :  { %v3174_v54 = vpop.f32.mrf.mxu1  ;;  %4197 = vmatmul.mubr.bf16.vlgmr.msra.gmra.mxu1 %v3215_v27  ;;  %v4041_v0 = vpop.f32.mrf.mxu0 }
 0x338   :  { %v3175_v15 = vadd.f32 %v3174_v54, %v3122_v46  ;;  %v3207_v47 = vmax.f32 %v3173_v51, 0.0  ;;  %5002 = vmatpush3.bf16.msra.mxu1 %v5411_v53  ;;  %v4042_v34 = vadd.f32 %v4041_v0, %v3362_v29 }
 0x339   :  { %4995 = vmatprep.subr.bf16.mxu1 %v5412_v35  ;;  %v4043_v1 = vpop.f32.mrf.mxu0 }
 0x33a   :  { %v3208_v48 = vmax.f32 %v3175_v15, 0.0  ;;  %v3223_v44 = vpack.c.bf16 %v3207_v47, %v3199_v12  ;;  %v4044_v36 = vadd.f32 %v4043_v1, %v3358_v42 }
 0x33b   :  { %v4045_v3 = vpop.f32.mrf.mxu0 }
 0x33c   :  { %v3224_v50 = vpack.c.bf16 %v3208_v48, %v3200_v17  ;;  %5003 = vmatpush3.bf16.msra.mxu1 %v5413_v56  ;;  %v4046_v24 = vadd.f32 %v4045_v3, %v3362_v29 }
 0x33d   :  { %4996 = vmatprep.subr.bf16.mxu1 %v5414_v37  ;;  %v4049_v4 = vpop.f32.mrf.mxu0 }
 0x33e   :  { %4206 = vmatprep.mubr.bf16.mxu1 %v3224_v50  ;;  %v4050_v32 = vadd.f32 %v4049_v4, %v3358_v42 }
 0x33f   :  { %4207 = vmatmul.mubr.bf16.gmra.mxu1 %v3223_v44  ;;  %v4051_v5 = vpop.f32.mrf.mxu0 }
 0x340   :  { %5004 = vmatpush3.bf16.msra.mxu1 %v5415_v38  ;;  %v4052_v12 = vadd.f32 %v4051_v5, %v3362_v29 }
 0x341   :  { %4997 = vmatprep.subr.bf16.mxu1 %v5416_v40  ;;  %v4053_v7 = vpop.f32.mrf.mxu0 }
 0x342   :  { %v4054_v50 = vadd.f32 %v4053_v7, %v3358_v42 }
 0x343   :  { %v4055_v9 = vpop.f32.mrf.mxu0 }
 0x344   :  { %5005 = vmatpush3.bf16.msra.mxu1 %v5417_v52  ;;  %v4056_v53 = vadd.f32 %v4055_v9, %v3362_v29 }
 0x345   :  { %4998 = vmatprep.subr.bf16.mxu1 %v5418_v41 }
 0x348   :  { %5006 = vmatpush3.bf16.msra.mxu1 %v5419_v18 }
 0x349   :  { %4999 = vmatprep.subr.bf16.mxu1 %v5420_v57 }
 0x34c   :  { %5007 = vmatpush3.bf16.msra.mxu1 %v5421_v58 }
 0x34d   :  { %5000 = vmatprep.subr.bf16.mxu1 %v5422_v59 }
 0x350   :  { %5008 = vmatpush3.bf16.msra.mxu1 %v5423_v60 }
 0x351   :  { %5001 = vmatprep.subr.bf16.mxu1 %v5424_v61 }
 0x354   :  { %5009 = vmatpush3.bf16.msra.mxu1 %v5425_v62 }
 0x375   :  { %v4092_v19 = vpop.f32.mrf.mxu1 }
 0x376   :  { %v4093_v30 = vadd.f32 %v4092_v19, %v4040_v2 }
 0x377   :  { %v4094_v6 = vpop.f32.mrf.mxu1 }
 0x378   :  { %v4095_v23 = vadd.f32 %v4094_v6, %v4042_v34 }
 0x379   :  { %v4096_v8 = vpop.f32.mrf.mxu1 }
 0x37a   :  { %v4097_v45 = vadd.f32 %v4096_v8, %v4044_v36 }
 0x37b   :  { %v4098_v22 = vpop.f32.mrf.mxu1 }
 0x37c   :  { %v4099_v46 = vadd.f32 %v4098_v22, %v4046_v24 }
 0x37d   :  { %v4102_v11 = vpop.f32.mrf.mxu1 }
 0x37e   :  { %v4103_v41 = vadd.f32 %v4102_v11, %v4050_v32 }
 0x37f   :  { %v4104_v14 = vpop.f32.mrf.mxu1 }
 0x380   :  { %v4105_v37 = vadd.f32 %v4104_v14, %v4052_v12 }
 0x381   :  { %v4106_v25 = vpop.f32.mrf.mxu1 }
 0x382   :  { %v4107_v38 = vadd.f32 %v4106_v25, %v4054_v50 }
 0x383   :  { %v4108_v31 = vpop.f32.mrf.mxu1 }
 0x384   :  { %v4109_v59 = vadd.f32 %v4108_v31, %v4056_v53 }
 0x3b6   :  { %v4145_v10 = vpop.f32.mrf.mxu0 }
 0x3b7   :  { %v4146_v26 = vadd.f32 %v4145_v10, %v4093_v30 }
 0x3b8   :  { %v4147_v13 = vpop.f32.mrf.mxu0 }
 0x3b9   :  { %v4148_v49 = vadd.f32 %v4147_v13, %v4095_v23 }
 0x3ba   :  { %v4149_v20 = vpop.f32.mrf.mxu0 }
 0x3bb   :  { %v4150_v51 = vadd.f32 %v4149_v20, %v4097_v45  ;;  %v4949_v20 = vld [vmem:[%s5858_s8] ss:$0 sm:$0xff]  ;;  %s5566_s8 = scalar_lea.vmem %s4423_s29, 512 }
 0x3bc   :  { %v4151_v28 = vpop.f32.mrf.mxu0  ;;  %p5567_p7 = scmp.ne.s32.totalorder %s4423_s29, %s5566_s8  ;;  %p5572_p9 = scmp.lt.s32.totalorder %s5566_s8, %s5566_s8 }
 0x3bd   :  { %v4152_v43 = vadd.f32 %v4151_v28, %v4099_v46 }
 0x3be   :  { %v4155_v33 = vpop.f32.mrf.mxu0  ;;  %p5573_p10 = por %p5572_p9, %p5571_p8 }
 0x3bf   :  { %v4156_v63 = vadd.f32 %v4155_v33, %v4103_v41 }
 0x3c0   :  { %v4157_v27 = vpop.f32.mrf.mxu0  ;;  %p5574_p11 = pnand %p5573_p10, %p5567_p7 }
 0x3c1   :  { %v4158_v60 = vadd.f32 %v4157_v27, %v4105_v37 }
 0x3c2   :  { %v4159_v47 = vpop.f32.mrf.mxu0 }
 0x3c3   :  { %v4160_v61 = vadd.f32 %v4159_v47, %v4107_v38 }
 0x3c4   :  { %v4161_v18 = vpop.f32.mrf.mxu0 }
 0x3c5   :  { %v4162_v3 = vadd.f32 %v4161_v18, %v4109_v59 }
 0x3f7   :  { %v4198_v39 = vpop.f32.mrf.mxu1 }
 0x3f8   :  { %v4199_v17 = vadd.f32 %v4198_v39, %v4146_v26 }
 0x3f9   :  { %v4200_v55 = vpop.f32.mrf.mxu1 }
 0x3fa   :  { %v4201_v15 = vadd.f32 %v4200_v55, %v4148_v49  ;;  %v4217_v57 = vmax.f32 %v4199_v17, 0.0 }
 0x3fb   :  { %v4202_v54 = vpop.f32.mrf.mxu1 }
 0x3fc   :  { %v4203_v16 = vadd.f32 %v4202_v54, %v4150_v51  ;;  %v4218_v40 = vmax.f32 %v4201_v15, 0.0 }
 0x3fd   :  { %v4204_v48 = vpop.f32.mrf.mxu1 }
 0x3fe   :  { %v4205_v44 = vadd.f32 %v4204_v48, %v4152_v43  ;;  %v4219_v35 = vmax.f32 %v4203_v16, 0.0 }
 0x3ff   :  { %v4208_v56 = vpop.f32.mrf.mxu1 }
 0x400   :  { %v4220_v52 = vmax.f32 %v4205_v44, 0.0  ;;  %v4225_v0 = vpack.c.bf16 %v4219_v35, %v4217_v57  ;;  %v4209_v5 = vadd.f32 %v4208_v56, %v4156_v63 }
 0x401   :  { %v4210_v58 = vpop.f32.mrf.mxu1 }
 0x402   :  { %v4226_v62 = vpack.c.bf16 %v4220_v52, %v4218_v40  ;;  %v4211_v4 = vadd.f32 %v4210_v58, %v4158_v60  ;;  %v4221_v10 = vmax.f32 %v4209_v5, 0.0 }
 0x403   :  { %v4212_v1 = vpop.f32.mrf.mxu1 }
 0x404   :  { %v4213_v19 = vadd.f32 %v4212_v1, %v4160_v61  ;;  %4396 = vmatprep.mubr.bf16.mxu0 %v4226_v62  ;;  %v4222_v9 = vmax.f32 %v4211_v4, 0.0 }
 0x405   :  { %v4214_v6 = vpop.f32.mrf.mxu1  ;;  %4397 = vmatmul.mubr.bf16.vlgmr.msra.gmra.mxu0 %v4225_v0 }
 0x406   :  { %v4215_v7 = vadd.f32 %v4214_v6, %v4162_v3  ;;  %v4223_v8 = vmax.f32 %v4213_v19, 0.0 }
 0x408   :  { %v4224_v22 = vmax.f32 %v4215_v7, 0.0  ;;  %v4227_v13 = vpack.c.bf16 %v4223_v8, %v4221_v10 }
 0x40a   :  { %v4228_v11 = vpack.c.bf16 %v4224_v22, %v4222_v9 }
 0x40c   :  { %4404 = vmatprep.mubr.bf16.mxu1 %v4228_v11 }
 0x40d   :  { %4405 = vmatmul.mubr.bf16.vlgmr.msra.gmra.mxu1 %v4227_v13 }
 0x4c5   :  { %v4982_v14 = vpop.f32.mrf.mxu0 }
 0x4c7   :  { %v4983_v21 = vpop.f32.mrf.mxu0 }
 0x4c8   :  { %v4984_v25 = vadd.f32 %v4983_v21, %v4982_v14 }
 0x4c9   :  { %v4985_v28 = vpop.f32.mrf.mxu0 }
 0x4ca   :  { %v4399_v29 = vadd.f32 %v4984_v25, %v4949_v20 }
 0x4cb   :  { %v4986_v42 = vpop.f32.mrf.mxu0 }
 0x4cc   :  { %4413 = vst [vmem:[#allocation14] sm:$0xff] %v4399_v29  ;;  %v4987_v31 = vadd.f32 %v4986_v42, %v4985_v28 }
 0x4cd   :  { %v4988_v33 = vpop.f32.mrf.mxu1 }
 0x4ce   :  { %v4402_v34 = vadd.f32 %v4987_v31, %v4949_v20 }
 0x4cf   :  { %v4989_v36 = vpop.f32.mrf.mxu1 }
 0x4d0   :  { %4414 = vst [vmem:[#allocation14 + $0x8] sm:$0xff] %v4402_v34  ;;  %v4990_v2 = vadd.f32 %v4989_v36, %v4988_v33 }
 0x4d1   :  { %v4991_v39 = vpop.f32.mrf.mxu1 }
 0x4d2   :  { %v4407_v24 = vadd.f32 %v4990_v2, %v4949_v20 }
 0x4d3   :  { %v4992_v23 = vpop.f32.mrf.mxu1 }
 0x4d4   :  { %4415 = vst [vmem:[#allocation14 + $0x10] sm:$0xff] %v4407_v24  ;;  %v4993_v45 = vadd.f32 %v4992_v23, %v4991_v39 }
 0x4d6   :  { %v4410_v30 = vadd.f32 %v4993_v45, %v4949_v20 }
 0x4d8   :  { %4416 = vst [vmem:[#allocation14 + $0x18] sm:$0xff] %v4410_v30 }
 0x4d9   :  { %5577 = shalt.err (!%p5574_p11)
}
 0x4da   :  { %4428 = dma.vmem_to_hbm [thread:$0]  %s4423_s29, 512, %s5859_s9, [#allocation4], %s5603_s25, %s5603_s25, %s5604_s26  }
 0x4db   :  { %5594 = dma.done.wait [#allocation4], 512  }
 0x4dc   :  { %5595 = vsyncadd [#allocation4], 4294966784 }
 0x4dd   :  { %4432 = vsyncpa [#allocation3], 1 }
 0x4de   :  { %4433 = vsyncpa [#allocation6], 1 }
 0x4df   :  { %4434 = vsyncpa [#allocation9], 1 }
 0x4e0   :  { %4435 = vsyncpa [#allocation12], 1 }
 0x4e1   :  { %4436 = vsyncpa [#allocation4], 1 }

</bundles_post_ra>
